<compile_context>
chip_gen: v7x
topology: tpu7x:2x2x1
jax: 0.10.0
libtpu: 0.0.40
codegen_flags: <defaults>
</compile_context>

<pallas_src>
import functools

import jax
import jax.numpy as jnp
from jax.experimental import pallas as pl
from jax.experimental.pallas import tpu as pltpu


# ----------------------------------------------------------------------------
# Fused kernel: one CAAM_WBY branch per grid step.
# ----------------------------------------------------------------------------
def _caam_branch_kernel(x_ref, wq_ref, wk_ref, wv_ref, pw_ref, pb_ref,
                        wcam_ref, bcam_ref, wout_ref, shift_ref, pool_ref,
                        out_ref, cls_ref, *, batch, num_heads, hw, cdtype):
    # x_ref   : (1, B*N, C)   raw (row-major) reshape of the NCHW branch input
    # wq/wk/wv: (1, C, C)     full-width qkv weights (softmax scale folded in wq)
    # pw_ref  : (1, C, C)     attention output projection;  pb_ref: (1, 1, C)
    # wcam_ref: (1, r, nc, N) conv_cam weight pre-permuted for the raw NCHW view
    # bcam_ref: (1, nc, 1)
    # wout_ref: (1, r, C, N)  conv_out weight with BN scale folded, pre-permuted
    # shift_ref:(1, C, 1)     BN shift (beta - scale*mean)
    # pool_ref: (HW, bins)    adaptive-avg-pool averaging matrix (fp32)
    # out_ref : (1, B, C, HW)   cls_ref: (1, B, nc, bins)
    _, BN, C = x_ref.shape
    B = batch
    N = BN // B
    D = C // num_heads
    r = C // hw
    nc = wcam_ref.shape[2]
    f32 = jnp.float32

    xc = x_ref[0]                       # (BN, C), compute dtype
    x3 = xc.reshape(B, N, C)            # leading split only (layout preserving)

    # ---- conv_cam (1x1) + adaptive avg-pool + sigmoid -----------------------
    # NCHW view: x[b, c, p] = x3[b, c // r, (c % r)*HW + p]  (C = r*HW), so the
    # 1x1 conv is a sum of r matmuls on static lane slices of x3.
    cam = None
    for i in range(r):
        w_i = jnp.broadcast_to(wcam_ref[0, i][None], (B, nc, N))
        t = jnp.einsum('bkn,bnp->bkp', w_i, x3[:, :, i * hw:(i + 1) * hw],
                       preferred_element_type=f32)
        cam = t if cam is None else cam + t                       # (B, nc, HW)
    pooled = jnp.einsum('bkp,pq->bkq', cam, pool_ref[...],
                        preferred_element_type=f32) + bcam_ref[0]  # (B, nc, bins)
    cls_ref[0] = jax.nn.sigmoid(pooled).astype(cls_ref.dtype)

    # ---- MAttention ----------------------------------------------------------
    q = jnp.dot(xc, wq_ref[0], preferred_element_type=f32).astype(cdtype)
    k = jnp.dot(xc, wk_ref[0], preferred_element_type=f32).astype(cdtype)
    v = jnp.dot(xc, wv_ref[0], preferred_element_type=f32).astype(cdtype)
    heads = []
    for h in range(num_heads):
        qh = q[:, h * D:(h + 1) * D].reshape(B, N, D)
        kh = k[:, h * D:(h + 1) * D].reshape(B, N, D)
        vh = v[:, h * D:(h + 1) * D].reshape(B, N, D)
        s = jnp.einsum('bnd,bmd->bnm', qh, kh, preferred_element_type=f32)
        s = s - jnp.max(s, axis=-1, keepdims=True)
        e = jnp.exp(s)
        attn = e * pl.reciprocal(jnp.sum(e, axis=-1, keepdims=True), approx=True)
        oh = jnp.einsum('bnm,bmd->bnd', attn.astype(cdtype), vh,
                        preferred_element_type=f32)
        heads.append(oh.astype(cdtype))
    o_cat = jnp.concatenate(heads, axis=-1).reshape(BN, C)          # (BN, C)
    ms = (jnp.dot(o_cat, pw_ref[0], preferred_element_type=f32)
          + pb_ref[0]).astype(cdtype)                               # (BN, C)

    # ---- conv_out (1x1, BN folded) + ReLU on the raw NCHW reinterpretation ---
    ms3 = ms.reshape(B, N, C)
    conv = None
    for i in range(r):
        w_i = jnp.broadcast_to(wout_ref[0, i][None], (B, C, N))
        t = jnp.einsum('bkn,bnp->bkp', w_i, ms3[:, :, i * hw:(i + 1) * hw],
                       preferred_element_type=f32)
        conv = t if conv is None else conv + t                      # (B, C, HW)
    out_ref[0] = jnp.maximum(conv + shift_ref[0], 0.0).astype(out_ref.dtype)


# ----------------------------------------------------------------------------
# Wrapper: parameter folding + one fused pallas_call (branch axis parallel)
# ----------------------------------------------------------------------------
def _pool_matrix(H, W, bh, bw):
    """(HW, bh*bw) averaging matrix of AdaptiveAvgPool2d when bins divide dims."""
    # TODO(synk): the real config uses bin_size=(32,32) on an 8x8 feature
    # (upsampling adaptive pool); this matrix form assumes bins divide H, W.
    assert H % bh == 0 and W % bw == 0
    wh, ww = H // bh, W // bw
    row_bin = jnp.arange(H) // wh
    col_bin = jnp.arange(W) // ww
    bin_idx = (row_bin[:, None] * bw + col_bin[None, :]).reshape(H * W, 1)
    onehot = (bin_idx == jnp.arange(bh * bw)[None, :]).astype(jnp.float32)
    return onehot / float(wh * ww)


def caam_wby_forward(x, y, p, *, num_heads, bin_size, num_classes,
                     compute_dtype=jnp.float32):
    B, C, H, W = x.shape
    HW = H * W
    N = HW
    BN = B * N
    bh, bw = bin_size
    bins = bh * bw
    D = C // num_heads
    assert C % num_heads == 0
    assert C % HW == 0, "kernel requires H*W to divide C (true for the real model)"
    assert H % bh == 0 and W % bw == 0
    r = C // HW
    dt = x.dtype
    cdt = compute_dtype
    scale = D ** (-0.5)
    eps = 1e-5

    # ---- one-time parameter folding (host side, traced under jit) ----------
    def prep_msa(mp):
        wq = mp['wr'][:, :C] * scale            # fold softmax scale into q
        wk = mp['wf'][:, C:2 * C]
        wv = mp['wf'][:, 2 * C:3 * C]
        return wq, wk, wv, mp['pw'], mp['pb'].reshape(1, C)

    def prep_cam(w, b):                          # w: (C, nc)
        w_r = w.T.reshape(num_classes, N, r).transpose(2, 0, 1)   # (r, nc, N)
        return w_r, b.reshape(num_classes, 1)

    def prep_out(w, bn):                         # w: (C_in, C_out)
        inv = bn['gamma'] / jnp.sqrt(bn['var'] + eps)
        w_fold = inv[:, None] * w.T                                # (C_out, C_in)
        w_r = w_fold.reshape(C, N, r).transpose(2, 0, 1)           # (r, C, N)
        shift = (bn['beta'] - inv * bn['mean']).reshape(C, 1)
        return w_r, shift

    mx, my = prep_msa(p['msa']), prep_msa(p['msa_y'])
    wq, wk, wv, pw, pb = [jnp.stack(t) for t in zip(mx, my)]
    wcam_x, bcam_x = prep_cam(p['conv_cam_w'], p['conv_cam_b'])
    wcam_y, bcam_y = prep_cam(p['conv_cam_y_w'], p['conv_cam_y_b'])
    wout_x, shift_x = prep_out(p['conv_out_w'], p['bn'])
    wout_y, shift_y = prep_out(p['conv_out_y_w'], p['bn_y'])

    wcam = jnp.stack([wcam_x, wcam_y]).astype(cdt)                # (2, r, nc, N)
    bcam = jnp.stack([bcam_x, bcam_y]).astype(jnp.float32)        # (2, nc, 1)
    wout = jnp.stack([wout_x, wout_y]).astype(cdt)                # (2, r, C, N)
    shift = jnp.stack([shift_x, shift_y]).astype(jnp.float32)     # (2, C, 1)
    pool = _pool_matrix(H, W, bh, bw)                             # (HW, bins)

    wq, wk, wv, pw = (wq.astype(cdt), wk.astype(cdt),
                      wv.astype(cdt), pw.astype(cdt))
    pb = pb.astype(jnp.float32)

    # PyTorch raw reshape (zero-copy): (B, C, H, W) -> (B*HW, C) per branch.
    x_nc = jnp.stack([x.reshape(BN, C), y.reshape(BN, C)]).astype(cdt)

    kern = functools.partial(_caam_branch_kernel, batch=B, num_heads=num_heads,
                             hw=HW, cdtype=cdt)

    flops = 2 * (2 * BN * C * C * 4                     # qkv + proj
                 + 2 * 2 * B * num_heads * N * N * D    # scores + PV
                 + 2 * B * C * C * HW                   # conv_out
                 + 2 * B * num_classes * C * HW         # conv_cam
                 + 2 * B * num_classes * HW * bins)     # pooling
    transcendentals = 2 * (B * num_heads * N * N + B * num_classes * bins)
    ins = (x_nc, wq, wk, wv, pw, pb, wcam, bcam, wout, shift, pool)
    bytes_accessed = int(sum(a.size * jnp.dtype(a.dtype).itemsize for a in ins)
                         + (2 * B * C * HW + 2 * B * num_classes * bins)
                         * jnp.dtype(dt).itemsize)

    out_br, cls_br = pl.pallas_call(
        kern,
        out_shape=(jax.ShapeDtypeStruct((2, B, C, HW), dt),
                   jax.ShapeDtypeStruct((2, B, num_classes, bins), dt)),
        grid=(2,),
        in_specs=[
            pl.BlockSpec((1, BN, C), lambda g: (g, 0, 0)),
            pl.BlockSpec((1, C, C), lambda g: (g, 0, 0)),
            pl.BlockSpec((1, C, C), lambda g: (g, 0, 0)),
            pl.BlockSpec((1, C, C), lambda g: (g, 0, 0)),
            pl.BlockSpec((1, C, C), lambda g: (g, 0, 0)),
            pl.BlockSpec((1, 1, C), lambda g: (g, 0, 0)),
            pl.BlockSpec((1, r, num_classes, N), lambda g: (g, 0, 0, 0)),
            pl.BlockSpec((1, num_classes, 1), lambda g: (g, 0, 0)),
            pl.BlockSpec((1, r, C, N), lambda g: (g, 0, 0, 0)),
            pl.BlockSpec((1, C, 1), lambda g: (g, 0, 0)),
            pl.BlockSpec((HW, bins), lambda g: (0, 0)),
        ],
        out_specs=(pl.BlockSpec((1, B, C, HW), lambda g: (g, 0, 0, 0)),
                   pl.BlockSpec((1, B, num_classes, bins), lambda g: (g, 0, 0, 0))),
        compiler_params=pltpu.CompilerParams(dimension_semantics=("parallel",)),
        cost_estimate=pl.CostEstimate(flops=flops,
                                      transcendentals=transcendentals,
                                      bytes_accessed=bytes_accessed),
    )(*ins)

    out = (out_br[0] + out_br[1]).reshape(B, C, H, W)
    cls = (cls_br[0] + cls_br[1]).reshape(B, num_classes, bh, bw)
    return out, cls


# ----------------------------------------------------------------------------
# Deterministic synthetic parameters (no checkpoint load)
# ----------------------------------------------------------------------------
def init_params(key, C, num_classes):
    s = 0.05
    ks = jax.random.split(key, 10)

    def n(k, shape):
        return jax.random.normal(k, shape, jnp.float32) * s

    def msa_params(k):
        k1, k2, k3, k4 = jax.random.split(k, 4)
        return dict(wr=n(k1, (C, 3 * C)), wf=n(k2, (C, 3 * C)),
                    pw=n(k3, (C, C)), pb=n(k4, (C,)))

    def bn_params(k):
        k1, k2, k3, k4 = jax.random.split(k, 4)
        return dict(gamma=1.0 + n(k1, (C,)), beta=n(k2, (C,)), mean=n(k3, (C,)),
                    var=jax.random.uniform(k4, (C,), jnp.float32, 0.5, 1.5))

    return dict(
        conv_cam_w=n(ks[0], (C, num_classes)), conv_cam_b=n(ks[1], (num_classes,)),
        conv_cam_y_w=n(ks[2], (C, num_classes)), conv_cam_y_b=n(ks[3], (num_classes,)),
        conv_out_w=n(ks[4], (C, C)), conv_out_y_w=n(ks[5], (C, C)),
        bn=bn_params(ks[6]), bn_y=bn_params(ks[7]),
        msa=msa_params(ks[8]), msa_y=msa_params(ks[9]),
    )


# ----------------------------------------------------------------------------
# Pure-JAX reference (PyTorch semantics, eval-mode BN, dropout p=0)
# ----------------------------------------------------------------------------
def _ref_mattention(x, mp, num_heads):
    B, C, H, W = x.shape
    N = H * W
    D = C // num_heads
    scale = D ** (-0.5)
    rgb = x.reshape(B, N, C)                      # raw reshape (PyTorch .reshape)

    def split(qkv):
        t = qkv.reshape(B, N, 3, num_heads, D).transpose(2, 0, 3, 1, 4)
        return t[0], t[1], t[2]

    qr, _, _ = split(rgb @ mp['wr'])
    _, kg, vg = split(rgb @ mp['wf'])
    attn = jax.nn.softmax(jnp.einsum('bhnd,bhmd->bhnm', qr, kg) * scale, axis=-1)
    o = jnp.einsum('bhnm,bhmd->bhnd', attn, vg)
    o = o.transpose(0, 2, 1, 3).reshape(B, N, C) @ mp['pw'] + mp['pb']
    return o.reshape(B, C, H, W)                  # raw reshape


def _ref_conv1x1(x, w):                            # w: (C_in, C_out)
    return jnp.einsum('bchw,ck->bkhw', x, w)


def _ref_bn_relu(z, bn, eps=1e-5):
    inv = bn['gamma'] / jnp.sqrt(bn['var'] + eps)
    zz = ((z - bn['mean'][None, :, None, None]) * inv[None, :, None, None]
          + bn['beta'][None, :, None, None])
    return jnp.maximum(zz, 0.0)


def _ref_pool_sigmoid(cam, bin_size):
    B, nc, H, W = cam.shape
    bh, bw = bin_size
    pooled = cam.reshape(B, nc, bh, H // bh, bw, W // bw).mean(axis=(3, 5))
    return jax.nn.sigmoid(pooled)


def _ref_caam(x, y, p, num_heads, bin_size):
    def branch(inp, cam_w, cam_b, msa, out_w, bn):
        cam = _ref_conv1x1(inp, cam_w) + cam_b[None, :, None, None]
        cls = _ref_pool_sigmoid(cam, bin_size)
        out = _ref_bn_relu(
            _ref_conv1x1(_ref_mattention(inp, msa, num_heads), out_w), bn)
        return out, cls

    ox, cx = branch(x, p['conv_cam_w'], p['conv_cam_b'], p['msa'],
                    p['conv_out_w'], p['bn'])
    oy, cy = branch(y, p['conv_cam_y_w'], p['conv_cam_y_b'], p['msa_y'],
                    p['conv_out_y_w'], p['bn_y'])
    return ox + oy, cx + cy


# ----------------------------------------------------------------------------
# Main
# ----------------------------------------------------------------------------
if __name__ == "__main__":
    # Small shapes consistent with CAAM_WBY(dim, 1, bins): 8x8 spatial, HW | C.
    B, C, H, W = 2, 128, 8, 8
    num_classes = 1
    num_heads = 4            # MAttention default
    bin_size = (4, 4)

    key = jax.random.PRNGKey(0)
    kx, ky, kp = jax.random.split(key, 3)
    x = jax.random.normal(kx, (B, C, H, W), jnp.float32)
    y = jax.random.normal(ky, (B, C, H, W), jnp.float32)
    params = init_params(kp, C, num_classes)

    with jax.default_matmul_precision("highest"):
        ref_out, ref_cls = _ref_caam(x, y, params, num_heads, bin_size)

    # fp32 compute path (tight check).
    fwd32 = jax.jit(functools.partial(
        caam_wby_forward, num_heads=num_heads, bin_size=bin_size,
        num_classes=num_classes, compute_dtype=jnp.float32))
    out, cls_score = jax.block_until_ready(fwd32(x, y, params))
    assert out.shape == (B, C, H, W)
    assert cls_score.shape == (B, num_classes, *bin_size)
    assert jnp.allclose(out, ref_out, atol=5e-3, rtol=5e-3), "out mismatch (fp32)"
    assert jnp.allclose(cls_score, ref_cls, atol=3e-3, rtol=3e-3), "cls mismatch (fp32)"

    # bf16 matmul-operand path (v6e/v7x fast path, loose check).
    fwd16 = jax.jit(functools.partial(
        caam_wby_forward, num_heads=num_heads, bin_size=bin_size,
        num_classes=num_classes, compute_dtype=jnp.bfloat16))
    out16, cls16 = jax.block_until_ready(fwd16(x, y, params))
    assert jnp.allclose(out16, ref_out, atol=7e-2, rtol=7e-2), "out mismatch (bf16)"
    assert jnp.allclose(cls16, ref_cls, atol=7e-2, rtol=7e-2), "cls mismatch (bf16)"

    print("KERNEL_OK")
</pallas_src>

<mosaic_0001>
module attributes {stable_mosaic.version = 11 : i64} {
  func.func @_caam_branch_kernel(%arg0: i32, %arg1: memref<1x128x128xf32, #tpu.memory_space<vmem>>, %arg2: memref<1x128x128xf32, #tpu.memory_space<vmem>>, %arg3: memref<1x128x128xf32, #tpu.memory_space<vmem>>, %arg4: memref<1x128x128xf32, #tpu.memory_space<vmem>>, %arg5: memref<1x128x128xf32, #tpu.memory_space<vmem>>, %arg6: memref<1x1x128xf32, #tpu.memory_space<vmem>>, %arg7: memref<1x2x1x64xf32, #tpu.memory_space<vmem>>, %arg8: memref<1x1x1xf32, #tpu.memory_space<vmem>>, %arg9: memref<1x2x128x64xf32, #tpu.memory_space<vmem>>, %arg10: memref<1x128x1xf32, #tpu.memory_space<vmem>>, %arg11: memref<64x16xf32, #tpu.memory_space<vmem>>, %arg12: memref<1x2x128x64xf32, #tpu.memory_space<vmem>>, %arg13: memref<1x2x1x16xf32, #tpu.memory_space<vmem>>) attributes {dimension_semantics = [#tpu.dimension_semantics<parallel>], iteration_bounds = array<i64: 2>, scalar_prefetch = 0 : i64, scratch_operands = 0 : i64, tpu.core_type = #tpu.core_type<tc>, window_params = [{transform_indices = @transform_0, window_bounds = array<i64: 1, 128, 128>}, {transform_indices = @transform_1, window_bounds = array<i64: 1, 128, 128>}, {transform_indices = @transform_2, window_bounds = array<i64: 1, 128, 128>}, {transform_indices = @transform_3, window_bounds = array<i64: 1, 128, 128>}, {transform_indices = @transform_4, window_bounds = array<i64: 1, 128, 128>}, {transform_indices = @transform_5, window_bounds = array<i64: 1, 1, 128>}, {transform_indices = @transform_6, window_bounds = array<i64: 1, 2, 1, 64>}, {transform_indices = @transform_7, window_bounds = array<i64: 1, 1, 1>}, {transform_indices = @transform_8, window_bounds = array<i64: 1, 2, 128, 64>}, {transform_indices = @transform_9, window_bounds = array<i64: 1, 128, 1>}, {pipeline_mode = #tpu.pipeline_mode<synchronous>, transform_indices = @transform_10, window_bounds = array<i64: 64, 16>}, {transform_indices = @transform_11, window_bounds = array<i64: 1, 2, 128, 64>}, {transform_indices = @transform_12, window_bounds = array<i64: 1, 2, 1, 16>}]} {
    %c0 = arith.constant 0 : index
    %c0_0 = arith.constant 0 : index
    %c0_1 = arith.constant 0 : index
    %0 = vector.load %arg1[%c0, %c0_0, %c0_1] : memref<1x128x128xf32, #tpu.memory_space<vmem>>, vector<1x128x128xf32>
    %1 = vector.shape_cast %0 : vector<1x128x128xf32> to vector<128x128xf32>
    %2 = vector.shape_cast %1 : vector<128x128xf32> to vector<2x64x128xf32>
    %c0_2 = arith.constant 0 : index
    %c0_3 = arith.constant 0 : index
    %c0_4 = arith.constant 0 : index
    %c0_5 = arith.constant 0 : index
    %3 = vector.load %arg7[%c0_2, %c0_3, %c0_4, %c0_5] : memref<1x2x1x64xf32, #tpu.memory_space<vmem>>, vector<1x1x1x64xf32>
    %4 = vector.shape_cast %3 : vector<1x1x1x64xf32> to vector<1x64xf32>
    %5 = vector.shape_cast %4 : vector<1x64xf32> to vector<1x1x64xf32>
    %6 = vector.shape_cast %5 : vector<1x1x64xf32> to vector<1x1x64xf32>
    %7 = vector.broadcast %6 : vector<1x1x64xf32> to vector<2x1x64xf32>
    %8 = vector.extract_strided_slice %2 {offsets = [0, 0, 0], sizes = [2, 64, 64], strides = [1, 1, 1]} : vector<2x64x128xf32> to vector<2x64x64xf32>
    "tpu.trace_start"() <{level = 10 : i32, message = "bkn,bnp->bkp"}> : () -> ()
    %cst = arith.constant dense<0.000000e+00> : vector<2x1x64xf32>
    %9 = tpu.matmul %7, %8, %cst {dimension_numbers = #tpu.dot_dimension_numbers<[2], [1], [1], [2], [0, 0, 0, 1, 1, 2], [0], [0]>} : vector<2x1x64xf32>, vector<2x64x64xf32>, vector<2x1x64xf32> -> vector<2x1x64xf32>
    "tpu.trace_stop"() : () -> ()
    %c0_6 = arith.constant 0 : index
    %c1 = arith.constant 1 : index
    %c0_7 = arith.constant 0 : index
    %c0_8 = arith.constant 0 : index
    %10 = vector.load %arg7[%c0_6, %c1, %c0_7, %c0_8] : memref<1x2x1x64xf32, #tpu.memory_space<vmem>>, vector<1x1x1x64xf32>
    %11 = vector.shape_cast %10 : vector<1x1x1x64xf32> to vector<1x64xf32>
    %12 = vector.shape_cast %11 : vector<1x64xf32> to vector<1x1x64xf32>
    %13 = vector.shape_cast %12 : vector<1x1x64xf32> to vector<1x1x64xf32>
    %14 = vector.broadcast %13 : vector<1x1x64xf32> to vector<2x1x64xf32>
    %15 = vector.extract_strided_slice %2 {offsets = [0, 0, 64], sizes = [2, 64, 64], strides = [1, 1, 1]} : vector<2x64x128xf32> to vector<2x64x64xf32>
    "tpu.trace_start"() <{level = 10 : i32, message = "bkn,bnp->bkp"}> : () -> ()
    %cst_9 = arith.constant dense<0.000000e+00> : vector<2x1x64xf32>
    %16 = tpu.matmul %14, %15, %cst_9 {dimension_numbers = #tpu.dot_dimension_numbers<[2], [1], [1], [2], [0, 0, 0, 1, 1, 2], [0], [0]>} : vector<2x1x64xf32>, vector<2x64x64xf32>, vector<2x1x64xf32> -> vector<2x1x64xf32>
    "tpu.trace_stop"() : () -> ()
    %17 = arith.addf %9, %16 : vector<2x1x64xf32>
    %c0_10 = arith.constant 0 : index
    %c0_11 = arith.constant 0 : index
    %18 = vector.load %arg11[%c0_10, %c0_11] : memref<64x16xf32, #tpu.memory_space<vmem>>, vector<64x16xf32>
    "tpu.trace_start"() <{level = 10 : i32, message = "bkp,pq->bkq"}> : () -> ()
    %cst_12 = arith.constant dense<0.000000e+00> : vector<2x1x16xf32>
    %19 = tpu.matmul %17, %18, %cst_12 {dimension_numbers = #tpu.dot_dimension_numbers<[2], [0], [0, 1], [1], [0, 0, 0, 1, 1, 1], [], []>} : vector<2x1x64xf32>, vector<64x16xf32>, vector<2x1x16xf32> -> vector<2x1x16xf32>
    "tpu.trace_stop"() : () -> ()
    %c0_13 = arith.constant 0 : index
    %c0_14 = arith.constant 0 : index
    %c0_15 = arith.constant 0 : index
    %20 = vector.load %arg8[%c0_13, %c0_14, %c0_15] : memref<1x1x1xf32, #tpu.memory_space<vmem>>, vector<1x1x1xf32>
    %21 = vector.shape_cast %20 : vector<1x1x1xf32> to vector<1x1xf32>
    %22 = vector.shape_cast %21 : vector<1x1xf32> to vector<1x1x1xf32>
    %23 = vector.broadcast %22 : vector<1x1x1xf32> to vector<2x1x16xf32>
    %24 = arith.addf %19, %23 : vector<2x1x16xf32>
    %25 = arith.negf %24 : vector<2x1x16xf32>
    %26 = math.exp %25 : vector<2x1x16xf32>
    %cst_16 = arith.constant 1.000000e+00 : f32
    %27 = vector.broadcast %cst_16 : f32 to vector<2x1x16xf32>
    %28 = arith.addf %27, %26 : vector<2x1x16xf32>
    %29 = arith.divf %27, %28 : vector<2x1x16xf32>
    %c0_17 = arith.constant 0 : index
    %c0_18 = arith.constant 0 : index
    %c0_19 = arith.constant 0 : index
    %c0_20 = arith.constant 0 : index
    %30 = vector.load %arg13[%c0_17, %c0_18, %c0_19, %c0_20] : memref<1x2x1x16xf32, #tpu.memory_space<vmem>>, vector<1x2x1x16xf32>
    %31 = vector.shape_cast %30 : vector<1x2x1x16xf32> to vector<2x1x16xf32>
    %32 = vector.shape_cast %29 : vector<2x1x16xf32> to vector<1x2x1x16xf32>
    tpu.vector_store %arg13[%c0_17, %c0_18, %c0_19, %c0_20], %32 {strides = array<i32>} : memref<1x2x1x16xf32, #tpu.memory_space<vmem>>, vector<1x2x1x16xf32>,
    %c0_21 = arith.constant 0 : index
    %c0_22 = arith.constant 0 : index
    %c0_23 = arith.constant 0 : index
    %33 = vector.load %arg2[%c0_21, %c0_22, %c0_23] : memref<1x128x128xf32, #tpu.memory_space<vmem>>, vector<1x128x128xf32>
    %34 = vector.shape_cast %33 : vector<1x128x128xf32> to vector<128x128xf32>
    %cst_24 = arith.constant dense<0.000000e+00> : vector<128x128xf32>
    %35 = tpu.matmul %1, %34, %cst_24 {dimension_numbers = #tpu.dot_dimension_numbers<[1], [0], [0], [1], [0, 0, 1, 1], [], []>} : vector<128x128xf32>, vector<128x128xf32>, vector<128x128xf32> -> vector<128x128xf32>
    %c0_25 = arith.constant 0 : index
    %c0_26 = arith.constant 0 : index
    %c0_27 = arith.constant 0 : index
    %36 = vector.load %arg3[%c0_25, %c0_26, %c0_27] : memref<1x128x128xf32, #tpu.memory_space<vmem>>, vector<1x128x128xf32>
    %37 = vector.shape_cast %36 : vector<1x128x128xf32> to vector<128x128xf32>
    %cst_28 = arith.constant dense<0.000000e+00> : vector<128x128xf32>
    %38 = tpu.matmul %1, %37, %cst_28 {dimension_numbers = #tpu.dot_dimension_numbers<[1], [0], [0], [1], [0, 0, 1, 1], [], []>} : vector<128x128xf32>, vector<128x128xf32>, vector<128x128xf32> -> vector<128x128xf32>
    %c0_29 = arith.constant 0 : index
    %c0_30 = arith.constant 0 : index
    %c0_31 = arith.constant 0 : index
    %39 = vector.load %arg4[%c0_29, %c0_30, %c0_31] : memref<1x128x128xf32, #tpu.memory_space<vmem>>, vector<1x128x128xf32>
    %40 = vector.shape_cast %39 : vector<1x128x128xf32> to vector<128x128xf32>
    %cst_32 = arith.constant dense<0.000000e+00> : vector<128x128xf32>
    %41 = tpu.matmul %1, %40, %cst_32 {dimension_numbers = #tpu.dot_dimension_numbers<[1], [0], [0], [1], [0, 0, 1, 1], [], []>} : vector<128x128xf32>, vector<128x128xf32>, vector<128x128xf32> -> vector<128x128xf32>
    %42 = vector.extract_strided_slice %35 {offsets = [0, 0], sizes = [128, 32], strides = [1, 1]} : vector<128x128xf32> to vector<128x32xf32>
    %43 = vector.shape_cast %42 : vector<128x32xf32> to vector<2x64x32xf32>
    %44 = vector.extract_strided_slice %38 {offsets = [0, 0], sizes = [128, 32], strides = [1, 1]} : vector<128x128xf32> to vector<128x32xf32>
    %45 = vector.shape_cast %44 : vector<128x32xf32> to vector<2x64x32xf32>
    %46 = vector.extract_strided_slice %41 {offsets = [0, 0], sizes = [128, 32], strides = [1, 1]} : vector<128x128xf32> to vector<128x32xf32>
    %47 = vector.shape_cast %46 : vector<128x32xf32> to vector<2x64x32xf32>
    "tpu.trace_start"() <{level = 10 : i32, message = "bnd,bmd->bnm"}> : () -> ()
    %cst_33 = arith.constant dense<0.000000e+00> : vector<2x64x64xf32>
    %48 = tpu.matmul %43, %45, %cst_33 {dimension_numbers = #tpu.dot_dimension_numbers<[2], [2], [1], [1], [0, 0, 0, 1, 1, 1], [0], [0]>} : vector<2x64x32xf32>, vector<2x64x32xf32>, vector<2x64x64xf32> -> vector<2x64x64xf32>
    "tpu.trace_stop"() : () -> ()
    %cst_34 = arith.constant dense<0xFF800000> : vector<2x64xf32>
    %49 = vector.multi_reduction <maximumf>, %48, %cst_34 [2] : vector<2x64x64xf32> to vector<2x64xf32>
    %50 = vector.shape_cast %49 : vector<2x64xf32> to vector<2x64x1xf32>
    %51 = vector.broadcast %50 : vector<2x64x1xf32> to vector<2x64x64xf32>
    %52 = arith.subf %48, %51 : vector<2x64x64xf32>
    %53 = math.exp %52 : vector<2x64x64xf32>
    %cst_35 = arith.constant dense<0.000000e+00> : vector<2x64xf32>
    %54 = vector.multi_reduction <add>, %53, %cst_35 [2] : vector<2x64x64xf32> to vector<2x64xf32>
    %55 = vector.shape_cast %54 : vector<2x64xf32> to vector<2x64x1xf32>
    %56 = tpu.reciprocal %55 {approx = true} : vector<2x64x1xf32> -> vector<2x64x1xf32>
    %57 = vector.broadcast %56 : vector<2x64x1xf32> to vector<2x64x64xf32>
    %58 = arith.mulf %53, %57 : vector<2x64x64xf32>
    "tpu.trace_start"() <{level = 10 : i32, message = "bnm,bmd->bnd"}> : () -> ()
    %cst_36 = arith.constant dense<0.000000e+00> : vector<2x64x32xf32>
    %59 = tpu.matmul %58, %47, %cst_36 {dimension_numbers = #tpu.dot_dimension_numbers<[2], [1], [1], [2], [0, 0, 0, 1, 1, 2], [0], [0]>} : vector<2x64x64xf32>, vector<2x64x32xf32>, vector<2x64x32xf32> -> vector<2x64x32xf32>
    "tpu.trace_stop"() : () -> ()
    %60 = vector.extract_strided_slice %35 {offsets = [0, 32], sizes = [128, 32], strides = [1, 1]} : vector<128x128xf32> to vector<128x32xf32>
    %61 = vector.shape_cast %60 : vector<128x32xf32> to vector<2x64x32xf32>
    %62 = vector.extract_strided_slice %38 {offsets = [0, 32], sizes = [128, 32], strides = [1, 1]} : vector<128x128xf32> to vector<128x32xf32>
    %63 = vector.shape_cast %62 : vector<128x32xf32> to vector<2x64x32xf32>
    %64 = vector.extract_strided_slice %41 {offsets = [0, 32], sizes = [128, 32], strides = [1, 1]} : vector<128x128xf32> to vector<128x32xf32>
    %65 = vector.shape_cast %64 : vector<128x32xf32> to vector<2x64x32xf32>
    "tpu.trace_start"() <{level = 10 : i32, message = "bnd,bmd->bnm"}> : () -> ()
    %cst_37 = arith.constant dense<0.000000e+00> : vector<2x64x64xf32>
    %66 = tpu.matmul %61, %63, %cst_37 {dimension_numbers = #tpu.dot_dimension_numbers<[2], [2], [1], [1], [0, 0, 0, 1, 1, 1], [0], [0]>} : vector<2x64x32xf32>, vector<2x64x32xf32>, vector<2x64x64xf32> -> vector<2x64x64xf32>
    "tpu.trace_stop"() : () -> ()
    %cst_38 = arith.constant dense<0xFF800000> : vector<2x64xf32>
    %67 = vector.multi_reduction <maximumf>, %66, %cst_38 [2] : vector<2x64x64xf32> to vector<2x64xf32>
    %68 = vector.shape_cast %67 : vector<2x64xf32> to vector<2x64x1xf32>
    %69 = vector.broadcast %68 : vector<2x64x1xf32> to vector<2x64x64xf32>
    %70 = arith.subf %66, %69 : vector<2x64x64xf32>
    %71 = math.exp %70 : vector<2x64x64xf32>
    %cst_39 = arith.constant dense<0.000000e+00> : vector<2x64xf32>
    %72 = vector.multi_reduction <add>, %71, %cst_39 [2] : vector<2x64x64xf32> to vector<2x64xf32>
    %73 = vector.shape_cast %72 : vector<2x64xf32> to vector<2x64x1xf32>
    %74 = tpu.reciprocal %73 {approx = true} : vector<2x64x1xf32> -> vector<2x64x1xf32>
    %75 = vector.broadcast %74 : vector<2x64x1xf32> to vector<2x64x64xf32>
    %76 = arith.mulf %71, %75 : vector<2x64x64xf32>
    "tpu.trace_start"() <{level = 10 : i32, message = "bnm,bmd->bnd"}> : () -> ()
    %cst_40 = arith.constant dense<0.000000e+00> : vector<2x64x32xf32>
    %77 = tpu.matmul %76, %65, %cst_40 {dimension_numbers = #tpu.dot_dimension_numbers<[2], [1], [1], [2], [0, 0, 0, 1, 1, 2], [0], [0]>} : vector<2x64x64xf32>, vector<2x64x32xf32>, vector<2x64x32xf32> -> vector<2x64x32xf32>
    "tpu.trace_stop"() : () -> ()
    %78 = vector.extract_strided_slice %35 {offsets = [0, 64], sizes = [128, 32], strides = [1, 1]} : vector<128x128xf32> to vector<128x32xf32>
    %79 = vector.shape_cast %78 : vector<128x32xf32> to vector<2x64x32xf32>
    %80 = vector.extract_strided_slice %38 {offsets = [0, 64], sizes = [128, 32], strides = [1, 1]} : vector<128x128xf32> to vector<128x32xf32>
    %81 = vector.shape_cast %80 : vector<128x32xf32> to vector<2x64x32xf32>
    %82 = vector.extract_strided_slice %41 {offsets = [0, 64], sizes = [128, 32], strides = [1, 1]} : vector<128x128xf32> to vector<128x32xf32>
    %83 = vector.shape_cast %82 : vector<128x32xf32> to vector<2x64x32xf32>
    "tpu.trace_start"() <{level = 10 : i32, message = "bnd,bmd->bnm"}> : () -> ()
    %cst_41 = arith.constant dense<0.000000e+00> : vector<2x64x64xf32>
    %84 = tpu.matmul %79, %81, %cst_41 {dimension_numbers = #tpu.dot_dimension_numbers<[2], [2], [1], [1], [0, 0, 0, 1, 1, 1], [0], [0]>} : vector<2x64x32xf32>, vector<2x64x32xf32>, vector<2x64x64xf32> -> vector<2x64x64xf32>
    "tpu.trace_stop"() : () -> ()
    %cst_42 = arith.constant dense<0xFF800000> : vector<2x64xf32>
    %85 = vector.multi_reduction <maximumf>, %84, %cst_42 [2] : vector<2x64x64xf32> to vector<2x64xf32>
    %86 = vector.shape_cast %85 : vector<2x64xf32> to vector<2x64x1xf32>
    %87 = vector.broadcast %86 : vector<2x64x1xf32> to vector<2x64x64xf32>
    %88 = arith.subf %84, %87 : vector<2x64x64xf32>
    %89 = math.exp %88 : vector<2x64x64xf32>
    %cst_43 = arith.constant dense<0.000000e+00> : vector<2x64xf32>
    %90 = vector.multi_reduction <add>, %89, %cst_43 [2] : vector<2x64x64xf32> to vector<2x64xf32>
    %91 = vector.shape_cast %90 : vector<2x64xf32> to vector<2x64x1xf32>
    %92 = tpu.reciprocal %91 {approx = true} : vector<2x64x1xf32> -> vector<2x64x1xf32>
    %93 = vector.broadcast %92 : vector<2x64x1xf32> to vector<2x64x64xf32>
    %94 = arith.mulf %89, %93 : vector<2x64x64xf32>
    "tpu.trace_start"() <{level = 10 : i32, message = "bnm,bmd->bnd"}> : () -> ()
    %cst_44 = arith.constant dense<0.000000e+00> : vector<2x64x32xf32>
    %95 = tpu.matmul %94, %83, %cst_44 {dimension_numbers = #tpu.dot_dimension_numbers<[2], [1], [1], [2], [0, 0, 0, 1, 1, 2], [0], [0]>} : vector<2x64x64xf32>, vector<2x64x32xf32>, vector<2x64x32xf32> -> vector<2x64x32xf32>
    "tpu.trace_stop"() : () -> ()
    %96 = vector.extract_strided_slice %35 {offsets = [0, 96], sizes = [128, 32], strides = [1, 1]} : vector<128x128xf32> to vector<128x32xf32>
    %97 = vector.shape_cast %96 : vector<128x32xf32> to vector<2x64x32xf32>
    %98 = vector.extract_strided_slice %38 {offsets = [0, 96], sizes = [128, 32], strides = [1, 1]} : vector<128x128xf32> to vector<128x32xf32>
    %99 = vector.shape_cast %98 : vector<128x32xf32> to vector<2x64x32xf32>
    %100 = vector.extract_strided_slice %41 {offsets = [0, 96], sizes = [128, 32], strides = [1, 1]} : vector<128x128xf32> to vector<128x32xf32>
    %101 = vector.shape_cast %100 : vector<128x32xf32> to vector<2x64x32xf32>
    "tpu.trace_start"() <{level = 10 : i32, message = "bnd,bmd->bnm"}> : () -> ()
    %cst_45 = arith.constant dense<0.000000e+00> : vector<2x64x64xf32>
    %102 = tpu.matmul %97, %99, %cst_45 {dimension_numbers = #tpu.dot_dimension_numbers<[2], [2], [1], [1], [0, 0, 0, 1, 1, 1], [0], [0]>} : vector<2x64x32xf32>, vector<2x64x32xf32>, vector<2x64x64xf32> -> vector<2x64x64xf32>
    "tpu.trace_stop"() : () -> ()
    %cst_46 = arith.constant dense<0xFF800000> : vector<2x64xf32>
    %103 = vector.multi_reduction <maximumf>, %102, %cst_46 [2] : vector<2x64x64xf32> to vector<2x64xf32>
    %104 = vector.shape_cast %103 : vector<2x64xf32> to vector<2x64x1xf32>
    %105 = vector.broadcast %104 : vector<2x64x1xf32> to vector<2x64x64xf32>
    %106 = arith.subf %102, %105 : vector<2x64x64xf32>
    %107 = math.exp %106 : vector<2x64x64xf32>
    %cst_47 = arith.constant dense<0.000000e+00> : vector<2x64xf32>
    %108 = vector.multi_reduction <add>, %107, %cst_47 [2] : vector<2x64x64xf32> to vector<2x64xf32>
    %109 = vector.shape_cast %108 : vector<2x64xf32> to vector<2x64x1xf32>
    %110 = tpu.reciprocal %109 {approx = true} : vector<2x64x1xf32> -> vector<2x64x1xf32>
    %111 = vector.broadcast %110 : vector<2x64x1xf32> to vector<2x64x64xf32>
    %112 = arith.mulf %107, %111 : vector<2x64x64xf32>
    "tpu.trace_start"() <{level = 10 : i32, message = "bnm,bmd->bnd"}> : () -> ()
    %cst_48 = arith.constant dense<0.000000e+00> : vector<2x64x32xf32>
    %113 = tpu.matmul %112, %101, %cst_48 {dimension_numbers = #tpu.dot_dimension_numbers<[2], [1], [1], [2], [0, 0, 0, 1, 1, 2], [0], [0]>} : vector<2x64x64xf32>, vector<2x64x32xf32>, vector<2x64x32xf32> -> vector<2x64x32xf32>
    "tpu.trace_stop"() : () -> ()
    %114 = tpu.concatenate %59, %77, %95, %113 in 2 : vector<2x64x32xf32>, vector<2x64x32xf32>, vector<2x64x32xf32>, vector<2x64x32xf32> -> vector<2x64x128xf32>
    %115 = vector.shape_cast %114 : vector<2x64x128xf32> to vector<128x128xf32>
    %c0_49 = arith.constant 0 : index
    %c0_50 = arith.constant 0 : index
    %c0_51 = arith.constant 0 : index
    %116 = vector.load %arg5[%c0_49, %c0_50, %c0_51] : memref<1x128x128xf32, #tpu.memory_space<vmem>>, vector<1x128x128xf32>
    %117 = vector.shape_cast %116 : vector<1x128x128xf32> to vector<128x128xf32>
    %cst_52 = arith.constant dense<0.000000e+00> : vector<128x128xf32>
    %118 = tpu.matmul %115, %117, %cst_52 {dimension_numbers = #tpu.dot_dimension_numbers<[1], [0], [0], [1], [0, 0, 1, 1], [], []>} : vector<128x128xf32>, vector<128x128xf32>, vector<128x128xf32> -> vector<128x128xf32>
    %c0_53 = arith.constant 0 : index
    %c0_54 = arith.constant 0 : index
    %c0_55 = arith.constant 0 : index
    %119 = vector.load %arg6[%c0_53, %c0_54, %c0_55] : memref<1x1x128xf32, #tpu.memory_space<vmem>>, vector<1x1x128xf32>
    %120 = vector.shape_cast %119 : vector<1x1x128xf32> to vector<1x128xf32>
    %121 = vector.broadcast %120 : vector<1x128xf32> to vector<128x128xf32>
    %122 = arith.addf %118, %121 : vector<128x128xf32>
    %123 = vector.shape_cast %122 : vector<128x128xf32> to vector<2x64x128xf32>
    %c0_56 = arith.constant 0 : index
    %c0_57 = arith.constant 0 : index
    %c0_58 = arith.constant 0 : index
    %c0_59 = arith.constant 0 : index
    %124 = vector.load %arg9[%c0_56, %c0_57, %c0_58, %c0_59] : memref<1x2x128x64xf32, #tpu.memory_space<vmem>>, vector<1x1x128x64xf32>
    %125 = vector.shape_cast %124 : vector<1x1x128x64xf32> to vector<128x64xf32>
    %126 = vector.shape_cast %125 : vector<128x64xf32> to vector<1x128x64xf32>
    %127 = vector.shape_cast %126 : vector<1x128x64xf32> to vector<1x128x64xf32>
    %128 = vector.broadcast %127 : vector<1x128x64xf32> to vector<2x128x64xf32>
    %129 = vector.extract_strided_slice %123 {offsets = [0, 0, 0], sizes = [2, 64, 64], strides = [1, 1, 1]} : vector<2x64x128xf32> to vector<2x64x64xf32>
    "tpu.trace_start"() <{level = 10 : i32, message = "bkn,bnp->bkp"}> : () -> ()
    %cst_60 = arith.constant dense<0.000000e+00> : vector<2x128x64xf32>
    %130 = tpu.matmul %128, %129, %cst_60 {dimension_numbers = #tpu.dot_dimension_numbers<[2], [1], [1], [2], [0, 0, 0, 1, 1, 2], [0], [0]>} : vector<2x128x64xf32>, vector<2x64x64xf32>, vector<2x128x64xf32> -> vector<2x128x64xf32>
    "tpu.trace_stop"() : () -> ()
    %c0_61 = arith.constant 0 : index
    %c1_62 = arith.constant 1 : index
    %c0_63 = arith.constant 0 : index
    %c0_64 = arith.constant 0 : index
    %131 = vector.load %arg9[%c0_61, %c1_62, %c0_63, %c0_64] : memref<1x2x128x64xf32, #tpu.memory_space<vmem>>, vector<1x1x128x64xf32>
    %132 = vector.shape_cast %131 : vector<1x1x128x64xf32> to vector<128x64xf32>
    %133 = vector.shape_cast %132 : vector<128x64xf32> to vector<1x128x64xf32>
    %134 = vector.shape_cast %133 : vector<1x128x64xf32> to vector<1x128x64xf32>
    %135 = vector.broadcast %134 : vector<1x128x64xf32> to vector<2x128x64xf32>
    %136 = vector.extract_strided_slice %123 {offsets = [0, 0, 64], sizes = [2, 64, 64], strides = [1, 1, 1]} : vector<2x64x128xf32> to vector<2x64x64xf32>
    "tpu.trace_start"() <{level = 10 : i32, message = "bkn,bnp->bkp"}> : () -> ()
    %cst_65 = arith.constant dense<0.000000e+00> : vector<2x128x64xf32>
    %137 = tpu.matmul %135, %136, %cst_65 {dimension_numbers = #tpu.dot_dimension_numbers<[2], [1], [1], [2], [0, 0, 0, 1, 1, 2], [0], [0]>} : vector<2x128x64xf32>, vector<2x64x64xf32>, vector<2x128x64xf32> -> vector<2x128x64xf32>
    "tpu.trace_stop"() : () -> ()
    %138 = arith.addf %130, %137 : vector<2x128x64xf32>
    %c0_66 = arith.constant 0 : index
    %c0_67 = arith.constant 0 : index
    %c0_68 = arith.constant 0 : index
    %139 = vector.load %arg10[%c0_66, %c0_67, %c0_68] : memref<1x128x1xf32, #tpu.memory_space<vmem>>, vector<1x128x1xf32>
    %140 = vector.shape_cast %139 : vector<1x128x1xf32> to vector<128x1xf32>
    %141 = vector.shape_cast %140 : vector<128x1xf32> to vector<1x128x1xf32>
    %142 = vector.broadcast %141 : vector<1x128x1xf32> to vector<2x128x64xf32>
    %143 = arith.addf %138, %142 : vector<2x128x64xf32>
    %cst_69 = arith.constant 0.000000e+00 : f32
    %144 = vector.broadcast %cst_69 : f32 to vector<2x128x64xf32>
    %145 = arith.maximumf %143, %144 : vector<2x128x64xf32>
    %c0_70 = arith.constant 0 : index
    %c0_71 = arith.constant 0 : index
    %c0_72 = arith.constant 0 : index
    %c0_73 = arith.constant 0 : index
    %146 = vector.load %arg12[%c0_70, %c0_71, %c0_72, %c0_73] : memref<1x2x128x64xf32, #tpu.memory_space<vmem>>, vector<1x2x128x64xf32>
    %147 = vector.shape_cast %146 : vector<1x2x128x64xf32> to vector<2x128x64xf32>
    %148 = vector.shape_cast %145 : vector<2x128x64xf32> to vector<1x2x128x64xf32>
    tpu.vector_store %arg12[%c0_70, %c0_71, %c0_72, %c0_73], %148 {strides = array<i32>} : memref<1x2x128x64xf32, #tpu.memory_space<vmem>>, vector<1x2x128x64xf32>,
    return
  }
  func.func @transform_0(%arg0: i32) -> (i32, i32, i32) {
    %c0_i32 = arith.constant 0 : i32
    %c0_i32_0 = arith.constant 0 : i32
    %c0_i32_1 = arith.constant 0 : i32
    return %arg0, %c0_i32, %c0_i32_0 : i32, i32, i32
  }
  func.func @transform_1(%arg0: i32) -> (i32, i32, i32) {
    %c0_i32 = arith.constant 0 : i32
    %c0_i32_0 = arith.constant 0 : i32
    %c0_i32_1 = arith.constant 0 : i32
    return %arg0, %c0_i32, %c0_i32_0 : i32, i32, i32
  }
  func.func @transform_2(%arg0: i32) -> (i32, i32, i32) {
    %c0_i32 = arith.constant 0 : i32
    %c0_i32_0 = arith.constant 0 : i32
    %c0_i32_1 = arith.constant 0 : i32
    return %arg0, %c0_i32, %c0_i32_0 : i32, i32, i32
  }
  func.func @transform_3(%arg0: i32) -> (i32, i32, i32) {
    %c0_i32 = arith.constant 0 : i32
    %c0_i32_0 = arith.constant 0 : i32
    %c0_i32_1 = arith.constant 0 : i32
    return %arg0, %c0_i32, %c0_i32_0 : i32, i32, i32
  }
  func.func @transform_4(%arg0: i32) -> (i32, i32, i32) {
    %c0_i32 = arith.constant 0 : i32
    %c0_i32_0 = arith.constant 0 : i32
    %c0_i32_1 = arith.constant 0 : i32
    return %arg0, %c0_i32, %c0_i32_0 : i32, i32, i32
  }
  func.func @transform_5(%arg0: i32) -> (i32, i32, i32) {
    %c0_i32 = arith.constant 0 : i32
    %c0_i32_0 = arith.constant 0 : i32
    %c0_i32_1 = arith.constant 0 : i32
    return %arg0, %c0_i32, %c0_i32_0 : i32, i32, i32
  }
  func.func @transform_6(%arg0: i32) -> (i32, i32, i32, i32) {
    %c0_i32 = arith.constant 0 : i32
    %c0_i32_0 = arith.constant 0 : i32
    %c0_i32_1 = arith.constant 0 : i32
    %c0_i32_2 = arith.constant 0 : i32
    return %arg0, %c0_i32, %c0_i32_0, %c0_i32_1 : i32, i32, i32, i32
  }
  func.func @transform_7(%arg0: i32) -> (i32, i32, i32) {
    %c0_i32 = arith.constant 0 : i32
    %c0_i32_0 = arith.constant 0 : i32
    %c0_i32_1 = arith.constant 0 : i32
    return %arg0, %c0_i32, %c0_i32_0 : i32, i32, i32
  }
  func.func @transform_8(%arg0: i32) -> (i32, i32, i32, i32) {
    %c0_i32 = arith.constant 0 : i32
    %c0_i32_0 = arith.constant 0 : i32
    %c0_i32_1 = arith.constant 0 : i32
    %c0_i32_2 = arith.constant 0 : i32
    return %arg0, %c0_i32, %c0_i32_0, %c0_i32_1 : i32, i32, i32, i32
  }
  func.func @transform_9(%arg0: i32) -> (i32, i32, i32) {
    %c0_i32 = arith.constant 0 : i32
    %c0_i32_0 = arith.constant 0 : i32
    %c0_i32_1 = arith.constant 0 : i32
    return %arg0, %c0_i32, %c0_i32_0 : i32, i32, i32
  }
  func.func @transform_10(%arg0: i32) -> (i32, i32) {
    %c0_i32 = arith.constant 0 : i32
    %c0_i32_0 = arith.constant 0 : i32
    %c0_i32_1 = arith.constant 0 : i32
    return %c0_i32, %c0_i32_0 : i32, i32
  }
  func.func @transform_11(%arg0: i32) -> (i32, i32, i32, i32) {
    %c0_i32 = arith.constant 0 : i32
    %c0_i32_0 = arith.constant 0 : i32
    %c0_i32_1 = arith.constant 0 : i32
    %c0_i32_2 = arith.constant 0 : i32
    return %arg0, %c0_i32, %c0_i32_0, %c0_i32_1 : i32, i32, i32, i32
  }
  func.func @transform_12(%arg0: i32) -> (i32, i32, i32, i32) {
    %c0_i32 = arith.constant 0 : i32
    %c0_i32_0 = arith.constant 0 : i32
    %c0_i32_1 = arith.constant 0 : i32
    %c0_i32_2 = arith.constant 0 : i32
    return %arg0, %c0_i32, %c0_i32_0, %c0_i32_1 : i32, i32, i32, i32
  }
}

</mosaic_0001>

<bundles_post_ra>
// kernel: caam_wby_forward.1
= control target key start
LH: loop header
LB: loop body
LE: loop exit
PB: predicated region body
PF: predicated region fallthrough
CT: control target
= control target key end

     0   :  { %s9550_s21 = smov 0   ;;  %s11758_s0 = inlined_call_operand.vmem [shape: f32[2,128,128], index: 0, kind: input, shape index: {}]   ;;  %s11759_s1 = inlined_call_operand.vmem [shape: f32[2,128,128], index: 1, kind: input, shape index: {}]   ;;  %s11760_s2 = inlined_call_operand.vmem [shape: f32[2,128,128], index: 2, kind: input, shape index: {}]   ;;  %s11761_s3 = inlined_call_operand.vmem [shape: f32[2,128,128], index: 3, kind: input, shape index: {}]   ;;  %s11762_s4 = inlined_call_operand.vmem [shape: f32[2,128,128], index: 4, kind: input, shape index: {}]   ;;  %s11763_s5 = inlined_call_operand.vmem [shape: f32[2,1,128], index: 5, kind: input, shape index: {}]   ;;  %s11764_s6 = inlined_call_operand.vmem [shape: f32[2,2,1,64], index: 6, kind: input, shape index: {}]   ;;  %s11765_s7 = inlined_call_operand.vmem [shape: f32[2,1,1], index: 7, kind: input, shape index: {}]   ;;  %s11766_s8 = inlined_call_operand.vmem [shape: f32[2,2,128,64], index: 8, kind: input, shape index: {}]   ;;  %s11767_s9 = inlined_call_operand.vmem [shape: f32[2,128,1], index: 9, kind: input, shape index: {}]   ;;  %s11768_s10 = inlined_call_operand.vmem [shape: f32[64,16], index: 10, kind: input, shape index: {}]   ;;  %s11769_s11 = inlined_call_operand.vmem [shape: f32[2,2,128,64], index: 11, kind: output, shape index: {0}]   ;;  %s11770_s12 = inlined_call_operand.vmem [shape: f32[2,2,1,16], index: 12, kind: output, shape index: {1}]  }
   0x1 LB: > { %s6374_s22 = sadd.s32 4294967295, %s9475_s21   ;;  %p6378_p0 = scmp.ge.s32.totalorder %s9475_s21, 1  ;;  %s9475_s21 = sphi %s9550_s21, %s23_s21  }
   0x2   : > { %p450_p1 = scmp.lt.s32.totalorder %s9475_s21, 3 }
   0x4   : > { %p451_p2 = pnand %p6378_p0, %p450_p1 }
   0x6   : > { %454 = sbr.rel (%p451_p2) target bundleno = 4099 (0x1003), region = 64 }
   0xd   : > { %p536_p3 = scmp.lt.s32.totalorder %s6374_s22, 1  ;;  %v9477_v0 = vmov 0.0|0.0   ;;  %s9478_s27 = smov 64   ;;  %vm9479_vm0 = vmmov 0   ;;  %v9480_v26 = vmov 0.0   ;;  %vm641_vm1 = vcmask 523264  }
   0xe   : > { %8140 = vmatprep.subr.bf16.mxu1 %v9477_v0  ;;  %8164 = vmatprep.subr.bf16.mxu0 %v9477_v0  ;;  %vm981_vm2 = vcmask 1041409   ;;  %vm1595_vm3 = vcmask 261120   ;;  %s9482_s14 = smov 32   ;;  %vm5036_vm5 = vcmask 785408   ;;  %vm1109_vm6 = vcmask 122880  }
   0xf   : > { %s11907_s22 = smov (!%p536_p3, %s6374_s22), 1  ;;  %7229 = vmatprep.mubr.msk.f32.mxu1 %vm9479_vm0, %v9480_v26  ;;  %7267 = vmatprep.mubr.msk.f32.mxu0 %vm9479_vm0, %v9480_v26  ;;  %vm9895_vm4 = vmpackc.low %vm1595_vm3, %vm1595_vm3 }
  0x10   : > { %s9563_s23 = sshll.u32 %s11907_s22, 7  ;;  %s6389_s28 = sshll.u32 %s11907_s22, 1 }
  0x11   : > { %s9569_s26 = scalar_lea.vmem %s11758_s0, %s9563_s23  ;;  %s9662_s13 = scalar_lea.vmem %s11764_s6, %s6389_s28 }
  0x12   : > { %v9572_v1 = vld [vmem:[%s9569_s26] sm:$0xff]  ;;  %v9575_v2 = vld [vmem:[%s9569_s26 + $0x8] sm:$0xff]  ;;  %v9578_v3 = vld [vmem:[%s9569_s26 + $0x10] sm:$0xff]  ;;  %s9698_s16 = scalar_lea.vmem %s11759_s1, %s9563_s23  ;;  %s9729_s19 = scalar_lea.vmem %s11760_s2, %s9563_s23 }
  0x13   : > { %v8763_v4 = vpack.i.bf16 %v9575_v2, %v9572_v1  ;;  %v9583_v5 = vld [vmem:[%s9569_s26 + $0x18] sm:$0xff]  ;;  %v9586_v6 = vld [vmem:[%s9569_s26 + $0x20] sm:$0xff]  ;;  %v9589_v7 = vld [vmem:[%s9569_s26 + $0x28] sm:$0xff]  ;;  %v8165_v8 = vpack.c.bf16 %v9575_v2, %v9572_v1  ;;  %s11200_s17 = scalar_lea.vmem %s11762_s4, %s9563_s23  ;;  %s563_s20 = scalar_lea.vmem %s11763_s5, %s11907_s22 }
  0x14   : > { %v8773_v9 = vpack.i.bf16 %v9589_v7, %v9586_v6  ;;  %v9596_v10 = vld [vmem:[%s9569_s26 + $0x30] sm:$0xff]  ;;  %v9599_v11 = vld [vmem:[%s9569_s26 + $0x38] sm:$0xff]  ;;  %v8768_v12 = vpack.i.bf16 %v9583_v5, %v9578_v3  ;;  %v8168_v13 = vpack.c.bf16 %v9583_v5, %v9578_v3  ;;  %v9610_v15 = vld [vmem:[%s9569_s26 + $0x40] sm:$0xff]  ;;  %v8171_v20 = vpack.c.bf16 %v9589_v7, %v9586_v6  ;;  %s6685_s24 = sshll.u32 %s11907_s22, 8  ;;  %s589_s18 = scalar_lea.vmem %s11770_s12, %s6389_s28 }
  0x15   : > { %8764 = vrot.lane.b32.xlu0 %v8763_v4, %s9478_s27  ;;  %8166 = vmatpush3.bf16.msra.mxu0 %v8165_v8  ;;  %v8778_v14 = vpack.i.bf16 %v9599_v11, %v9596_v10  ;;  %v9613_v16 = vld [vmem:[%s9569_s26 + $0x48] sm:$0xff]  ;;  %v9617_v17 = vld [vmem:[%s9569_s26 + $0x50] sm:$0xff]  ;;  %v9620_v18 = vld [vmem:[%s9569_s26 + $0x58] sm:$0xff]  ;;  %v8174_v28 = vpack.c.bf16 %v9599_v11, %v9596_v10  ;;  %s11390_s29 = scalar_lea.vmem %s11766_s8, %s6685_s24 }
  0x16   : > { %8774 = vrot.lane.b32.xlu1 %v8773_v9, %s9478_s27  ;;  %8167 = vmatprep.subr.bf16.mxu0 %v9477_v0  ;;  %v8783_v19 = vpack.i.bf16 %v9613_v16, %v9610_v15  ;;  %v8788_v21 = vpack.i.bf16 %v9620_v18, %v9617_v17  ;;  %v9631_v22 = vld [vmem:[%s9569_s26 + $0x60] sm:$0xff]  ;;  %v9634_v23 = vld [vmem:[%s9569_s26 + $0x68] sm:$0xff]  ;;  %v9638_v24 = vld [vmem:[%s9569_s26 + $0x70] sm:$0xff]  ;;  %v8177_v4 = vpack.c.bf16 %v9613_v16, %v9610_v15 }
  0x17   : > { %v9641_v25 = vld [vmem:[%s9569_s26 + $0x78] sm:$0xff]  ;;  %v8793_v27 = vpack.i.bf16 %v9634_v23, %v9631_v22  ;;  %v9666_v30 = vld [vmem:[%s9662_s13] sm:$0x1]  ;;  %v6397_v54 = vld [vmem:[%s9662_s13 + $0x1] sm:$0x1]  ;;  %v8180_v8 = vpack.c.bf16 %v9620_v18, %v9617_v17  ;;  %v8183_v9 = vpack.c.bf16 %v9634_v23, %v9631_v22  ;;  %s9768_s13 = scalar_lea.vmem %s11761_s3, %s9563_s23 }
  0x18   : > { %v8798_v29 = vpack.i.bf16 %v9641_v25, %v9638_v24 }
  0x19   : > { %8769 = vrot.lane.b32.xlu0 %v8768_v12, %s9478_s27  ;;  %8169 = vmatpush3.bf16.msra.mxu0 %v8168_v13  ;;  %v1112_v12 = vld [vmem:[%s9698_s16] sm:$0xff]  ;;  %v1113_v13 = vld [vmem:[%s9698_s16 + $0x8] sm:$0xff] }
  0x1a   : > { %8779 = vrot.lane.b32.xlu1 %v8778_v14, %s9478_s27  ;;  %8170 = vmatprep.subr.bf16.mxu0 %v9477_v0  ;;  %v8186_v14 = vpack.c.bf16 %v9641_v25, %v9638_v24 }
  0x1d   : > { %8784 = vrot.lane.b32.xlu0 %v8783_v19, %s9478_s27  ;;  %8172 = vmatpush3.bf16.msra.mxu0 %v8171_v20  ;;  %v8200_v19 = vpack.c.bf16 %v1113_v13, %v1112_v12  ;;  %v1114_v20 = vld [vmem:[%s9698_s16 + $0x10] sm:$0xff]  ;;  %v1288_v12 = vld [vmem:[%s9729_s19 + $0x78] sm:$0xff]  ;;  %v960_v13 = vld [vmem:[%s11768_s10] sm:$0xff] }
  0x1e   : > { %8789 = vrot.lane.b32.xlu1 %v8788_v21, %s9478_s27  ;;  %8173 = vmatprep.subr.bf16.mxu0 %v9477_v0  ;;  %v1115_v21 = vld [vmem:[%s9698_s16 + $0x18] sm:$0xff] }
  0x21   : > { %8794 = vrot.lane.b32.xlu0 %v8793_v27, %s9478_s27  ;;  %8175 = vmatpush3.bf16.msra.mxu0 %v8174_v28  ;;  %v1116_v27 = vld [vmem:[%s9698_s16 + $0x20] sm:$0xff]  ;;  %v1117_v28 = vld [vmem:[%s9698_s16 + $0x28] sm:$0xff] }
  0x22   : > { %8799 = vrot.lane.b32.xlu1 %v8798_v29, %s9478_s27  ;;  %8188 = vmatprep.subr.bf16.mxu0 %v9477_v0  ;;  %v8208_v29 = vpack.c.bf16 %v1117_v28, %v1116_v27  ;;  %v1434_v27 = vld [vmem:[%s9768_s13] sm:$0xff]  ;;  %v1435_v28 = vld [vmem:[%s9768_s13 + $0x8] sm:$0xff] }
  0x24   : > { %7268 = vmatmul.mubr.msk.f32.vlgmr.msra.gmra.mrb[0].mxu0 %vm641_vm1, %v9666_v30 }
  0x25   : > { %7305 = vmatprep.mubr.msk.f32.mxu0 %vm9479_vm0, %v9480_v26 }
  0x87   : > { %v8765_v31 = vpop.permute.xlu0 %8764 }
  0x88   : > { %v8767_v32 = vunpack.i.h.bf16 %v8765_v31  ;;  %v8766_v33 = vunpack.i.l.bf16 %v8765_v31  ;;  %v8775_v34 = vpop.permute.xlu1 %8774  ;;  %v1118_v31 = vld [vmem:[%s9698_s16 + $0x30] sm:$0xff] }
  0x89   : > { %v8777_v39 = vunpack.i.h.bf16 %v8775_v34  ;;  %v8776_v40 = vunpack.i.l.bf16 %v8775_v34  ;;  %v1120_v34 = vld [vmem:[%s9698_s16 + $0x40] sm:$0xff] }
  0x8a   : > { %v8141_v35 = vpack.c.bf16 %v8767_v32, %v8766_v33  ;;  %v1119_v32 = vld [vmem:[%s9698_s16 + $0x38] sm:$0xff] }
  0x8b   : > { %v8770_v36 = vpop.permute.xlu0 %8769  ;;  %v8147_v45 = vpack.c.bf16 %v8777_v39, %v8776_v40  ;;  %v8212_v33 = vpack.c.bf16 %v1119_v32, %v1118_v31  ;;  %v1124_v39 = vld [vmem:[%s9698_s16 + $0x60] sm:$0xff]  ;;  %v1125_v40 = vld [vmem:[%s9698_s16 + $0x68] sm:$0xff] }
  0x8c   : > { %v8772_v37 = vunpack.i.h.bf16 %v8770_v36  ;;  %v8771_v38 = vunpack.i.l.bf16 %v8770_v36  ;;  %8142 = vmatpush3.bf16.msra.mxu1 %v8141_v35  ;;  %v8780_v41 = vpop.permute.xlu1 %8779  ;;  %v1121_v35 = vld [vmem:[%s9698_s16 + $0x48] sm:$0xff]  ;;  %v1122_v36 = vld [vmem:[%s9698_s16 + $0x50] sm:$0xff]  ;;  %v964_v31 = vld [vmem:[%s11768_s10 + $0x20] sm:$0xff] }
  0x8d   : > { %8143 = vmatprep.subr.bf16.mxu1 %v9477_v0  ;;  %v8782_v43 = vunpack.i.h.bf16 %v8780_v41  ;;  %v8781_v44 = vunpack.i.l.bf16 %v8780_v41  ;;  %v8224_v41 = vpack.c.bf16 %v1125_v40, %v1124_v39  ;;  %v965_v32 = vld [vmem:[%s11768_s10 + $0x28] sm:$0xff]  ;;  %v1438_v39 = vld [vmem:[%s9768_s13 + $0x20] sm:$0xff] }
  0x8e   : > { %v8144_v42 = vpack.c.bf16 %v8772_v37, %v8771_v38  ;;  %v1123_v37 = vld [vmem:[%s9698_s16 + $0x58] sm:$0xff]  ;;  %v1439_v40 = vld [vmem:[%s9768_s13 + $0x28] sm:$0xff] }
  0x8f   : > { %v8785_v46 = vpop.permute.xlu0 %8784  ;;  %v8150_v49 = vpack.c.bf16 %v8782_v43, %v8781_v44  ;;  %v8220_v38 = vpack.c.bf16 %v1123_v37, %v1122_v36  ;;  %v1127_v43 = vld [vmem:[%s9698_s16 + $0x78] sm:$0xff] }
  0x90   : > { %8145 = vmatpush3.bf16.msra.mxu1 %v8144_v42  ;;  %v8787_v47 = vunpack.i.h.bf16 %v8785_v46  ;;  %v8786_v48 = vunpack.i.l.bf16 %v8785_v46  ;;  %v8790_v50 = vpop.permute.xlu1 %8789  ;;  %v1126_v42 = vld [vmem:[%s9698_s16 + $0x70] sm:$0xff]  ;;  %v1274_v46 = vld [vmem:[%s9729_s19 + $0x8] sm:$0xff] }
  0x91   : > { %8146 = vmatprep.subr.bf16.mxu1 %v9477_v0  ;;  %v8792_v52 = vunpack.i.h.bf16 %v8790_v50  ;;  %v8791_v53 = vunpack.i.l.bf16 %v8790_v50  ;;  %v8228_v44 = vpack.c.bf16 %v1127_v43, %v1126_v42  ;;  %v967_v42 = vld [vmem:[%s11768_s10 + $0x38] sm:$0xff]  ;;  %v1440_v43 = vld [vmem:[%s9768_s13 + $0x30] sm:$0xff] }
  0x92   : > { %v8153_v51 = vpack.c.bf16 %v8787_v47, %v8786_v48  ;;  %v1275_v48 = vld [vmem:[%s9729_s19 + $0x10] sm:$0xff] }
  0x93   : > { %v8795_v55 = vpop.permute.xlu0 %8794  ;;  %v8156_v56 = vpack.c.bf16 %v8792_v52, %v8791_v53  ;;  %v1278_v52 = vld [vmem:[%s9729_s19 + $0x28] sm:$0xff] }
  0x94   : > { %8148 = vmatpush3.bf16.msra.mxu1 %v8147_v45  ;;  %v8797_v57 = vunpack.i.h.bf16 %v8795_v55  ;;  %v8796_v58 = vunpack.i.l.bf16 %v8795_v55  ;;  %v8800_v59 = vpop.permute.xlu1 %8799  ;;  %v1273_v45 = vld [vmem:[%s9729_s19] sm:$0xff]  ;;  %v1280_v55 = vld [vmem:[%s9729_s19 + $0x38] sm:$0xff] }
  0x95   : > { %8149 = vmatprep.subr.bf16.mxu1 %v9477_v0  ;;  %v8802_v61 = vunpack.i.h.bf16 %v8800_v59  ;;  %v8801_v62 = vunpack.i.l.bf16 %v8800_v59  ;;  %v8232_v47 = vpack.c.bf16 %v1274_v46, %v1273_v45  ;;  %v1441_v45 = vld [vmem:[%s9768_s13 + $0x38] sm:$0xff] }
  0x96   : > { %v8159_v60 = vpack.c.bf16 %v8797_v57, %v8796_v58  ;;  %v1281_v57 = vld [vmem:[%s9729_s19 + $0x40] sm:$0xff]  ;;  %v1282_v58 = vld [vmem:[%s9729_s19 + $0x48] sm:$0xff]  ;;  %v8276_v46 = vpack.c.bf16 %v1441_v45, %v1440_v43 }
  0x97   : > { %v8162_v63 = vpack.c.bf16 %v8802_v61, %v8801_v62  ;;  %v8248_v59 = vpack.c.bf16 %v1282_v58, %v1281_v57  ;;  %v1284_v61 = vld [vmem:[%s9729_s19 + $0x58] sm:$0xff] }
  0x98   : > { %8151 = vmatpush3.bf16.msra.mxu1 %v8150_v49  ;;  %v1276_v49 = vld [vmem:[%s9729_s19 + $0x18] sm:$0xff] }
  0x99   : > { %8152 = vmatprep.subr.bf16.mxu1 %v9477_v0  ;;  %v8236_v50 = vpack.c.bf16 %v1276_v49, %v1275_v48  ;;  %v1443_v48 = vld [vmem:[%s9768_s13 + $0x48] sm:$0xff]  ;;  %v1449_v57 = vld [vmem:[%s9768_s13 + $0x78] sm:$0xff] }
  0x9b   : > { %7230 = vmatmul.mubr.msk.f32.vlgmr.msra.gmra.mrb[0].mxu1 %vm641_vm1, %v6397_v54 }
  0x9c   : > { %8154 = vmatpush3.bf16.msra.mxu1 %v8153_v51  ;;  %7248 = vmatprep.mubr.msk.f32.mxu1 %vm9479_vm0, %v9480_v26  ;;  %v1277_v51 = vld [vmem:[%s9729_s19 + $0x20] sm:$0xff] }
  0x9d   : > { %8155 = vmatprep.subr.bf16.mxu1 %v9477_v0  ;;  %v8240_v53 = vpack.c.bf16 %v1278_v52, %v1277_v51  ;;  %v1445_v51 = vld [vmem:[%s9768_s13 + $0x58] sm:$0xff] }
  0xa0   : > { %8157 = vmatpush3.bf16.msra.mxu1 %v8156_v56 }
  0xa1   : > { %8158 = vmatprep.subr.bf16.mxu1 %v9477_v0 }
  0xa4   : > { %8160 = vmatpush3.bf16.msra.mxu1 %v8159_v60  ;;  %v1283_v60 = vld [vmem:[%s9729_s19 + $0x50] sm:$0xff] }
  0xa5   : > { %8161 = vmatprep.subr.bf16.mxu1 %v9477_v0  ;;  %v8252_v62 = vpack.c.bf16 %v1284_v61, %v1283_v60 }
  0xa8   : > { %8163 = vmatpush3.bf16.msra.mxu1 %v8162_v63  ;;  %v1285_v63 = vld [vmem:[%s9729_s19 + $0x60] sm:$0xff] }
  0xa9   : > { %8176 = vmatprep.subr.bf16.mxu1 %v9477_v0 }
  0xab   : > { %7249 = vmatmul.mubr.msk.f32.vlgmr.msra.gmra.mrb[2].mxu1 %vm641_vm1, %v6397_v54  ;;  %v1279_v54 = vld [vmem:[%s9729_s19 + $0x30] sm:$0xff] }
  0xac   : > { %8178 = vmatpush3.bf16.msra.mxu1 %v8177_v4  ;;  %7286 = vmatprep.mubr.msk.f32.mxu1 %vm9479_vm0, %v9480_v26  ;;  %v8204_v26 = vpack.c.bf16 %v1115_v21, %v1114_v20  ;;  %v8244_v56 = vpack.c.bf16 %v1280_v55, %v1279_v54  ;;  %v1286_v4 = vld [vmem:[%s9729_s19 + $0x68] sm:$0xff]  ;;  %v963_v21 = vld [vmem:[%s11768_s10 + $0x18] sm:$0xff] }
  0xad   : > { %8179 = vmatprep.subr.bf16.mxu1 %v9477_v0  ;;  %v1447_v54 = vld [vmem:[%s9768_s13 + $0x68] sm:$0xff] }
  0xb0   : > { %8181 = vmatpush3.bf16.msra.mxu1 %v8180_v8  ;;  %v8256_v8 = vpack.c.bf16 %v1286_v4, %v1285_v63 }
  0xb1   : > { %8182 = vmatprep.subr.bf16.mxu1 %v9477_v0 }
  0xb4   : > { %8184 = vmatpush3.bf16.msra.mxu1 %v8183_v9  ;;  %v1287_v9 = vld [vmem:[%s9729_s19 + $0x70] sm:$0xff] }
  0xb5   : > { %8185 = vmatprep.subr.bf16.mxu1 %v9477_v0 }
  0xb8   : > { %8187 = vmatpush3.bf16.msra.mxu1 %v8186_v14  ;;  %v961_v14 = vld [vmem:[%s11768_s10 + $0x8] sm:$0xff] }
  0xb9   : > { %8201 = vmatprep.subr.bf16.mxu1 %v8200_v19  ;;  %v8189_v20 = vpack.c.bf16 %v961_v14, %v960_v13 }
  0xbb   : > { %7287 = vmatmul.mubr.msk.f32.vlgmr.msra.gmra.mrb[2].mxu1 %vm641_vm1, %v9666_v30  ;;  %v8216_v30 = vpack.c.bf16 %v1121_v35, %v1120_v34  ;;  %8190 = vmatpush3.bf16.msra.mxu0 %v8189_v20  ;;  %v1436_v34 = vld [vmem:[%s9768_s13 + $0x10] sm:$0xff]  ;;  %v1437_v35 = vld [vmem:[%s9768_s13 + $0x18] sm:$0xff] }
  0xbc   : > { %8203 = vmatpush3.bf16.msra.mxu1 %v8200_v19  ;;  %7340 = vmatprep.mubr.f32.mxu1 %v9572_v1  ;;  %v962_v19 = vld [vmem:[%s11768_s10 + $0x10] sm:$0xff] }
  0xbd   : > { %8205 = vmatprep.subr.bf16.mxu1 %v8204_v26  ;;  %8191 = vmatprep.subr.bf16.mxu0 %v9477_v0 }
  0xc0   : > { %8207 = vmatpush3.bf16.msra.mxu1 %v8204_v26  ;;  %v8260_v26 = vpack.c.bf16 %v1288_v12, %v1287_v9 }
  0xc1   : > { %8209 = vmatprep.subr.bf16.mxu1 %v8208_v29 }
  0xc4   : > { %8211 = vmatpush3.bf16.msra.mxu1 %v8208_v29  ;;  %v8192_v29 = vpack.c.bf16 %v963_v21, %v962_v19 }
  0xc5   : > { %8213 = vmatprep.subr.bf16.mxu1 %v8212_v33 }
  0xc6   : > { %8193 = vmatpush3.bf16.msra.mxu0 %v8192_v29 }
  0xc7   : > { %8194 = vmatprep.subr.bf16.mxu0 %v9477_v0 }
  0xc8   : > { %8215 = vmatpush3.bf16.msra.mxu1 %v8212_v33  ;;  %v8264_v33 = vpack.c.bf16 %v1435_v28, %v1434_v27 }
  0xc9   : > { %8217 = vmatprep.subr.bf16.mxu1 %v8216_v30 }
  0xcc   : > { %8219 = vmatpush3.bf16.msra.mxu1 %v8216_v30  ;;  %v8195_v30 = vpack.c.bf16 %v965_v32, %v964_v31 }
  0xcd   : > { %8221 = vmatprep.subr.bf16.mxu1 %v8220_v38 }
  0xce   : > { %8196 = vmatpush3.bf16.msra.mxu0 %v8195_v30 }
  0xcf   : > { %8197 = vmatprep.subr.bf16.mxu0 %v9477_v0  ;;  %v966_v0 = vld [vmem:[%s11768_s10 + $0x30] sm:$0xff] }
  0xd0   : > { %8223 = vmatpush3.bf16.msra.mxu1 %v8220_v38  ;;  %v8268_v38 = vpack.c.bf16 %v1437_v35, %v1436_v34 }
  0xd1   : > { %8225 = vmatprep.subr.bf16.mxu1 %v8224_v41 }
  0xd4   : > { %8227 = vmatpush3.bf16.msra.mxu1 %v8224_v41  ;;  %v8272_v41 = vpack.c.bf16 %v1439_v40, %v1438_v39 }
  0xd5   : > { %8229 = vmatprep.subr.bf16.mxu1 %v8228_v44 }
  0xd8   : > { %8231 = vmatpush3.bf16.msra.mxu1 %v8228_v44  ;;  %v8198_v44 = vpack.c.bf16 %v967_v42, %v966_v0 }
  0xd9   : > { %8233 = vmatprep.subr.bf16.mxu1 %v8232_v47 }
  0xda   : > { %8199 = vmatpush3.bf16.msra.mxu0 %v8198_v44 }
  0xdb   : > { %7341 = vmatmul.mubr.f32.vlgmr.msra.gmra.mrb[4].mxu1 %v9575_v2 }
  0xdc   : > { %8235 = vmatpush3.bf16.msra.mxu1 %v8232_v47  ;;  %7343 = vmatprep.mubr.f32.mxu1 %v9578_v3  ;;  %v1442_v47 = vld [vmem:[%s9768_s13 + $0x40] sm:$0xff] }
  0xdd   : > { %8237 = vmatprep.subr.bf16.mxu1 %v8236_v50  ;;  %v8280_v49 = vpack.c.bf16 %v1443_v48, %v1442_v47 }
  0xdf   : > { %7344 = vmatmul.mubr.f32.gmra.mrb[6].mxu1 %v9583_v5 }
  0xe0   : > { %8239 = vmatpush3.bf16.msra.mxu1 %v8236_v50  ;;  %7346 = vmatprep.mubr.f32.mxu1 %v9586_v6  ;;  %v1444_v50 = vld [vmem:[%s9768_s13 + $0x50] sm:$0xff] }
  0xe1   : > { %8241 = vmatprep.subr.bf16.mxu1 %v8240_v53  ;;  %v8284_v52 = vpack.c.bf16 %v1445_v51, %v1444_v50 }
  0xe3   : > { %7347 = vmatmul.mubr.f32.gmra.mrb[8].mxu1 %v9589_v7 }
  0xe4   : > { %8243 = vmatpush3.bf16.msra.mxu1 %v8240_v53  ;;  %7349 = vmatprep.mubr.f32.mxu1 %v9596_v10  ;;  %v1446_v53 = vld [vmem:[%s9768_s13 + $0x60] sm:$0xff] }
  0xe5   : > { %8245 = vmatprep.subr.bf16.mxu1 %v8244_v56  ;;  %v8288_v55 = vpack.c.bf16 %v1447_v54, %v1446_v53 }
  0xe7   : > { %7350 = vmatmul.mubr.f32.gmra.mrb[10].mxu1 %v9599_v11 }
  0xe8   : > { %8247 = vmatpush3.bf16.msra.mxu1 %v8244_v56  ;;  %7352 = vmatprep.mubr.f32.mxu1 %v9610_v15  ;;  %v1448_v56 = vld [vmem:[%s9768_s13 + $0x70] sm:$0xff]  ;;  %s9481_s13 = smov 96  }
  0xe9   : > { %8249 = vmatprep.subr.bf16.mxu1 %v8248_v59  ;;  %v8292_v58 = vpack.c.bf16 %v1449_v57, %v1448_v56 }
  0xeb   : > { %7353 = vmatmul.mubr.f32.gmra.mrb[12].mxu1 %v9613_v16 }
  0xec   : > { %8251 = vmatpush3.bf16.msra.mxu1 %v8248_v59  ;;  %7355 = vmatprep.mubr.f32.mxu1 %v9617_v17 }
  0xed   : > { %8253 = vmatprep.subr.bf16.mxu1 %v8252_v62 }
  0xef   : > { %7356 = vmatmul.mubr.f32.gmra.mrb[14].mxu1 %v9620_v18 }
  0xf0   : > { %8255 = vmatpush3.bf16.msra.mxu1 %v8252_v62  ;;  %7358 = vmatprep.mubr.f32.mxu1 %v9631_v22 }
  0xf1   : > { %8257 = vmatprep.subr.bf16.mxu1 %v8256_v8 }
  0xf3   : > { %7359 = vmatmul.mubr.f32.gmra.mrb[16].mxu1 %v9634_v23 }
  0xf4   : > { %8259 = vmatpush3.bf16.msra.mxu1 %v8256_v8  ;;  %7361 = vmatprep.mubr.f32.mxu1 %v9638_v24 }
  0xf5   : > { %8261 = vmatprep.subr.bf16.mxu1 %v8260_v26 }
  0xf7   : > { %7362 = vmatmul.mubr.f32.gmra.mrb[18].mxu1 %v9641_v25  ;;  %v9791_v36 = vpop.f32.mrb[0].mxu0 }
  0xf8   : > { %8263 = vmatpush3.bf16.msra.mxu1 %v8260_v26  ;;  %7396 = vmatprep.mubr.f32.mxu1 %v9572_v1  ;;  %v7269_v37 = vpop.f32.mrb[1].mxu0 }
  0xf9   : > { %8265 = vmatprep.subr.bf16.mxu1 %v8264_v33 }
  0xfb   : > { %7397 = vmatmul.mubr.f32.vlgmr.msra.gmra.mrb[20].mxu1 %v9575_v2 }
  0xfc   : > { %7399 = vmatprep.mubr.f32.mxu1 %v9578_v3  ;;  %8267 = vmatpush3.bf16.msra.mxu1 %v8264_v33 }
  0xfd   : > { %8269 = vmatprep.subr.bf16.mxu1 %v8268_v38 }
  0xff   : > { %7400 = vmatmul.mubr.f32.gmra.mrb[22].mxu1 %v9583_v5 }
 0x100   : > { %7402 = vmatprep.mubr.f32.mxu1 %v9586_v6  ;;  %8271 = vmatpush3.bf16.msra.mxu1 %v8268_v38 }
 0x101   : > { %8273 = vmatprep.subr.bf16.mxu1 %v8272_v41 }
 0x103   : > { %7403 = vmatmul.mubr.f32.gmra.mrb[24].mxu1 %v9589_v7 }
 0x104   : > { %7405 = vmatprep.mubr.f32.mxu1 %v9596_v10  ;;  %8275 = vmatpush3.bf16.msra.mxu1 %v8272_v41 }
 0x105   : > { %8277 = vmatprep.subr.bf16.mxu1 %v8276_v46 }
 0x107   : > { %7406 = vmatmul.mubr.f32.gmra.mrb[26].mxu1 %v9599_v11 }
 0x108   : > { %7408 = vmatprep.mubr.f32.mxu1 %v9610_v15  ;;  %8279 = vmatpush3.bf16.msra.mxu1 %v8276_v46 }
 0x109   : > { %8281 = vmatprep.subr.bf16.mxu1 %v8280_v49 }
 0x10b   : > { %7409 = vmatmul.mubr.f32.gmra.mrb[28].mxu1 %v9613_v16 }
 0x10c   : > { %7411 = vmatprep.mubr.f32.mxu1 %v9617_v17  ;;  %8283 = vmatpush3.bf16.msra.mxu1 %v8280_v49 }
 0x10d   : > { %8285 = vmatprep.subr.bf16.mxu1 %v8284_v52 }
 0x10f   : > { %7412 = vmatmul.mubr.f32.gmra.mrb[30].mxu1 %v9620_v18 }
 0x110   : > { %7414 = vmatprep.mubr.f32.mxu1 %v9631_v22  ;;  %8287 = vmatpush3.bf16.msra.mxu1 %v8284_v52 }
 0x111   : > { %8289 = vmatprep.subr.bf16.mxu1 %v8288_v55 }
 0x113   : > { %7415 = vmatmul.mubr.f32.gmra.mrb[32].mxu1 %v9634_v23 }
 0x114   : > { %7417 = vmatprep.mubr.f32.mxu1 %v9638_v24  ;;  %8291 = vmatpush3.bf16.msra.mxu1 %v8288_v55 }
 0x115   : > { %8293 = vmatprep.subr.bf16.mxu1 %v8292_v58 }
 0x117   : > { %7418 = vmatmul.mubr.f32.gmra.mrb[34].mxu1 %v9641_v25 }
 0x118   : > { %7452 = vmatprep.mubr.f32.mxu1 %v9572_v1  ;;  %8295 = vmatpush3.bf16.msra.mxu1 %v8292_v58 }
 0x11b   : > { %7453 = vmatmul.mubr.f32.vlgmr.msra.gmra.mrb[36].mxu1 %v9575_v2 }
 0x11c   : > { %7455 = vmatprep.mubr.f32.mxu1 %v9578_v3 }
 0x11f   : > { %7456 = vmatmul.mubr.f32.gmra.mrb[38].mxu1 %v9583_v5 }
 0x120   : > { %7458 = vmatprep.mubr.f32.mxu1 %v9586_v6 }
 0x123   : > { %7459 = vmatmul.mubr.f32.gmra.mrb[40].mxu1 %v9589_v7 }
 0x124   : > { %7461 = vmatprep.mubr.f32.mxu1 %v9596_v10 }
 0x127   : > { %7462 = vmatmul.mubr.f32.gmra.mrb[42].mxu1 %v9599_v11 }
 0x128   : > { %7464 = vmatprep.mubr.f32.mxu1 %v9610_v15 }
 0x12b   : > { %7465 = vmatmul.mubr.f32.gmra.mrb[44].mxu1 %v9613_v16 }
 0x12c   : > { %7467 = vmatprep.mubr.f32.mxu1 %v9617_v17 }
 0x12f   : > { %7468 = vmatmul.mubr.f32.gmra.mrb[46].mxu1 %v9620_v18 }
 0x130   : > { %7470 = vmatprep.mubr.f32.mxu1 %v9631_v22 }
 0x133   : > { %7471 = vmatmul.mubr.f32.gmra.mrb[48].mxu1 %v9634_v23 }
 0x134   : > { %7473 = vmatprep.mubr.f32.mxu1 %v9638_v24 }
 0x137   : > { %7474 = vmatmul.mubr.f32.gmra.mrb[50].mxu1 %v9641_v25 }
 0x16e   : > { %v711_v1 = vpop.f32.mrb[0].mxu1 }
 0x16f   : > { %v7231_v2 = vpop.f32.mrb[1].mxu1  ;;  %v887_v3 = vadd.f32 %v9791_v36, %v711_v1 }
 0x18e   : > { %v956_v5 = vpop.f32.mrb[2].mxu1 }
 0x18f   : > { %v980_v6 = vrot.slane %v956_v5, 7  ;;  %v7288_v7 = vpop.f32.mrb[3].mxu1 }
 0x191   : > { %v982_v10 = vsel %vm981_vm2, %v980_v6, %v887_v3 }
 0x192   : > { %7306 = vmatmul.mubr.msk.f32.vlgmr.msra.gmra.mrb[2].mxu0 %vm641_vm1, %v982_v10 }
 0x1ae   : > { %v9847_v11 = vpop.f32.mrb[4].mxu1 }
 0x1af   : > { %11805 = vst [vmem:[#allocation2_spill] sm:$0xff] %v9847_v11  ;;  %2338 = vrot.lane.b32.xlu0 %v9847_v11, %s9481_s13  ;;  %v9851_v15 = vpop.f32.mrb[5].mxu1 }
 0x1b0   : > { %11806 = vst [vmem:[#allocation3_spill] sm:$0xff] %v9851_v15  ;;  %7492 = vmatprep.mubr.msk.f32.mxu0 %vm1595_vm3, %v9851_v15 }
 0x1b2   : > { %v9855_v16 = vpop.f32.mrb[6].mxu1 }
 0x1b3   : > { %11807 = vst [vmem:[#allocation4_spill] sm:$0xff] %v9855_v16  ;;  %2336 = vrot.lane.b32.xlu0 %v9851_v15, %s9481_s13  ;;  %2342 = vrot.lane.b32.xlu1 %v9855_v16, %s9481_s13  ;;  %v9861_v17 = vpop.f32.mrb[7].mxu1 }
 0x1b4   : > { %11808 = vst [vmem:[#allocation5_spill] sm:$0xff] %v9861_v17 }
 0x1b6   : > { %v9863_v18 = vpop.f32.mrb[8].mxu1 }
 0x1b7   : > { %11809 = vst [vmem:[#allocation6_spill] sm:$0xff] %v9863_v18  ;;  %2340 = vrot.lane.b32.xlu1 %v9861_v17, %s9481_s13  ;;  %v9867_v22 = vpop.f32.mrb[9].mxu1 }
 0x1b8   : > { %11810 = vst [vmem:[#allocation7_spill] sm:$0xff] %v9867_v22 }
 0x1ba   : > { %v9869_v23 = vpop.f32.mrb[10].mxu1 }
 0x1bb   : > { %11811 = vst [vmem:[#allocation8_spill] sm:$0xff] %v9869_v23  ;;  %2344 = vrot.lane.b32.xlu1 %v9867_v22, %s9481_s13  ;;  %v9873_v24 = vpop.f32.mrb[11].mxu1 }
 0x1be   : > { %v9875_v25 = vpop.f32.mrb[12].mxu1 }
 0x1bf   : > { %v9877_v59 = vpop.f32.mrb[13].mxu1 }
 0x1c0   : > { %7520 = vmatprep.mubr.msk.f32.mxu1 %vm1595_vm3, %v9877_v59 }
 0x1c2   : > { %v9881_v60 = vpop.f32.mrb[14].mxu1 }
 0x1c3   : > { %v9883_v61 = vpop.f32.mrb[15].mxu1 }
 0x1c6   : > { %v9885_v62 = vpop.f32.mrb[16].mxu1 }
 0x1c7   : > { %v9887_v63 = vpop.f32.mrb[17].mxu1 }
 0x1ca   : > { %v9889_v4 = vpop.f32.mrb[18].mxu1 }
 0x1cb   : > { %v9891_v8 = vpop.f32.mrb[19].mxu1 }
 0x1ce   : > { %v7398_v9 = vpop.f32.mrb[20].mxu1 }
 0x1cf   : > { %v1355_v12 = vpop.f32.mrb[21].mxu1 }
 0x1d0   : > { %v9899_v14 = vpack.i.bf16 %v7398_v9, %v1355_v12  ;;  %v8296_v19 = vpack.c.bf16 %v7398_v9, %v1355_v12 }
 0x1d2   : > { %8804 = vrot.lane.b32.xlu1 %v9899_v14, %s9481_s13  ;;  %8298 = vmatprep.subr.msk.bf16.mxu0 %vm9895_vm4, %v8296_v19  ;;  %v7401_v20 = vpop.f32.mrb[22].mxu1 }
 0x1d3   : > { %8301 = vmatpush3.bf16.xpose.msk.msra.mxu0 %vm9895_vm4, %v8296_v19  ;;  %v1365_v21 = vpop.f32.mrb[23].mxu1 }
 0x1d4   : > { %v9907_v26 = vpack.i.bf16 %v7401_v20, %v1365_v21  ;;  %v8302_v27 = vpack.c.bf16 %v7401_v20, %v1365_v21 }
 0x1d6   : > { %8809 = vrot.lane.b32.xlu1 %v9907_v26, %s9481_s13  ;;  %8304 = vmatprep.subr.msk.bf16.mxu0 %vm9895_vm4, %v8302_v27  ;;  %v7404_v28 = vpop.f32.mrb[24].mxu1 }
 0x1d7   : > { %v1375_v29 = vpop.f32.mrb[25].mxu1 }
 0x1d8   : > { %v9913_v31 = vpack.i.bf16 %v7404_v28, %v1375_v29  ;;  %v8308_v32 = vpack.c.bf16 %v7404_v28, %v1375_v29 }
 0x1da   : > { %v7407_v33 = vpop.f32.mrb[26].mxu1  ;;  %8814 = vrot.lane.b32.xlu0 %v9913_v31, %s9481_s13 }
 0x1db   : > { %8307 = vmatpush3.bf16.xpose.msk.msra.mxu0 %vm9895_vm4, %v8302_v27  ;;  %v1385_v34 = vpop.f32.mrb[27].mxu1 }
 0x1dc   : > { %v9919_v35 = vpack.i.bf16 %v7407_v33, %v1385_v34  ;;  %v8314_v30 = vpack.c.bf16 %v7407_v33, %v1385_v34  ;;  %8310 = vmatprep.subr.msk.bf16.mxu0 %vm9895_vm4, %v8308_v32 }
 0x1de   : > { %11814 = vst [vmem:[#allocation9_spill] sm:$0xff] %v9919_v35  ;;  %v7410_v36 = vpop.f32.mrb[28].mxu1  ;;  %8819 = vrot.lane.b32.xlu1 %v9919_v35, %s9481_s13 }
 0x1df   : > { %v1395_v37 = vpop.f32.mrb[29].mxu1 }
 0x1e0   : > { %v9925_v38 = vpack.i.bf16 %v7410_v36, %v1395_v37  ;;  %v8320_v39 = vpack.c.bf16 %v7410_v36, %v1395_v37 }
 0x1e2   : > { %11815 = vst [vmem:[#allocation10_spill] sm:$0xff] %v9925_v38  ;;  %8322 = vmatprep.subr.msk.bf16.mxu1 %vm9895_vm4, %v8320_v39  ;;  %v7413_v40 = vpop.f32.mrb[30].mxu1  ;;  %8824 = vrot.lane.b32.xlu1 %v9925_v38, %s9481_s13 }
 0x1e3   : > { %8313 = vmatpush3.bf16.xpose.msk.msra.mxu0 %vm9895_vm4, %v8308_v32  ;;  %8325 = vmatpush3.bf16.xpose.msk.msra.mxu1 %vm9895_vm4, %v8320_v39  ;;  %v1405_v41 = vpop.f32.mrb[31].mxu1 }
 0x1e4   : > { %8316 = vmatprep.subr.msk.bf16.mxu0 %vm9895_vm4, %v8314_v30  ;;  %v9937_v0 = vpack.i.bf16 %v7413_v40, %v1405_v41  ;;  %v8326_v42 = vpack.c.bf16 %v7413_v40, %v1405_v41 }
 0x1e6   : > { %11816 = vst [vmem:[#allocation11_spill] sm:$0xff] %v9937_v0  ;;  %8328 = vmatprep.subr.msk.bf16.mxu1 %vm9895_vm4, %v8326_v42  ;;  %v7416_v43 = vpop.f32.mrb[32].mxu1  ;;  %8829 = vrot.lane.b32.xlu1 %v9937_v0, %s9481_s13 }
 0x1e7   : > { %v1415_v44 = vpop.f32.mrb[33].mxu1 }
 0x1e8   : > { %v9943_v45 = vpack.i.bf16 %v7416_v43, %v1415_v44  ;;  %v8332_v46 = vpack.c.bf16 %v7416_v43, %v1415_v44 }
 0x1ea   : > { %11817 = vst [vmem:[#allocation12_spill] sm:$0xff] %v9943_v45  ;;  %v7419_v47 = vpop.f32.mrb[34].mxu1  ;;  %8834 = vrot.lane.b32.xlu0 %v9943_v45, %s9481_s13 }
 0x1eb   : > { %8319 = vmatpush3.bf16.xpose.msk.msra.mxu0 %vm9895_vm4, %v8314_v30  ;;  %8331 = vmatpush3.bf16.xpose.msk.msra.mxu1 %vm9895_vm4, %v8326_v42  ;;  %v1425_v48 = vpop.f32.mrb[35].mxu1 }
 0x1ec   : > { %8334 = vmatprep.subr.msk.bf16.mxu1 %vm9895_vm4, %v8332_v46  ;;  %v9953_v49 = vpack.i.bf16 %v7419_v47, %v1425_v48  ;;  %v8338_v50 = vpack.c.bf16 %v7419_v47, %v1425_v48 }
 0x1ee   : > { %11818 = vst [vmem:[#allocation13_spill] sm:$0xff] %v9953_v49  ;;  %v7454_v51 = vpop.f32.mrb[36].mxu1 }
 0x1ef   : > { %v1516_v52 = vpop.f32.mrb[37].mxu1 }
 0x1f0   : > { %v9967_v53 = vpack.i.bf16 %v7454_v51, %v1516_v52  ;;  %v8344_v54 = vpack.c.bf16 %v7454_v51, %v1516_v52 }
 0x1f2   : > { %7493 = vmatmul.mubr.msk.f32.vlgmr.msra.gmra.mrb[4].mxu0 %vm1595_vm3, %v9847_v11  ;;  %v7457_v55 = vpop.f32.mrb[38].mxu1  ;;  %8345 = vmatprep.subr.bf16.mxu0 %v8344_v54 }
 0x1f3   : > { %7495 = vmatprep.mubr.msk.f32.mxu0 %vm1595_vm3, %v9861_v17  ;;  %8337 = vmatpush3.bf16.xpose.msk.msra.mxu1 %vm9895_vm4, %v8332_v46  ;;  %v1526_v56 = vpop.f32.mrb[39].mxu1 }
 0x1f4   : > { %8340 = vmatprep.subr.msk.bf16.mxu1 %vm9895_vm4, %v8338_v50  ;;  %v9975_v57 = vpack.i.bf16 %v7457_v55, %v1526_v56  ;;  %8347 = vmatpush3.bf16.msra.mxu0 %v8344_v54  ;;  %v8348_v58 = vpack.c.bf16 %v7457_v55, %v1526_v56 }
 0x1f6   : > { %7496 = vmatmul.mubr.msk.f32.gmra.mrb[6].mxu0 %vm1595_vm3, %v9855_v16  ;;  %v7460_v1 = vpop.f32.mrb[40].mxu1  ;;  %8349 = vmatprep.subr.bf16.mxu0 %v8348_v58 }
 0x1f7   : > { %7498 = vmatprep.mubr.msk.f32.mxu0 %vm1595_vm3, %v9867_v22  ;;  %v1536_v2 = vpop.f32.mrb[41].mxu1 }
 0x1f8   : > { %v9979_v3 = vpack.i.bf16 %v7460_v1, %v1536_v2  ;;  %8351 = vmatpush3.bf16.msra.mxu0 %v8348_v58  ;;  %v8352_v21 = vpack.c.bf16 %v7460_v1, %v1536_v2 }
 0x1fa   : > { %7499 = vmatmul.mubr.msk.f32.gmra.mrb[8].mxu0 %vm1595_vm3, %v9863_v18  ;;  %v7463_v28 = vpop.f32.mrb[42].mxu1  ;;  %8353 = vmatprep.subr.bf16.mxu0 %v8352_v21 }
 0x1fb   : > { %7501 = vmatprep.mubr.msk.f32.mxu0 %vm1595_vm3, %v9873_v24  ;;  %8343 = vmatpush3.bf16.xpose.msk.msra.mxu1 %vm9895_vm4, %v8338_v50  ;;  %v1546_v32 = vpop.f32.mrb[43].mxu1 }
 0x1fc   : > { %v9998_v30 = vpack.i.bf16 %v7463_v28, %v1546_v32  ;;  %8355 = vmatpush3.bf16.msra.mxu0 %v8352_v21  ;;  %v8356_v36 = vpack.c.bf16 %v7463_v28, %v1546_v32 }
 0x1fe   : > { %7502 = vmatmul.mubr.msk.f32.gmra.mrb[10].mxu0 %vm1595_vm3, %v9869_v23  ;;  %8357 = vmatprep.subr.bf16.mxu0 %v8356_v36  ;;  %v7466_v40 = vpop.f32.mrb[44].mxu1 }
 0x1ff   : > { %v1556_v43 = vpop.f32.mrb[45].mxu1 }
 0x200   : > { %8359 = vmatpush3.bf16.msra.mxu0 %v8356_v36  ;;  %v10004_v44 = vpack.i.bf16 %v7466_v40, %v1556_v43  ;;  %v10006_v50 = vpack.c.bf16 %v7466_v40, %v1556_v43 }
 0x202   : > { %7521 = vmatmul.mubr.msk.f32.vlgmr.msra.gmra.mrb[52].mxu1 %vm1595_vm3, %v9875_v25  ;;  %v7469_v46 = vpop.f32.mrb[46].mxu1  ;;  %8361 = vmatprep.subr.bf16.mxu0 %v10006_v50 }
 0x203   : > { %7523 = vmatprep.mubr.msk.f32.mxu1 %vm1595_vm3, %v9883_v61  ;;  %v1566_v48 = vpop.f32.mrb[47].mxu1 }
 0x204   : > { %v10008_v52 = vpack.i.bf16 %v7469_v46, %v1566_v48 }
 0x206   : > { %7524 = vmatmul.mubr.msk.f32.gmra.mrb[54].mxu1 %vm1595_vm3, %v9881_v60  ;;  %v7472_v54 = vpop.f32.mrb[48].mxu1 }
 0x207   : > { %7526 = vmatprep.mubr.msk.f32.mxu1 %vm1595_vm3, %v9887_v63  ;;  %v1576_v55 = vpop.f32.mrb[49].mxu1 }
 0x208   : > { %v10013_v56 = vpack.i.bf16 %v7472_v54, %v1576_v55  ;;  %v10021_v21 = vpack.c.bf16 %v7472_v54, %v1576_v55 }
 0x20a   : > { %7527 = vmatmul.mubr.msk.f32.gmra.mrb[56].mxu1 %vm1595_vm3, %v9885_v62  ;;  %v7475_v58 = vpop.f32.mrb[50].mxu1 }
 0x20b   : > { %7529 = vmatprep.mubr.msk.f32.mxu1 %vm1595_vm3, %v9891_v8 }
 0x20e   : > { %7530 = vmatmul.mubr.msk.f32.gmra.mrb[58].mxu1 %vm1595_vm3, %v9889_v4 }
 0x221   : > { %v2339_v5 = vpop.permute.xlu0 %2338 }
 0x225   : > { %v2337_v6 = vpop.permute.xlu0 %2336  ;;  %v2343_v7 = vpop.permute.xlu1 %2342 }
 0x226   : > { %7604 = vmatprep.mubr.msk.f32.mxu1 %vm1595_vm3, %v2337_v6  ;;  %v1586_v6 = vpop.f32.mrb[51].mxu1 }
 0x229   : > { %v2341_v10 = vpop.permute.xlu1 %2340 }
 0x22d   : > { %v2345_v9 = vpop.permute.xlu1 %2344 }
 0x244   : > { %v8805_v12 = vpop.permute.xlu1 %8804 }
 0x245   : > { %v8807_v19 = vunpack.i.h.bf16 %v8805_v12  ;;  %v8806_v20 = vunpack.i.l.bf16 %v8805_v12  ;;  %v10017_v12 = vpack.i.bf16 %v7475_v58, %v1586_v6 }
 0x247   : > { %v8376_v27 = vpack.c.bf16 %v8807_v19, %v8806_v20  ;;  %11819 = vst [vmem:[#allocation14_spill] sm:$0xff] %v10017_v12  ;;  %v10019_v19 = vpack.c.bf16 %v7469_v46, %v1566_v48 }
 0x248   : > { %v8810_v29 = vpop.permute.xlu1 %8809 }
 0x249   : > { %8378 = vmatprep.subr.msk.bf16.mxu1 %vm9895_vm4, %v8376_v27  ;;  %v8812_v33 = vunpack.i.h.bf16 %v8810_v29  ;;  %v8811_v34 = vunpack.i.l.bf16 %v8810_v29 }
 0x24a   : > { %8381 = vmatpush3.bf16.xpose.msk.msra.mxu1 %vm9895_vm4, %v8376_v27  ;;  %v10027_v27 = vpack.c.bf16 %v7475_v58, %v1586_v6 }
 0x24b   : > { %v8382_v37 = vpack.c.bf16 %v8812_v33, %v8811_v34 }
 0x24c   : > { %v8815_v39 = vpop.permute.xlu0 %8814 }
 0x24d   : > { %8384 = vmatprep.subr.msk.bf16.mxu1 %vm9895_vm4, %v8382_v37  ;;  %v8817_v41 = vunpack.i.h.bf16 %v8815_v39  ;;  %v8816_v42 = vunpack.i.l.bf16 %v8815_v39 }
 0x24f   : > { %v8388_v47 = vpack.c.bf16 %v8817_v41, %v8816_v42 }
 0x250   : > { %v8820_v51 = vpop.permute.xlu1 %8819 }
 0x251   : > { %v8822_v1 = vunpack.i.h.bf16 %v8820_v51  ;;  %v8821_v2 = vunpack.i.l.bf16 %v8820_v51 }
 0x252   : > { %8387 = vmatpush3.bf16.xpose.msk.msra.mxu1 %vm9895_vm4, %v8382_v37 }
 0x253   : > { %8390 = vmatprep.subr.msk.bf16.mxu1 %vm9895_vm4, %v8388_v47  ;;  %v8394_v20 = vpack.c.bf16 %v8822_v1, %v8821_v2 }
 0x25a   : > { %8393 = vmatpush3.bf16.xpose.msk.msra.mxu1 %vm9895_vm4, %v8388_v47 }
 0x25b   : > { %8396 = vmatprep.subr.msk.bf16.mxu1 %vm9895_vm4, %v8394_v20 }
 0x262   : > { %8399 = vmatpush3.bf16.xpose.msk.msra.mxu1 %vm9895_vm4, %v8394_v20 }
 0x265   : > { %v10031_v28 = vpop.f32.mrb[2].mxu0 }
 0x266   : > { %11820 = vst [vmem:[#allocation15_spill] sm:$0xff] %v10031_v28  ;;  %v7307_v29 = vpop.f32.mrb[3].mxu0 }
 0x269   : > { %7605 = vmatmul.mubr.msk.f32.vlgmr.msra.gmra.mrb[60].mxu1 %vm1595_vm3, %v2339_v5 }
 0x26a   : > { %7607 = vmatprep.mubr.msk.f32.mxu1 %vm1595_vm3, %v2341_v10 }
 0x26d   : > { %7608 = vmatmul.mubr.msk.f32.gmra.mrb[62].mxu1 %vm1595_vm3, %v2343_v7 }
 0x26e   : > { %7610 = vmatprep.mubr.msk.f32.mxu1 %vm1595_vm3, %v2345_v9 }
 0x2c5   : > { %v7494_v32 = vpop.f32.mrb[4].mxu0 }
 0x2c6   : > { %v1710_v33 = vpop.f32.mrb[5].mxu0  ;;  %v1905_v34 = vsel %vm641_vm1, %v7494_v32, -inf }
 0x2c7   : > { %1906 = vmax.xlane.f32.xlu1 %v1905_v34  ;;  %v1902_v36 = vsel %vm641_vm1, %v1710_v33, -inf }
 0x2c8   : > { %1903 = vmax.xlane.f32.xlu0 %v1902_v36 }
 0x2c9   : > { %v7497_v37 = vpop.f32.mrb[6].mxu0 }
 0x2ca   : > { %v10039_v39 = vpop.f32.mrb[7].mxu0  ;;  %v1911_v40 = vsel %vm641_vm1, %v7497_v37, -inf }
 0x2cb   : > { %v1908_v7 = vsel %vm641_vm1, %v10039_v39, -inf }
 0x2cc   : > { %1912 = vmax.xlane.f32.xlu0 %v1911_v40 }
 0x2cd   : > { %v10042_v5 = vpop.f32.mrb[8].mxu0 }
 0x2ce   : > { %v10044_v10 = vpop.f32.mrb[9].mxu0  ;;  %v1917_v43 = vsel %vm641_vm1, %v10042_v5, -inf }
 0x2cf   : > { %v1914_v9 = vsel %vm641_vm1, %v10044_v10, -inf }
 0x2d0   : > { %1909 = vmax.xlane.f32.xlu0 %v1908_v7  ;;  %1915 = vmax.xlane.f32.xlu1 %v1914_v9 }
 0x2d1   : > { %v10050_v41 = vpop.f32.mrb[10].mxu0 }
 0x2d2   : > { %v10052_v42 = vpop.f32.mrb[11].mxu0  ;;  %v1923_v51 = vsel %vm641_vm1, %v10050_v41, -inf }
 0x2d3   : > { %v1920_v46 = vsel %vm641_vm1, %v10052_v42, -inf }
 0x2d4   : > { %1918 = vmax.xlane.f32.xlu0 %v1917_v43  ;;  %1921 = vmax.xlane.f32.xlu1 %v1920_v46 }
 0x2d5   : > { %v10058_v47 = vpop.f32.mrb[52].mxu1 }
 0x2d6   : > { %v10060_v48 = vpop.f32.mrb[53].mxu1  ;;  %v1929_v1 = vsel %vm641_vm1, %v10058_v47, -inf }
 0x2d7   : > { %v1926_v54 = vsel %vm641_vm1, %v10060_v48, -inf }
 0x2d8   : > { %1924 = vmax.xlane.f32.xlu0 %v1923_v51  ;;  %1927 = vmax.xlane.f32.xlu1 %v1926_v54 }
 0x2d9   : > { %v10066_v55 = vpop.f32.mrb[54].mxu1 }
 0x2da   : > { %v10068_v58 = vpop.f32.mrb[55].mxu1  ;;  %v1935_v29 = vsel %vm641_vm1, %v10066_v55, -inf }
 0x2db   : > { %v1932_v2 = vsel %vm641_vm1, %v10068_v58, -inf }
 0x2dc   : > { %1930 = vmax.xlane.f32.xlu0 %v1929_v1  ;;  %1933 = vmax.xlane.f32.xlu1 %v1932_v2  ;;  %v10104_v2 = vpop.permute.xlu1 %8824 }
 0x2dd   : > { %v10074_v6 = vpop.f32.mrb[56].mxu1 }
 0x2de   : > { %v10076_v20 = vpop.f32.mrb[57].mxu1  ;;  %v1941_v7 = vsel %vm641_vm1, %v10074_v6, -inf }
 0x2df   : > { %v1938_v34 = vsel %vm641_vm1, %v10076_v20, -inf }
 0x2e0   : > { %1936 = vmax.xlane.f32.xlu0 %v1935_v29  ;;  %1939 = vmax.xlane.f32.xlu1 %v1938_v34  ;;  %v10106_v29 = vpop.permute.xlu1 %8829  ;;  %v10108_v34 = vpop.permute.xlu0 %8834 }
 0x2e1   : > { %v10082_v36 = vpop.f32.mrb[58].mxu1 }
 0x2e2   : > { %v10084_v40 = vpop.f32.mrb[59].mxu1  ;;  %v1947_v43 = vsel %vm641_vm1, %v10082_v36, -inf }
 0x2e3   : > { %v1944_v9 = vsel %vm641_vm1, %v10084_v40, -inf }
 0x2e4   : > { %1942 = vmax.xlane.f32.xlu0 %v1941_v7  ;;  %1945 = vmax.xlane.f32.xlu1 %v1944_v9 }
 0x2e8   : > { %1948 = vmax.xlane.f32.xlu0 %v1947_v43 }
 0x2f5   : > { %2346 = vrot.lane.b32.xlu1 %v9863_v18, %s9481_s13 }
 0x2fe   : > { %8839 = vrot.lane.b32.xlu0 %v9953_v49, %s9481_s13 }
 0x33c   : > { %v10096_v46 = vpop.f32.mrb[60].mxu1 }
 0x33d   : > { %v10098_v51 = vpop.f32.mrb[61].mxu1 }
 0x340   : > { %v10100_v54 = vpop.f32.mrb[62].mxu1 }
 0x341   : > { %v10102_v1 = vpop.f32.mrb[63].mxu1 }
 0x354   : > { %v1907_v7 = vpop.xlane.xlu1 %1906 }
 0x355   : > { %v1951_v9 = vsub.f32 %v7494_v32, %v1907_v7  ;;  %v1904_v43 = vpop.xlane.xlu0 %1903 }
 0x356   : > { %v1950_v28 = vsub.f32 %v1710_v33, %v1904_v43 }
 0x357   : > { %v1968_v45 = vmul.f32 1.442695, %v1951_v9 }
 0x358   : > { %v1966_v49 = vmul.f32 1.442695, %v1950_v28 }
 0x359   : > { %9205 = vpow2.f32 %v1968_v45  ;;  %v1913_v11 = vpop.xlane.xlu0 %1912 }
 0x35a   : > { %9207 = vpow2.f32 %v1966_v49  ;;  %v1953_v15 = vsub.f32 %v7497_v37, %v1913_v11 }
 0x35c   : > { %v1972_v18 = vmul.f32 1.442695, %v1953_v15 }
 0x35d   : > { %v1910_v22 = vpop.xlane.xlu0 %1909  ;;  %v1916_v16 = vpop.xlane.xlu1 %1915 }
 0x35e   : > { %9209 = vpow2.f32 %v1972_v18  ;;  %v1952_v17 = vsub.f32 %v10039_v39, %v1910_v22  ;;  %v1954_v0 = vsub.f32 %v10044_v10, %v1916_v16 }
 0x360   : > { %v1970_v38 = vmul.f32 1.442695, %v1952_v17  ;;  %v1974_v35 = vmul.f32 1.442695, %v1954_v0 }
 0x361   : > { %v1919_v12 = vpop.xlane.xlu0 %1918  ;;  %v1922_v32 = vpop.xlane.xlu1 %1921 }
 0x362   : > { %9211 = vpow2.f32 %v1970_v38  ;;  %v1955_v33 = vsub.f32 %v10042_v5, %v1919_v12  ;;  %v1956_v15 = vsub.f32 %v10052_v42, %v1922_v32 }
 0x363   : > { %v10113_v28 = vpop.eup %9205  ;;  %9213 = vpow2.f32 %v1974_v35 }
 0x364   : > { %v10115_v45 = vpop.eup %9207  ;;  %v1976_v11 = vmul.f32 1.442695, %v1955_v33  ;;  %v2001_v18 = vsel %vm641_vm1, %v10113_v28, 0.0  ;;  %v1978_v49 = vmul.f32 1.442695, %v1956_v15 }
 0x365   : > { %2002 = vadd.xlane.f32.xlu0 %v2001_v18  ;;  %v1925_v16 = vpop.xlane.xlu0 %1924  ;;  %v1928_v17 = vpop.xlane.xlu1 %1927  ;;  %v1998_v22 = vsel %vm641_vm1, %v10115_v45, 0.0 }
 0x366   : > { %9215 = vpow2.f32 %v1976_v11  ;;  %v1957_v38 = vsub.f32 %v10050_v41, %v1925_v16  ;;  %1999 = vadd.xlane.f32.xlu1 %v1998_v22  ;;  %v1958_v42 = vsub.f32 %v10060_v48, %v1928_v17 }
 0x368   : > { %v10123_v0 = vpop.eup %9209  ;;  %v1980_v35 = vmul.f32 1.442695, %v1957_v38  ;;  %v1982_v11 = vmul.f32 1.442695, %v1958_v42 }
 0x369   : > { %v1931_v12 = vpop.xlane.xlu0 %1930  ;;  %v1934_v37 = vpop.xlane.xlu1 %1933  ;;  %v2007_v39 = vsel %vm641_vm1, %v10123_v0, 0.0 }
 0x36a   : > { %9217 = vpow2.f32 %v1980_v35  ;;  %v1959_v5 = vsub.f32 %v10058_v47, %v1931_v12  ;;  %2008 = vadd.xlane.f32.xlu0 %v2007_v39 }
 0x36b   : > { %9219 = vpow2.f32 %v1978_v49 }
 0x36c   : > { %v10128_v10 = vpop.eup %9211  ;;  %v1984_v41 = vmul.f32 1.442695, %v1959_v5 }
 0x36d   : > { %v1937_v7 = vpop.xlane.xlu0 %1936  ;;  %v1940_v9 = vpop.xlane.xlu1 %1939  ;;  %v2004_v43 = vsel %vm641_vm1, %v10128_v10, 0.0 }
 0x36e   : > { %v10133_v32 = vpop.eup %9213  ;;  %2005 = vadd.xlane.f32.xlu1 %v2004_v43  ;;  %9221 = vpow2.f32 %v1984_v41  ;;  %v1961_v47 = vsub.f32 %v10066_v55, %v1937_v7  ;;  %v1960_v7 = vsub.f32 %v10068_v58, %v1934_v37 }
 0x36f   : > { %v2010_v48 = vsel %vm641_vm1, %v10133_v32, 0.0  ;;  %9223 = vpow2.f32 %v1982_v11 }
 0x370   : > { %v10135_v33 = vpop.eup %9215  ;;  %v1988_v17 = vmul.f32 1.442695, %v1961_v47  ;;  %v1986_v11 = vmul.f32 1.442695, %v1960_v7 }
 0x371   : > { %v1946_v15 = vpop.xlane.xlu1 %1945  ;;  %v2013_v18 = vsel %vm641_vm1, %v10135_v33, 0.0  ;;  %v1943_v43 = vpop.xlane.xlu0 %1942 }
 0x372   : > { %2014 = vadd.xlane.f32.xlu0 %v2013_v18  ;;  %2011 = vadd.xlane.f32.xlu1 %v2010_v48  ;;  %9225 = vpow2.f32 %v1988_v17  ;;  %v1963_v47 = vsub.f32 %v10074_v6, %v1943_v43  ;;  %v1962_v18 = vsub.f32 %v10076_v20, %v1940_v9 }
 0x373   : > { %9227 = vpow2.f32 %v1986_v11 }
 0x374   : > { %v10142_v16 = vpop.eup %9217  ;;  %v1992_v48 = vmul.f32 1.442695, %v1963_v47  ;;  %v1990_v17 = vmul.f32 1.442695, %v1962_v18  ;;  %v2677_v18 = vsel %vm641_vm1, %v10096_v46, -inf }
 0x375   : > { %v2347_v22 = vpop.permute.xlu1 %2346  ;;  %v2019_v38 = vsel %vm641_vm1, %v10142_v16, 0.0  ;;  %v10146_v49 = vpop.eup %9219 }
 0x376   : > { %2020 = vadd.xlane.f32.xlu0 %v2019_v38  ;;  %7611 = vmatmul.mubr.msk.f32.gmra.mrb[64].mxu1 %vm1595_vm3, %v2347_v22  ;;  %v2016_v55 = vsel %vm641_vm1, %v10146_v49, 0.0  ;;  %9229 = vpow2.f32 %v1992_v48  ;;  %v1964_v22 = vsub.f32 %v10084_v40, %v1946_v15 }
 0x377   : > { %9231 = vpow2.f32 %v1990_v17 }
 0x378   : > { %v10151_v35 = vpop.eup %9221  ;;  %v1994_v38 = vmul.f32 1.442695, %v1964_v22  ;;  %v2674_v22 = vsel %vm641_vm1, %v10098_v51, -inf }
 0x379   : > { %v2025_v12 = vsel %vm641_vm1, %v10151_v35, 0.0  ;;  %v10155_v39 = vpop.eup %9223 }
 0x37a   : > { %2017 = vadd.xlane.f32.xlu0 %v2016_v55  ;;  %v2022_v5 = vsel %vm641_vm1, %v10155_v39, 0.0  ;;  %v1949_v55 = vpop.xlane.xlu0 %1948  ;;  %9233 = vpow2.f32 %v1994_v38 }
 0x37b   : > { %v1965_v58 = vsub.f32 %v10082_v36, %v1949_v55 }
 0x37c   : > { %v10159_v42 = vpop.eup %9225 }
 0x37d   : > { %v2031_v41 = vsel %vm641_vm1, %v10159_v42, 0.0  ;;  %v1996_v37 = vmul.f32 1.442695, %v1965_v58 }
 0x37e   : > { %2026 = vadd.xlane.f32.xlu0 %v2025_v12  ;;  %v10171_v12 = vpop.eup %9227  ;;  %v10208_v43 = vpop.permute.xlu0 %8839 }
 0x37f   : > { %v2028_v6 = vsel %vm641_vm1, %v10171_v12, 0.0  ;;  %9235 = vpow2.f32 %v1996_v37  ;;  %v2680_v37 = vsel %vm641_vm1, %v10102_v1, -inf }
 0x380   : > { %v10176_v20 = vpop.eup %9229 }
 0x381   : > { %v2037_v9 = vsel %vm641_vm1, %v10176_v20, 0.0 }
 0x382   : > { %2023 = vadd.xlane.f32.xlu0 %v2022_v5  ;;  %v10180_v5 = vpop.eup %9231 }
 0x383   : > { %2350 = vrot.lane.b32.xlu1 %v9869_v23, %s9481_s13  ;;  %v2034_v40 = vsel %vm641_vm1, %v10180_v5, 0.0 }
 0x384   : > { %v10184_v15 = vpop.eup %9233 }
 0x385   : > { %v2040_v36 = vsel %vm641_vm1, %v10184_v15, 0.0 }
 0x386   : > { %2032 = vadd.xlane.f32.xlu0 %v2031_v41 }
 0x389   : > { %v10188_v41 = vpop.eup %9235 }
 0x38a   : > { %v2043_v7 = vsel %vm641_vm1, %v10188_v41, 0.0 }
 0x39c   : > { %2348 = vrot.lane.b32.xlu0 %v9873_v24, %s9481_s13 }
 0x3a7   : > { %2029 = vadd.xlane.f32.xlu1 %v2028_v6 }
 0x3ab   : > { %2038 = vadd.xlane.f32.xlu1 %v2037_v9 }
 0x3af   : > { %2035 = vadd.xlane.f32.xlu1 %v2034_v40 }
 0x3b3   : > { %2041 = vadd.xlane.f32.xlu1 %v2040_v36 }
 0x3bb   : > { %2044 = vadd.xlane.f32.xlu0 %v2043_v7  ;;  %v2683_v7 = vsel %vm641_vm1, %v10100_v54, -inf }
 0x3c4   : > { %2507 = vrot.lane.b32.xlu1 %v9875_v25, %s9481_s13 }
 0x3c8   : > { %2511 = vrot.lane.b32.xlu1 %v9881_v60, %s9481_s13 }
 0x3cc   : > { %2515 = vrot.lane.b32.xlu1 %v9885_v62, %s9481_s13 }
 0x3d0   : > { %2519 = vrot.lane.b32.xlu1 %v9889_v4, %s9481_s13 }
 0x3d1   : > { %2505 = vrot.lane.b32.xlu0 %v9877_v59, %s9481_s13 }
 0x3d5   : > { %2509 = vrot.lane.b32.xlu0 %v9883_v61, %s9481_s13 }
 0x3d9   : > { %2513 = vrot.lane.b32.xlu0 %v9887_v63, %s9481_s13 }
 0x3dd   : > { %2517 = vrot.lane.b32.xlu0 %v9891_v8, %s9481_s13 }
 0x3f2   : > { %v2003_v11 = vpop.xlane.xlu0 %2002 }
 0x3f3   : > { %9237 = vrcp.f32 %v2003_v11  ;;  %v2000_v47 = vpop.xlane.xlu1 %1999 }
 0x3f4   : > { %9239 = vrcp.f32 %v2000_v47  ;;  %2678 = vmax.xlane.f32.xlu1 %v2677_v18 }
 0x3f7   : > { %v2009_v48 = vpop.xlane.xlu0 %2008 }
 0x3f8   : > { %9241 = vrcp.f32 %v2009_v48 }
 0x3fb   : > { %v2006_v17 = vpop.xlane.xlu1 %2005 }
 0x3fc   : > { %9243 = vrcp.f32 %v2006_v17  ;;  %2675 = vmax.xlane.f32.xlu0 %v2674_v22  ;;  %v8827_v17 = vunpack.i.h.bf16 %v10104_v2  ;;  %v8826_v22 = vunpack.i.l.bf16 %v10104_v2 }
 0x3fd   : > { %v9238_v38 = vpop.eup %9237 }
 0x3fe   : > { %v9240_v55 = vpop.eup %9239  ;;  %v2063_v40 = vmul.f32 %v9238_v38, %v10113_v28 }
 0x3ff   : > { %v2015_v58 = vpop.xlane.xlu0 %2014  ;;  %v2012_v6 = vpop.xlane.xlu1 %2011  ;;  %v2062_v9 = vmul.f32 %v9240_v55, %v10115_v45 }
 0x400   : > { %9245 = vrcp.f32 %v2015_v58  ;;  %2681 = vmax.xlane.f32.xlu0 %v2680_v37 }
 0x401   : > { %9247 = vrcp.f32 %v2012_v6  ;;  %7548 = vmatprep.mubr.msk.f32.mxu0 %vm641_vm1, %v2062_v9 }
 0x402   : > { %7549 = vmatmul.mubr.msk.f32.vlgmr.msra.gmra.mrb[12].mxu0 %vm641_vm1, %v2063_v40  ;;  %v9242_v11 = vpop.eup %9241  ;;  %v8832_v40 = vunpack.i.h.bf16 %v10106_v29 }
 0x403   : > { %8363 = vmatpush3.bf16.msra.mxu0 %v10006_v50  ;;  %v2021_v36 = vpop.xlane.xlu0 %2020  ;;  %v2065_v50 = vmul.f32 %v9242_v11, %v10123_v0  ;;  %v8400_v0 = vpack.c.bf16 %v8827_v17, %v8826_v22  ;;  %v2351_v37 = vpop.permute.xlu1 %2350  ;;  %v8837_v11 = vunpack.i.h.bf16 %v10108_v34 }
 0x404   : > { %8365 = vmatprep.subr.bf16.mxu0 %v10019_v19  ;;  %2684 = vmax.xlane.f32.xlu0 %v2683_v7  ;;  %9249 = vrcp.f32 %v2021_v36  ;;  %v8831_v36 = vunpack.i.l.bf16 %v10106_v29 }
 0x406   : > { %v9244_v45 = vpop.eup %9243  ;;  %v8406_v7 = vpack.c.bf16 %v8832_v40, %v8831_v36 }
 0x407   : > { %8367 = vmatpush3.bf16.msra.mxu0 %v10019_v19  ;;  %v2018_v28 = vpop.xlane.xlu0 %2017  ;;  %v2064_v47 = vmul.f32 %v9244_v45, %v10128_v10  ;;  %v8836_v45 = vunpack.i.l.bf16 %v10108_v34 }
 0x408   : > { %9251 = vrcp.f32 %v2018_v28  ;;  %8369 = vmatprep.subr.bf16.mxu0 %v10021_v21 }
 0x409   : > { %7551 = vmatprep.mubr.msk.f32.mxu0 %vm641_vm1, %v2064_v47  ;;  %v8412_v29 = vpack.c.bf16 %v8837_v11, %v8836_v45 }
 0x40a   : > { %v9246_v18 = vpop.eup %9245  ;;  %7552 = vmatmul.mubr.msk.f32.gmra.mrb[14].mxu0 %vm641_vm1, %v2065_v50 }
 0x40b   : > { %v9248_v48 = vpop.eup %9247  ;;  %8371 = vmatpush3.bf16.msra.mxu0 %v10021_v21  ;;  %v2027_v19 = vpop.xlane.xlu0 %2026  ;;  %v2067_v10 = vmul.f32 %v9246_v18, %v10135_v33 }
 0x40c   : > { %8373 = vmatprep.subr.bf16.mxu0 %v10027_v27  ;;  %v2066_v38 = vmul.f32 %v9248_v48, %v10133_v32  ;;  %9253 = vrcp.f32 %v2027_v19 }
 0x40e   : > { %7554 = vmatprep.mubr.msk.f32.mxu0 %vm641_vm1, %v2066_v38  ;;  %v9250_v2 = vpop.eup %9249 }
 0x40f   : > { %7555 = vmatmul.mubr.msk.f32.gmra.mrb[16].mxu0 %vm641_vm1, %v2067_v10  ;;  %v2024_v55 = vpop.xlane.xlu0 %2023  ;;  %v2069_v32 = vmul.f32 %v9250_v2, %v10142_v16 }
 0x410   : > { %8375 = vmatpush3.bf16.msra.mxu0 %v10027_v27  ;;  %9255 = vrcp.f32 %v2024_v55 }
 0x411   : > { %8402 = vmatprep.subr.msk.bf16.mxu0 %vm9895_vm4, %v8400_v0 }
 0x412   : > { %v9252_v21 = vpop.eup %9251 }
 0x413   : > { %v2033_v33 = vpop.xlane.xlu0 %2032  ;;  %v2068_v58 = vmul.f32 %v9252_v21, %v10146_v49 }
 0x414   : > { %9257 = vrcp.f32 %v2033_v33 }
 0x415   : > { %7557 = vmatprep.mubr.msk.f32.mxu0 %vm641_vm1, %v2068_v58 }
 0x416   : > { %7558 = vmatmul.mubr.msk.f32.gmra.mrb[18].mxu0 %vm641_vm1, %v2069_v32  ;;  %v9254_v27 = vpop.eup %9253 }
 0x417   : > { %v2349_v6 = vpop.permute.xlu0 %2348  ;;  %v2071_v16 = vmul.f32 %v9254_v27, %v10151_v35  ;;  %v8842_v35 = vunpack.i.h.bf16 %v10208_v43 }
 0x418   : > { %7613 = vmatprep.mubr.msk.f32.mxu1 %vm1595_vm3, %v2349_v6 }
 0x419   : > { %7614 = vmatmul.mubr.msk.f32.gmra.mrb[66].mxu1 %vm1595_vm3, %v2351_v37 }
 0x41a   : > { %v9256_v9 = vpop.eup %9255 }
 0x41b   : > { %v2070_v49 = vmul.f32 %v9256_v9, %v10155_v39  ;;  %v8841_v39 = vunpack.i.l.bf16 %v10208_v43 }
 0x41d   : > { %7576 = vmatprep.mubr.msk.f32.mxu0 %vm641_vm1, %v2070_v49  ;;  %v8418_v28 = vpack.c.bf16 %v8842_v35, %v8841_v39 }
 0x41e   : > { %7577 = vmatmul.mubr.msk.f32.vlgmr.msra.gmra.mrb[20].mxu0 %vm641_vm1, %v2071_v16  ;;  %v9258_v18 = vpop.eup %9257 }
 0x41f   : > { %8405 = vmatpush3.bf16.xpose.msk.msra.mxu0 %vm9895_vm4, %v8400_v0  ;;  %v2073_v22 = vmul.f32 %v9258_v18, %v10159_v42 }
 0x420   : > { %8408 = vmatprep.subr.msk.bf16.mxu0 %vm9895_vm4, %v8406_v7 }
 0x427   : > { %8411 = vmatpush3.bf16.xpose.msk.msra.mxu0 %vm9895_vm4, %v8406_v7 }
 0x428   : > { %8414 = vmatprep.subr.msk.bf16.mxu0 %vm9895_vm4, %v8412_v29 }
 0x42f   : > { %8417 = vmatpush3.bf16.xpose.msk.msra.mxu0 %vm9895_vm4, %v8412_v29 }
 0x430   : > { %8420 = vmatprep.subr.msk.bf16.mxu0 %vm9895_vm4, %v8418_v28 }
 0x434   : > { %v2030_v34 = vpop.xlane.xlu1 %2029 }
 0x435   : > { %9259 = vrcp.f32 %v2030_v34 }
 0x437   : > { %8423 = vmatpush3.bf16.xpose.msk.msra.mxu0 %vm9895_vm4, %v8418_v28 }
 0x438   : > { %v2039_v47 = vpop.xlane.xlu1 %2038 }
 0x439   : > { %9261 = vrcp.f32 %v2039_v47 }
 0x43c   : > { %v2036_v50 = vpop.xlane.xlu1 %2035 }
 0x43d   : > { %9263 = vrcp.f32 %v2036_v50 }
 0x43f   : > { %v9260_v48 = vpop.eup %9259 }
 0x440   : > { %v2042_v43 = vpop.xlane.xlu1 %2041  ;;  %v2072_v17 = vmul.f32 %v9260_v48, %v10171_v12 }
 0x441   : > { %9265 = vrcp.f32 %v2042_v43 }
 0x442   : > { %7579 = vmatprep.mubr.msk.f32.mxu0 %vm641_vm1, %v2072_v17 }
 0x443   : > { %7580 = vmatmul.mubr.msk.f32.gmra.mrb[22].mxu0 %vm641_vm1, %v2073_v22  ;;  %v9262_v19 = vpop.eup %9261 }
 0x444   : > { %v2075_v2 = vmul.f32 %v9262_v19, %v10176_v20  ;;  %v2508_v32 = vpop.permute.xlu1 %2507 }
 0x447   : > { %v9264_v10 = vpop.eup %9263 }
 0x448   : > { %v2045_v38 = vpop.xlane.xlu0 %2044  ;;  %v2074_v0 = vmul.f32 %v9264_v10, %v10180_v5  ;;  %v2512_v27 = vpop.permute.xlu1 %2511 }
 0x449   : > { %9267 = vrcp.f32 %v2045_v38  ;;  %v10276_v55 = vpop.f32.mrb[64].mxu1 }
 0x44a   : > { %7582 = vmatprep.mubr.msk.f32.mxu0 %vm641_vm1, %v2074_v0  ;;  %v10280_v12 = vpop.f32.mrb[65].mxu1  ;;  %v2689_v42 = vsel %vm641_vm1, %v10276_v55, -inf }
 0x44b   : > { %v9266_v21 = vpop.eup %9265  ;;  %2690 = vmax.xlane.f32.xlu0 %v2689_v42  ;;  %7583 = vmatmul.mubr.msk.f32.gmra.mrb[24].mxu0 %vm641_vm1, %v2075_v2  ;;  %v2686_v33 = vsel %vm641_vm1, %v10280_v12, -inf }
 0x44c   : > { %2687 = vmax.xlane.f32.xlu1 %v2686_v33  ;;  %v2076_v5 = vmul.f32 %v9266_v21, %v10184_v15  ;;  %v2506_v20 = vpop.permute.xlu0 %2505  ;;  %v2516_v15 = vpop.permute.xlu1 %2515 }
 0x44e   : > { %7585 = vmatprep.mubr.msk.f32.mxu0 %vm641_vm1, %v2076_v5 }
 0x450   : > { %v2510_v37 = vpop.permute.xlu0 %2509 }
 0x453   : > { %v9268_v58 = vpop.eup %9267 }
 0x454   : > { %v2077_v6 = vmul.f32 %v9268_v58, %v10188_v41  ;;  %v2514_v9 = vpop.permute.xlu0 %2513  ;;  %v2520_v41 = vpop.permute.xlu1 %2519 }
 0x456   : > { %7586 = vmatmul.mubr.msk.f32.gmra.mrb[26].mxu0 %vm641_vm1, %v2077_v6 }
 0x457   : > { %7632 = vmatprep.mubr.msk.f32.mxu0 %vm1595_vm3, %v2506_v20 }
 0x458   : > { %v2518_v40 = vpop.permute.xlu0 %2517 }
 0x45a   : > { %7633 = vmatmul.mubr.msk.f32.vlgmr.msra.gmra.mrb[28].mxu0 %vm1595_vm3, %v2508_v32 }
 0x45b   : > { %7635 = vmatprep.mubr.msk.f32.mxu0 %vm1595_vm3, %v2510_v37 }
 0x45e   : > { %7636 = vmatmul.mubr.msk.f32.gmra.mrb[30].mxu0 %vm1595_vm3, %v2512_v27 }
 0x45f   : > { %7638 = vmatprep.mubr.msk.f32.mxu0 %vm1595_vm3, %v2514_v9 }
 0x462   : > { %7639 = vmatmul.mubr.msk.f32.gmra.mrb[32].mxu0 %vm1595_vm3, %v2516_v15 }
 0x463   : > { %7641 = vmatprep.mubr.msk.f32.mxu0 %vm1595_vm3, %v2518_v40 }
 0x466   : > { %7642 = vmatmul.mubr.msk.f32.gmra.mrb[34].mxu0 %vm1595_vm3, %v2520_v41 }
 0x481   : > { %v2679_v17 = vpop.xlane.xlu1 %2678 }
 0x482   : > { %v2723_v22 = vsub.f32 %v10096_v46, %v2679_v17 }
 0x484   : > { %v2740_v10 = vmul.f32 1.442695, %v2723_v22 }
 0x486   : > { %9269 = vpow2.f32 %v2740_v10 }
 0x489   : > { %v2676_v48 = vpop.xlane.xlu0 %2675 }
 0x48a   : > { %v2722_v9 = vsub.f32 %v10098_v51, %v2676_v48 }
 0x48d   : > { %v2682_v43 = vpop.xlane.xlu0 %2681 }
 0x48e   : > { %v2724_v38 = vsub.f32 %v10102_v1, %v2682_v43 }
 0x490   : > { %v2742_v21 = vmul.f32 1.442695, %v2724_v38  ;;  %v10359_v6 = vpop.eup %9269 }
 0x491   : > { %v2685_v19 = vpop.xlane.xlu0 %2684 }
 0x492   : > { %9271 = vpow2.f32 %v2742_v21 }
 0x49c   : > { %v10363_v37 = vpop.eup %9271 }
 0x49d   : > { %v2776_v15 = vsel %vm641_vm1, %v10363_v37, 0.0 }
 0x4d5   : > { %v10299_v36 = vpop.f32.mrb[12].mxu0 }
 0x4d6   : > { %11821 = vst [vmem:[#allocation16_spill] sm:$0xff] %v10299_v36  ;;  %v10301_v49 = vpop.f32.mrb[13].mxu0 }
 0x4d7   : > { %11822 = vst [vmem:[#allocation17_spill] sm:$0xff] %v10301_v49 }
 0x4d8   : > { %v2691_v0 = vpop.xlane.xlu0 %2690 }
 0x4d9   : > { %v2727_v33 = vsub.f32 %v10276_v55, %v2691_v0  ;;  %v2688_v46 = vpop.xlane.xlu1 %2687  ;;  %v2773_v55 = vsel %vm641_vm1, %v10359_v6, 0.0 }
 0x4da   : > { %v2726_v1 = vsub.f32 %v10280_v12, %v2688_v46 }
 0x4db   : > { %v2748_v5 = vmul.f32 1.442695, %v2727_v33 }
 0x4dc   : > { %v2746_v32 = vmul.f32 1.442695, %v2726_v1 }
 0x4dd   : > { %v10303_v16 = vpop.f32.mrb[14].mxu0  ;;  %9273 = vpow2.f32 %v2748_v5 }
 0x4de   : > { %11823 = vst [vmem:[#allocation18_spill] sm:$0xff] %v10303_v16  ;;  %v10305_v7 = vpop.f32.mrb[15].mxu0  ;;  %9275 = vpow2.f32 %v2746_v32 }
 0x4df   : > { %11824 = vst [vmem:[#allocation19_spill] sm:$0xff] %v10305_v7 }
 0x4e2   : > { %v10307_v11 = vpop.f32.mrb[16].mxu0 }
 0x4e3   : > { %11825 = vst [vmem:[#allocation20_spill] sm:$0xff] %v10307_v11  ;;  %v10309_v45 = vpop.f32.mrb[17].mxu0 }
 0x4e4   : > { %11826 = vst [vmem:[#allocation21_spill] sm:$0xff] %v10309_v45 }
 0x4e7   : > { %v10372_v40 = vpop.eup %9273 }
 0x4e8   : > { %v2785_v17 = vsel %vm641_vm1, %v10372_v40, 0.0  ;;  %v10381_v22 = vpop.eup %9275 }
 0x4e9   : > { %v10311_v29 = vpop.f32.mrb[18].mxu0  ;;  %v2782_v38 = vsel %vm641_vm1, %v10381_v22, 0.0 }
 0x4ea   : > { %11827 = vst [vmem:[#allocation22_spill] sm:$0xff] %v10311_v29  ;;  %v10313_v35 = vpop.f32.mrb[19].mxu0 }
 0x4eb   : > { %11828 = vst [vmem:[#allocation23_spill] sm:$0xff] %v10313_v35 }
 0x4ec   : > { %v10315_v39 = vpop.f32.mrb[66].mxu1 }
 0x4ed   : > { %v10317_v28 = vpop.f32.mrb[67].mxu1  ;;  %v2695_v34 = vsel %vm641_vm1, %v10315_v39, -inf }
 0x4ee   : > { %2696 = vmax.xlane.f32.xlu0 %v2695_v34  ;;  %v2692_v47 = vsel %vm641_vm1, %v10317_v28, -inf  ;;  %v2738_v34 = vmul.f32 1.442695, %v2722_v9 }
 0x4ef   : > { %2693 = vmax.xlane.f32.xlu1 %v2692_v47  ;;  %v2725_v47 = vsub.f32 %v10100_v54, %v2685_v19 }
 0x4f0   : > { %9277 = vpow2.f32 %v2738_v34 }
 0x4f1   : > { %v10323_v50 = vpop.f32.mrb[20].mxu0  ;;  %v2744_v48 = vmul.f32 1.442695, %v2725_v47 }
 0x4f2   : > { %11829 = vst [vmem:[#allocation24_spill] sm:$0xff] %v10323_v50  ;;  %v10325_v18 = vpop.f32.mrb[21].mxu0 }
 0x4f3   : > { %11830 = vst [vmem:[#allocation25_spill] sm:$0xff] %v10325_v18  ;;  %9279 = vpow2.f32 %v2744_v48 }
 0x4fa   : > { %v10397_v33 = vpop.eup %9277 }
 0x4fb   : > { %v2770_v46 = vsel %vm641_vm1, %v10397_v33, 0.0 }
 0x4fd   : > { %v10401_v5 = vpop.eup %9279 }
 0x4fe   : > { %v2779_v1 = vsel %vm641_vm1, %v10401_v5, 0.0 }
 0x500   : > { %8844 = vrot.lane.b32.xlu1 %v9967_v53, %s9481_s13 }
 0x504   : > { %8849 = vrot.lane.b32.xlu0 %v9975_v57, %s9481_s13  ;;  %8854 = vrot.lane.b32.xlu1 %v9979_v3, %s9481_s13 }
 0x508   : > { %8874 = vrot.lane.b32.xlu0 %v10004_v44, %s9481_s13  ;;  %8859 = vrot.lane.b32.xlu1 %v9998_v30, %s9481_s13 }
 0x50c   : > { %8864 = vrot.lane.b32.xlu1 %v9899_v14, %s9478_s27 }
 0x510   : > { %8869 = vrot.lane.b32.xlu1 %v9907_v26, %s9478_s27 }
 0x514   : > { %8879 = vrot.lane.b32.xlu1 %v10008_v52, %s9481_s13 }
 0x516   : > { %v10345_v2 = vpop.f32.mrb[22].mxu0 }
 0x517   : > { %11831 = vst [vmem:[#allocation26_spill] sm:$0xff] %v10345_v2  ;;  %v10347_v42 = vpop.f32.mrb[23].mxu0 }
 0x518   : > { %11832 = vst [vmem:[#allocation27_spill] sm:$0xff] %v10347_v42  ;;  %8884 = vrot.lane.b32.xlu1 %v9913_v31, %s9478_s27 }
 0x51c   : > { %8889 = vrot.lane.b32.xlu1 %v10013_v56, %s9481_s13 }
 0x51e   : > { %v10355_v20 = vpop.f32.mrb[24].mxu0 }
 0x51f   : > { %11833 = vst [vmem:[#allocation28_spill] sm:$0xff] %v10355_v20  ;;  %v10357_v58 = vpop.f32.mrb[25].mxu0 }
 0x520   : > { %11834 = vst [vmem:[#allocation29_spill] sm:$0xff] %v10357_v58 }
 0x527   : > { %2774 = vadd.xlane.f32.xlu0 %v2773_v55  ;;  %v11837_v55 = vld [vmem:[#allocation14_spill] sm:$0xff] }
 0x529   : > { %v10365_v27 = vpop.f32.mrb[26].mxu0 }
 0x52a   : > { %11835 = vst [vmem:[#allocation30_spill] sm:$0xff] %v10365_v27  ;;  %v10368_v12 = vpop.f32.mrb[27].mxu0 }
 0x52b   : > { %11836 = vst [vmem:[#allocation31_spill] sm:$0xff] %v10368_v12  ;;  %2777 = vadd.xlane.f32.xlu0 %v2776_v15 }
 0x52d   : > { %v10374_v41 = vpop.f32.mrb[28].mxu0 }
 0x52e   : > { %v10377_v43 = vpop.f32.mrb[29].mxu0 }
 0x52f   : > { %2786 = vadd.xlane.f32.xlu0 %v2785_v17  ;;  %v2698_v32 = vsel %vm641_vm1, %v10377_v43, -inf }
 0x531   : > { %v10383_v51 = vpop.f32.mrb[30].mxu0 }
 0x532   : > { %v10385_v10 = vpop.f32.mrb[31].mxu0 }
 0x533   : > { %2783 = vadd.xlane.f32.xlu0 %v2782_v38  ;;  %v2704_v47 = vsel %vm641_vm1, %v10385_v10, -inf }
 0x535   : > { %v10389_v0 = vpop.f32.mrb[32].mxu0 }
 0x536   : > { %v10391_v54 = vpop.f32.mrb[33].mxu0 }
 0x539   : > { %v10393_v19 = vpop.f32.mrb[34].mxu0 }
 0x53a   : > { %v10395_v21 = vpop.f32.mrb[35].mxu0 }
 0x540   : > { %2771 = vadd.xlane.f32.xlu1 %v2770_v46 }
 0x544   : > { %2780 = vadd.xlane.f32.xlu1 %v2779_v1 }
 0x548   : > { %2699 = vmax.xlane.f32.xlu1 %v2698_v32  ;;  %v2710_v32 = vsel %vm641_vm1, %v10391_v54, -inf }
 0x559   : > { %8894 = vrot.lane.b32.xlu1 %v11837_v55, %s9481_s13 }
 0x57b   : > { %v2697_v9 = vpop.xlane.xlu0 %2696 }
 0x57c   : > { %v2729_v15 = vsub.f32 %v10315_v39, %v2697_v9  ;;  %v2694_v34 = vpop.xlane.xlu1 %2693 }
 0x57d   : > { %v2728_v17 = vsub.f32 %v10317_v28, %v2694_v34  ;;  %2705 = vmax.xlane.f32.xlu1 %v2704_v47 }
 0x57e   : > { %v2752_v48 = vmul.f32 1.442695, %v2729_v15  ;;  %v2716_v15 = vsel %vm641_vm1, %v10395_v21, -inf }
 0x57f   : > { %v2750_v38 = vmul.f32 1.442695, %v2728_v17  ;;  %v8850_v46 = vpop.permute.xlu0 %8849 }
 0x580   : > { %9281 = vpow2.f32 %v2752_v48  ;;  %v8845_v1 = vpop.permute.xlu1 %8844  ;;  %v8852_v27 = vunpack.i.h.bf16 %v8850_v46  ;;  %v8851_v12 = vunpack.i.l.bf16 %v8850_v46 }
 0x581   : > { %v8847_v20 = vunpack.i.h.bf16 %v8845_v1  ;;  %v8846_v58 = vunpack.i.l.bf16 %v8845_v1  ;;  %2711 = vmax.xlane.f32.xlu1 %v2710_v32  ;;  %9283 = vpow2.f32 %v2750_v38 }
 0x582   : > { %v8428_v17 = vpack.c.bf16 %v8852_v27, %v8851_v12 }
 0x583   : > { %v8875_v39 = vpop.permute.xlu0 %8874  ;;  %v8424_v9 = vpack.c.bf16 %v8847_v20, %v8846_v58 }
 0x584   : > { %v8877_v2 = vunpack.i.h.bf16 %v8875_v39  ;;  %v8876_v42 = vunpack.i.l.bf16 %v8875_v39  ;;  %v8855_v28 = vpop.permute.xlu1 %8854 }
 0x585   : > { %v8857_v34 = vunpack.i.h.bf16 %v8855_v28  ;;  %v8856_v47 = vunpack.i.l.bf16 %v8855_v28  ;;  %2717 = vmax.xlane.f32.xlu1 %v2716_v15  ;;  %8425 = vmatprep.subr.bf16.mxu1 %v8424_v9 }
 0x586   : > { %8427 = vmatpush3.bf16.msra.mxu1 %v8424_v9  ;;  %v8440_v48 = vpack.c.bf16 %v8877_v2, %v8876_v42 }
 0x587   : > { %8429 = vmatprep.subr.bf16.mxu1 %v8428_v17  ;;  %v8432_v20 = vpack.c.bf16 %v8857_v34, %v8856_v47  ;;  %v2701_v34 = vsel %vm641_vm1, %v10374_v41, -inf }
 0x588   : > { %8441 = vmatprep.subr.bf16.mxu0 %v8440_v48  ;;  %v8860_v46 = vpop.permute.xlu1 %8859 }
 0x589   : > { %v8862_v1 = vunpack.i.h.bf16 %v8860_v46  ;;  %v8861_v38 = vunpack.i.l.bf16 %v8860_v46  ;;  %8443 = vmatpush3.bf16.msra.mxu0 %v8440_v48  ;;  %v11838_v46 = vld [vmem:[#allocation9_spill] sm:$0xff] }
 0x58a   : > { %v10417_v58 = vpop.eup %9281  ;;  %8431 = vmatpush3.bf16.msra.mxu1 %v8428_v17 }
 0x58b   : > { %8433 = vmatprep.subr.bf16.mxu1 %v8432_v20  ;;  %v2791_v32 = vsel %vm641_vm1, %v10417_v58, 0.0  ;;  %v10421_v39 = vpop.eup %9283  ;;  %v8436_v42 = vpack.c.bf16 %v8862_v1, %v8861_v38  ;;  %v2707_v1 = vsel %vm641_vm1, %v10383_v51, -inf }
 0x58c   : > { %2792 = vadd.xlane.f32.xlu0 %v2791_v32  ;;  %v8865_v27 = vpop.permute.xlu1 %8864  ;;  %v2788_v9 = vsel %vm641_vm1, %v10421_v39, 0.0  ;;  %v11839_v32 = vld [vmem:[#allocation10_spill] sm:$0xff] }
 0x58d   : > { %v8867_v12 = vunpack.i.h.bf16 %v8865_v27  ;;  %v8866_v2 = vunpack.i.l.bf16 %v8865_v27  ;;  %v2713_v27 = vsel %vm641_vm1, %v10389_v0, -inf }
 0x58e   : > { %8435 = vmatpush3.bf16.msra.mxu1 %v8432_v20 }
 0x58f   : > { %8437 = vmatprep.subr.bf16.mxu1 %v8436_v42  ;;  %v10427_v15 = vpack.c.bf16 %v8867_v12, %v8866_v2 }
 0x590   : > { %2789 = vadd.xlane.f32.xlu0 %v2788_v9  ;;  %v10425_v28 = vpop.permute.xlu1 %8869  ;;  %v11840_v9 = vld [vmem:[#allocation11_spill] sm:$0xff] }
 0x591   : > { %v8872_v49 = vunpack.i.h.bf16 %v10425_v28  ;;  %v8871_v36 = vunpack.i.l.bf16 %v10425_v28 }
 0x592   : > { %8439 = vmatpush3.bf16.msra.mxu1 %v8436_v42 }
 0x593   : > { %8458 = vmatprep.subr.msk.bf16.mxu1 %vm9895_vm4, %v10427_v15 }
 0x594   : > { %2702 = vmax.xlane.f32.xlu0 %v2701_v34  ;;  %v8880_v47 = vpop.permute.xlu1 %8879  ;;  %v2719_v34 = vsel %vm641_vm1, %v10393_v19, -inf }
 0x595   : > { %v8882_v17 = vunpack.i.h.bf16 %v8880_v47  ;;  %v8881_v48 = vunpack.i.l.bf16 %v8880_v47 }
 0x596   : > { %8899 = vrot.lane.b32.xlu1 %v11838_v46, %s9478_s27 }
 0x597   : > { %v8444_v38 = vpack.c.bf16 %v8882_v17, %v8881_v48  ;;  %v11841_v17 = vld [vmem:[#allocation5_spill] sm:$0xff]  ;;  %v11842_v48 = vld [vmem:[#allocation4_spill] sm:$0xff] }
 0x598   : > { %2708 = vmax.xlane.f32.xlu0 %v2707_v1  ;;  %v10438_v20 = vpop.permute.xlu1 %8884  ;;  %v11843_v1 = vld [vmem:[#allocation7_spill] sm:$0xff] }
 0x599   : > { %8445 = vmatprep.subr.bf16.mxu0 %v8444_v38 }
 0x59a   : > { %8904 = vrot.lane.b32.xlu1 %v11839_v32, %s9478_s27  ;;  %8447 = vmatpush3.bf16.msra.mxu0 %v8444_v38  ;;  %v11844_v38 = vld [vmem:[#allocation6_spill] sm:$0xff] }
 0x59c   : > { %2714 = vmax.xlane.f32.xlu0 %v2713_v27  ;;  %v8890_v12 = vpop.permute.xlu1 %8889  ;;  %v11845_v27 = vld [vmem:[#allocation3_spill] sm:$0xff] }
 0x59d   : > { %v8892_v2 = vunpack.i.h.bf16 %v8890_v12  ;;  %v8891_v42 = vunpack.i.l.bf16 %v8890_v12  ;;  %v11846_v12 = vld [vmem:[#allocation2_spill] sm:$0xff] }
 0x59e   : > { %8909 = vrot.lane.b32.xlu1 %v11840_v9, %s9478_s27 }
 0x59f   : > { %v8448_v47 = vpack.c.bf16 %v8892_v2, %v8891_v42  ;;  %v11847_v42 = vld [vmem:[#allocation12_spill] sm:$0xff] }
 0x5a0   : > { %2720 = vmax.xlane.f32.xlu0 %v2719_v34 }
 0x5a1   : > { %8449 = vmatprep.subr.bf16.mxu0 %v8448_v47 }
 0x5a2   : > { %3176 = vrot.lane.b32.xlu1 %v11841_v17, %s9478_s27  ;;  %8451 = vmatpush3.bf16.msra.mxu0 %v8448_v47  ;;  %v11848_v47 = vld [vmem:[#allocation13_spill] sm:$0xff] }
 0x5a6   : > { %3178 = vrot.lane.b32.xlu1 %v11842_v48, %s9478_s27 }
 0x5aa   : > { %3180 = vrot.lane.b32.xlu1 %v11843_v1, %s9478_s27 }
 0x5ae   : > { %3182 = vrot.lane.b32.xlu1 %v11844_v38, %s9478_s27 }
 0x5b2   : > { %3186 = vrot.lane.b32.xlu1 %v9869_v23, %s9478_s27 }
 0x5b4   : > { %v2775_v2 = vpop.xlane.xlu0 %2774 }
 0x5b5   : > { %9285 = vrcp.f32 %v2775_v2 }
 0x5b6   : > { %3172 = vrot.lane.b32.xlu0 %v11845_v27, %s9478_s27 }
 0x5b8   : > { %v2778_v34 = vpop.xlane.xlu0 %2777 }
 0x5b9   : > { %9287 = vrcp.f32 %v2778_v34 }
 0x5ba   : > { %3174 = vrot.lane.b32.xlu0 %v11846_v12, %s9478_s27 }
 0x5bc   : > { %v2787_v50 = vpop.xlane.xlu0 %2786 }
 0x5be   : > { %8914 = vrot.lane.b32.xlu0 %v11847_v42, %s9478_s27 }
 0x5bf   : > { %v9286_v45 = vpop.eup %9285 }
 0x5c0   : > { %v2784_v29 = vpop.xlane.xlu0 %2783  ;;  %v2835_v2 = vmul.f32 %v9286_v45, %v10359_v6 }
 0x5c2   : > { %8919 = vrot.lane.b32.xlu0 %v11848_v47, %s9478_s27 }
 0x5c3   : > { %v9288_v16 = vpop.eup %9287 }
 0x5cd   : > { %v2772_v18 = vpop.xlane.xlu1 %2771 }
 0x5ce   : > { %9289 = vrcp.f32 %v2772_v18 }
 0x5cf   : > { %9291 = vrcp.f32 %v2784_v29  ;;  %v2836_v29 = vmul.f32 %v9288_v16, %v10363_v37 }
 0x5d1   : > { %v2781_v35 = vpop.xlane.xlu1 %2780 }
 0x5d2   : > { %9293 = vrcp.f32 %v2781_v35 }
 0x5d3   : > { %9295 = vrcp.f32 %v2787_v50  ;;  %v8462_v50 = vpack.c.bf16 %v8872_v49, %v8871_v36  ;;  %v8887_v36 = vunpack.i.h.bf16 %v10438_v20 }
 0x5d5   : > { %v2700_v11 = vpop.xlane.xlu1 %2699 }
 0x5d8   : > { %v9290_v7 = vpop.eup %9289 }
 0x5d9   : > { %v8895_v42 = vpop.permute.xlu1 %8894  ;;  %v2834_v47 = vmul.f32 %v9290_v7, %v10397_v33  ;;  %v9292_v18 = vpop.eup %9291 }
 0x5da   : > { %v8897_v34 = vunpack.i.h.bf16 %v8895_v42  ;;  %v8896_v23 = vunpack.i.l.bf16 %v8895_v42  ;;  %v2838_v16 = vmul.f32 %v9292_v18, %v10381_v22  ;;  %v2730_v18 = vsub.f32 %v10377_v43, %v2700_v11 }
 0x5db   : > { %7660 = vmatprep.mubr.msk.f32.mxu1 %vm641_vm1, %v2834_v47 }
 0x5dc   : > { %v9294_v35 = vpop.eup %9293  ;;  %7661 = vmatmul.mubr.msk.f32.vlgmr.msra.gmra.mrb[68].mxu1 %vm641_vm1, %v2835_v2  ;;  %v8452_v38 = vpack.c.bf16 %v8897_v34, %v8896_v23  ;;  %v8886_v23 = vunpack.i.l.bf16 %v10438_v20 }
 0x5dd   : > { %8461 = vmatpush3.bf16.xpose.msk.msra.mxu1 %vm9895_vm4, %v10427_v15  ;;  %7663 = vmatprep.mubr.msk.f32.mxu1 %vm641_vm1, %v2836_v29  ;;  %v2837_v7 = vmul.f32 %v9294_v35, %v10401_v5  ;;  %v9296_v45 = vpop.eup %9295 }
 0x5de   : > { %8464 = vmatprep.subr.msk.bf16.mxu1 %vm9895_vm4, %v8462_v50  ;;  %8453 = vmatprep.subr.bf16.mxu0 %v8452_v38  ;;  %v2839_v49 = vmul.f32 %v9296_v45, %v10372_v40  ;;  %v8468_v6 = vpack.c.bf16 %v8887_v36, %v8886_v23 }
 0x5df   : > { %8455 = vmatpush3.bf16.msra.mxu0 %v8452_v38 }
 0x5e0   : > { %7664 = vmatmul.mubr.msk.f32.gmra.mrb[70].mxu1 %vm641_vm1, %v2837_v7 }
 0x5e1   : > { %7666 = vmatprep.mubr.msk.f32.mxu1 %vm641_vm1, %v2838_v16 }
 0x5e4   : > { %7667 = vmatmul.mubr.msk.f32.gmra.mrb[72].mxu1 %vm641_vm1, %v2839_v49 }
 0x5e5   : > { %8467 = vmatpush3.bf16.xpose.msk.msra.mxu1 %vm9895_vm4, %v8462_v50  ;;  %v2754_v50 = vmul.f32 1.442695, %v2730_v18 }
 0x5e6   : > { %8470 = vmatprep.subr.msk.bf16.mxu1 %vm9895_vm4, %v8468_v6 }
 0x5ed   : > { %8473 = vmatpush3.bf16.xpose.msk.msra.mxu1 %vm9895_vm4, %v8468_v6 }
 0x60a   : > { %v10493_v37 = vpop.xlane.xlu1 %2705 }
 0x60e   : > { %v10495_v22 = vpop.xlane.xlu1 %2711 }
 0x612   : > { %v2718_v33 = vpop.xlane.xlu1 %2717 }
 0x613   : > { %v2736_v7 = vsub.f32 %v10395_v21, %v2718_v33 }
 0x616   : > { %v8900_v5 = vpop.permute.xlu1 %8899 }
 0x617   : > { %v8902_v28 = vunpack.i.h.bf16 %v8900_v5  ;;  %v8901_v40 = vunpack.i.l.bf16 %v8900_v5  ;;  %v2766_v5 = vmul.f32 1.442695, %v2736_v7 }
 0x619   : > { %v8474_v15 = vpack.c.bf16 %v8902_v28, %v8901_v40  ;;  %v2793_v20 = vpop.xlane.xlu0 %2792 }
 0x61a   : > { %v8905_v38 = vpop.permute.xlu1 %8904  ;;  %9297 = vrcp.f32 %v2793_v20 }
 0x61b   : > { %v8907_v42 = vunpack.i.h.bf16 %v8905_v38  ;;  %v8906_v47 = vunpack.i.l.bf16 %v8905_v38  ;;  %8476 = vmatprep.subr.msk.bf16.mxu1 %vm9895_vm4, %v8474_v15 }
 0x61c   : > { %8479 = vmatpush3.bf16.xpose.msk.msra.mxu1 %vm9895_vm4, %v8474_v15 }
 0x61d   : > { %v10501_v2 = vpack.c.bf16 %v8907_v42, %v8906_v47  ;;  %v2790_v34 = vpop.xlane.xlu0 %2789 }
 0x61e   : > { %9299 = vrcp.f32 %v2790_v34  ;;  %v10509_v36 = vpop.permute.xlu1 %8909 }
 0x61f   : > { %8482 = vmatprep.subr.msk.bf16.mxu0 %vm9895_vm4, %v10501_v2 }
 0x621   : > { %v2703_v29 = vpop.xlane.xlu0 %2702 }
 0x622   : > { %v2731_v35 = vsub.f32 %v10374_v41, %v2703_v29  ;;  %v3177_v43 = vpop.permute.xlu1 %3176 }
 0x624   : > { %v2756_v45 = vmul.f32 1.442695, %v2731_v35  ;;  %v9298_v49 = vpop.eup %9297 }
 0x625   : > { %v2709_v16 = vpop.xlane.xlu0 %2708  ;;  %v2841_v41 = vmul.f32 %v9298_v49, %v10417_v58 }
 0x626   : > { %9301 = vpow2.f32 %v2756_v45  ;;  %v2733_v23 = vsub.f32 %v10383_v51, %v2709_v16  ;;  %v3179_v38 = vpop.permute.xlu1 %3178  ;;  %v2734_v16 = vsub.f32 %v10391_v54, %v10495_v22 }
 0x627   : > { %9303 = vpow2.f32 %v2754_v50  ;;  %v2732_v50 = vsub.f32 %v10385_v10, %v10493_v37 }
 0x628   : > { %v9300_v6 = vpop.eup %9299  ;;  %v2760_v28 = vmul.f32 1.442695, %v2733_v23  ;;  %v2762_v49 = vmul.f32 1.442695, %v2734_v16 }
 0x629   : > { %v2715_v40 = vpop.xlane.xlu0 %2714  ;;  %v2840_v11 = vmul.f32 %v9300_v6, %v10421_v39  ;;  %v2758_v7 = vmul.f32 1.442695, %v2732_v50 }
 0x62a   : > { %9305 = vpow2.f32 %v2760_v28  ;;  %v3181_v18 = vpop.permute.xlu1 %3180  ;;  %v2735_v45 = vsub.f32 %v10389_v0, %v2715_v40 }
 0x62b   : > { %7669 = vmatprep.mubr.msk.f32.mxu1 %vm641_vm1, %v2840_v11  ;;  %9307 = vpow2.f32 %v2766_v5 }
 0x62c   : > { %7670 = vmatmul.mubr.msk.f32.gmra.mrb[74].mxu1 %vm641_vm1, %v2841_v41  ;;  %9309 = vpow2.f32 %v2758_v7  ;;  %v2764_v23 = vmul.f32 1.442695, %v2735_v45 }
 0x62d   : > { %v2721_v21 = vpop.xlane.xlu0 %2720 }
 0x62e   : > { %v3183_v35 = vpop.permute.xlu1 %3182  ;;  %9311 = vpow2.f32 %v2764_v23  ;;  %v2737_v6 = vsub.f32 %v10393_v19, %v2721_v21  ;;  %v8912_v23 = vunpack.i.h.bf16 %v10509_v36 }
 0x62f   : > { %9313 = vpow2.f32 %v2762_v49  ;;  %v8911_v49 = vunpack.i.l.bf16 %v10509_v36 }
 0x630   : > { %v10516_v33 = vpop.eup %9301  ;;  %v2768_v5 = vmul.f32 1.442695, %v2737_v6 }
 0x631   : > { %v3173_v51 = vpop.permute.xlu0 %3172  ;;  %v2797_v15 = vsel %vm641_vm1, %v10516_v33, 0.0  ;;  %v10520_v20 = vpop.eup %9303 }
 0x632   : > { %2798 = vadd.xlane.f32.xlu0 %v2797_v15  ;;  %7716 = vmatprep.mubr.msk.f32.mxu1 %vm1595_vm3, %v3173_v51  ;;  %v2794_v47 = vsel %vm641_vm1, %v10520_v20, 0.0  ;;  %9315 = vpow2.f32 %v2768_v5  ;;  %v3187_v7 = vpop.permute.xlu1 %3186 }
 0x634   : > { %v10523_v58 = vpop.eup %9305 }
 0x635   : > { %v3175_v39 = vpop.permute.xlu0 %3174  ;;  %v2803_v42 = vsel %vm641_vm1, %v10523_v58, 0.0  ;;  %v10529_v34 = vpop.eup %9307 }
 0x636   : > { %2804 = vadd.xlane.f32.xlu1 %v2803_v42  ;;  %2795 = vadd.xlane.f32.xlu0 %v2794_v47  ;;  %v2812_v29 = vsel %vm641_vm1, %v10529_v34, 0.0  ;;  %v10554_v28 = vpop.eup %9309 }
 0x637   : > { %7717 = vmatmul.mubr.msk.f32.vlgmr.msra.gmra.mrb[76].mxu1 %vm1595_vm3, %v3175_v39  ;;  %v2800_v10 = vsel %vm641_vm1, %v10554_v28, 0.0 }
 0x638   : > { %7719 = vmatprep.mubr.msk.f32.mxu1 %vm1595_vm3, %v3177_v43  ;;  %v10558_v37 = vpop.eup %9311 }
 0x639   : > { %v2809_v0 = vsel %vm641_vm1, %v10558_v37, 0.0  ;;  %v10562_v54 = vpop.eup %9313  ;;  %v8915_v15 = vpop.permute.xlu0 %8914 }
 0x63a   : > { %2813 = vadd.xlane.f32.xlu1 %v2812_v29  ;;  %v2806_v19 = vsel %vm641_vm1, %v10562_v54, 0.0 }
 0x63b   : > { %7720 = vmatmul.mubr.msk.f32.gmra.mrb[78].mxu1 %vm1595_vm3, %v3179_v38 }
 0x63c   : > { %7722 = vmatprep.mubr.msk.f32.mxu1 %vm1595_vm3, %v3181_v18  ;;  %v10566_v22 = vpop.eup %9315 }
 0x63d   : > { %v2815_v40 = vsel %vm641_vm1, %v10566_v22, 0.0  ;;  %v8920_v18 = vpop.permute.xlu0 %8919 }
 0x63e   : > { %v8922_v36 = vunpack.i.h.bf16 %v8920_v18 }
 0x63f   : > { %7723 = vmatmul.mubr.msk.f32.gmra.mrb[80].mxu1 %vm1595_vm3, %v3183_v35 }
 0x64b   : > { %3343 = vrot.lane.b32.xlu1 %v9875_v25, %s9478_s27 }
 0x64c   : > { %3184 = vrot.lane.b32.xlu0 %v9873_v24, %s9478_s27 }
 0x64f   : > { %3347 = vrot.lane.b32.xlu1 %v9881_v60, %s9478_s27 }
 0x653   : > { %3351 = vrot.lane.b32.xlu1 %v9885_v62, %s9478_s27 }
 0x657   : > { %3355 = vrot.lane.b32.xlu1 %v9889_v4, %s9478_s27 }
 0x66b   : > { %2801 = vadd.xlane.f32.xlu0 %v2800_v10  ;;  %v8486_v10 = vpack.c.bf16 %v8912_v23, %v8911_v49 }
 0x66f   : > { %2810 = vadd.xlane.f32.xlu0 %v2809_v0  ;;  %v8917_v0 = vunpack.i.h.bf16 %v8915_v15 }
 0x673   : > { %2807 = vadd.xlane.f32.xlu0 %v2806_v19  ;;  %v8916_v19 = vunpack.i.l.bf16 %v8915_v15 }
 0x677   : > { %2816 = vadd.xlane.f32.xlu0 %v2815_v40  ;;  %v8492_v40 = vpack.c.bf16 %v8917_v0, %v8916_v19 }
 0x68d   : > { %3341 = vrot.lane.b32.xlu0 %v9877_v59, %s9478_s27 }
 0x691   : > { %3345 = vrot.lane.b32.xlu0 %v9883_v61, %s9478_s27 }
 0x695   : > { %3349 = vrot.lane.b32.xlu0 %v9887_v63, %s9478_s27 }
 0x699   : > { %3353 = vrot.lane.b32.xlu0 %v9891_v8, %s9478_s27 }
 0x6af   : > { %v10578_v11 = vpop.f32.mrb[68].mxu1 }
 0x6b0   : > { %v10580_v41 = vpop.f32.mrb[69].mxu1 }
 0x6b3   : > { %v10584_v21 = vpop.f32.mrb[70].mxu1 }
 0x6b4   : > { %v10586_v51 = vpop.f32.mrb[71].mxu1 }
 0x6b7   : > { %v10590_v39 = vpop.f32.mrb[72].mxu1 }
 0x6b8   : > { %v10592_v42 = vpop.f32.mrb[73].mxu1 }
 0x6bf   : > { %v2799_v29 = vpop.xlane.xlu0 %2798 }
 0x6c0   : > { %9317 = vrcp.f32 %v2799_v29 }
 0x6c3   : > { %v2796_v35 = vpop.xlane.xlu0 %2795 }
 0x6c4   : > { %9319 = vrcp.f32 %v2796_v35 }
 0x6c7   : > { %v3185_v50 = vpop.permute.xlu0 %3184 }
 0x6c8   : > { %7725 = vmatprep.mubr.msk.f32.mxu1 %vm1595_vm3, %v3185_v50 }
 0x6c9   : > { %7726 = vmatmul.mubr.msk.f32.gmra.mrb[82].mxu1 %vm1595_vm3, %v3187_v7 }
 0x6ca   : > { %v9318_v45 = vpop.eup %9317 }
 0x6cb   : > { %v2843_v5 = vmul.f32 %v9318_v45, %v10516_v33  ;;  %v8921_v33 = vunpack.i.l.bf16 %v8920_v18 }
 0x6ce   : > { %v9320_v16 = vpop.eup %9319 }
 0x6cf   : > { %v2842_v6 = vmul.f32 %v9320_v16, %v10520_v20  ;;  %v8498_v20 = vpack.c.bf16 %v8922_v36, %v8921_v33 }
 0x6d1   : > { %7688 = vmatprep.mubr.msk.f32.mxu0 %vm641_vm1, %v2842_v6 }
 0x6d2   : > { %7689 = vmatmul.mubr.msk.f32.vlgmr.msra.gmra.mrb[36].mxu0 %vm641_vm1, %v2843_v5 }
 0x6d3   : > { %8485 = vmatpush3.bf16.xpose.msk.msra.mxu0 %vm9895_vm4, %v10501_v2  ;;  %v2805_v2 = vpop.xlane.xlu1 %2804 }
 0x6d4   : > { %8488 = vmatprep.subr.msk.bf16.mxu0 %vm9895_vm4, %v8486_v10  ;;  %9321 = vrcp.f32 %v2805_v2 }
 0x6d7   : > { %v2814_v29 = vpop.xlane.xlu1 %2813 }
 0x6db   : > { %8491 = vmatpush3.bf16.xpose.msk.msra.mxu0 %vm9895_vm4, %v8486_v10 }
 0x6dc   : > { %8494 = vmatprep.subr.msk.bf16.mxu0 %vm9895_vm4, %v8492_v40 }
 0x6de   : > { %v9322_v16 = vpop.eup %9321 }
 0x6df   : > { %v2845_v5 = vmul.f32 %v9322_v16, %v10523_v58  ;;  %v3344_v16 = vpop.permute.xlu1 %3343 }
 0x6e3   : > { %8497 = vmatpush3.bf16.xpose.msk.msra.mxu0 %vm9895_vm4, %v8492_v40 }
 0x6e4   : > { %8500 = vmatprep.subr.msk.bf16.mxu0 %vm9895_vm4, %v8498_v20 }
 0x6eb   : > { %8503 = vmatpush3.bf16.xpose.msk.msra.mxu0 %vm9895_vm4, %v8498_v20 }
 0x6f8   : > { %v2802_v15 = vpop.xlane.xlu0 %2801 }
 0x6f9   : > { %9323 = vrcp.f32 %v2802_v15 }
 0x6fa   : > { %9325 = vrcp.f32 %v2814_v29 }
 0x6fc   : > { %v2811_v35 = vpop.xlane.xlu0 %2810 }
 0x6fd   : > { %9327 = vrcp.f32 %v2811_v35 }
 0x6ff   : > { %v10619_v50 = vpop.f32.mrb[74].mxu1 }
 0x700   : > { %11849 = vst [vmem:[#allocation14_spill] sm:$0xff] %v10619_v50  ;;  %v2808_v18 = vpop.xlane.xlu0 %2807  ;;  %v10621_v7 = vpop.f32.mrb[75].mxu1 }
 0x701   : > { %11850 = vst [vmem:[#allocation9_spill] sm:$0xff] %v10621_v7  ;;  %9329 = vrcp.f32 %v2808_v18 }
 0x703   : > { %v9324_v23 = vpop.eup %9323 }
 0x704   : > { %v2817_v49 = vpop.xlane.xlu0 %2816  ;;  %v2844_v6 = vmul.f32 %v9324_v23, %v10554_v28  ;;  %v9326_v10 = vpop.eup %9325 }
 0x705   : > { %9331 = vrcp.f32 %v2817_v49  ;;  %v2848_v29 = vmul.f32 %v9326_v10, %v10529_v34  ;;  %v3348_v10 = vpop.permute.xlu1 %3347 }
 0x706   : > { %7691 = vmatprep.mubr.msk.f32.mxu0 %vm641_vm1, %v2844_v6 }
 0x707   : > { %7692 = vmatmul.mubr.msk.f32.gmra.mrb[38].mxu0 %vm641_vm1, %v2845_v5  ;;  %v9328_v0 = vpop.eup %9327 }
 0x708   : > { %v3342_v20 = vpop.permute.xlu0 %3341  ;;  %v2847_v2 = vmul.f32 %v9328_v0, %v10558_v37 }
 0x70a   : > { %v10629_v19 = vpop.f32.mrb[76].mxu1 }
 0x70b   : > { %v9330_v40 = vpop.eup %9329  ;;  %v10631_v36 = vpop.f32.mrb[77].mxu1  ;;  %v3513_v33 = vsel %vm641_vm1, %v10629_v19, -inf }
 0x70c   : > { %3514 = vmax.xlane.f32.xlu1 %v3513_v33  ;;  %v3510_v28 = vsel %vm641_vm1, %v10631_v36, -inf  ;;  %v2846_v58 = vmul.f32 %v9330_v40, %v10562_v54  ;;  %v3346_v49 = vpop.permute.xlu0 %3345  ;;  %v3352_v40 = vpop.permute.xlu1 %3351 }
 0x70d   : > { %3511 = vmax.xlane.f32.xlu0 %v3510_v28 }
 0x70e   : > { %v10639_v15 = vpop.f32.mrb[78].mxu1  ;;  %7694 = vmatprep.mubr.msk.f32.mxu0 %vm641_vm1, %v2846_v58 }
 0x70f   : > { %v9332_v35 = vpop.eup %9331  ;;  %v10643_v18 = vpop.f32.mrb[79].mxu1  ;;  %7695 = vmatmul.mubr.msk.f32.gmra.mrb[40].mxu0 %vm641_vm1, %v2847_v2  ;;  %v3519_v34 = vsel %vm641_vm1, %v10639_v15, -inf }
 0x710   : > { %7697 = vmatprep.mubr.msk.f32.mxu0 %vm641_vm1, %v2848_v29  ;;  %v3516_v54 = vsel %vm641_vm1, %v10643_v18, -inf  ;;  %v2849_v23 = vmul.f32 %v9332_v35, %v10566_v22  ;;  %v3350_v0 = vpop.permute.xlu0 %3349  ;;  %v3356_v28 = vpop.permute.xlu1 %3355 }
 0x711   : > { %3517 = vmax.xlane.f32.xlu0 %v3516_v54 }
 0x712   : > { %v10650_v37 = vpop.f32.mrb[80].mxu1 }
 0x713   : > { %v10652_v6 = vpop.f32.mrb[81].mxu1  ;;  %7698 = vmatmul.mubr.msk.f32.gmra.mrb[42].mxu0 %vm641_vm1, %v2849_v23  ;;  %v3525_v22 = vsel %vm641_vm1, %v10650_v37, -inf }
 0x714   : > { %7744 = vmatprep.mubr.msk.f32.mxu0 %vm1595_vm3, %v3342_v20  ;;  %v3522_v5 = vsel %vm641_vm1, %v10652_v6, -inf  ;;  %v3354_v33 = vpop.permute.xlu0 %3353 }
 0x715   : > { %3520 = vmax.xlane.f32.xlu0 %v3519_v34  ;;  %3523 = vmax.xlane.f32.xlu1 %v3522_v5 }
 0x717   : > { %7745 = vmatmul.mubr.msk.f32.vlgmr.msra.gmra.mrb[44].mxu0 %vm1595_vm3, %v3344_v16 }
 0x718   : > { %7747 = vmatprep.mubr.msk.f32.mxu0 %vm1595_vm3, %v3346_v49 }
 0x719   : > { %3526 = vmax.xlane.f32.xlu0 %v3525_v22 }
 0x71b   : > { %7748 = vmatmul.mubr.msk.f32.gmra.mrb[46].mxu0 %vm1595_vm3, %v3348_v10 }
 0x71c   : > { %7750 = vmatprep.mubr.msk.f32.mxu0 %vm1595_vm3, %v3350_v0 }
 0x71f   : > { %7751 = vmatmul.mubr.msk.f32.gmra.mrb[48].mxu0 %vm1595_vm3, %v3352_v40 }
 0x720   : > { %7753 = vmatprep.mubr.msk.f32.mxu0 %vm1595_vm3, %v3354_v33 }
 0x723   : > { %7754 = vmatmul.mubr.msk.f32.gmra.mrb[50].mxu0 %vm1595_vm3, %v3356_v28 }
 0x79a   : > { %v3512_v23 = vpop.xlane.xlu0 %3511 }
 0x79c   : > { %v10669_v58 = vpop.f32.mrb[82].mxu1 }
 0x79d   : > { %v10671_v20 = vpop.f32.mrb[83].mxu1  ;;  %v3531_v2 = vsel %vm641_vm1, %v10669_v58, -inf }
 0x79e   : > { %3532 = vmax.xlane.f32.xlu0 %v3531_v2  ;;  %v3528_v29 = vsel %vm641_vm1, %v10671_v20, -inf  ;;  %v3518_v49 = vpop.xlane.xlu0 %3517 }
 0x79f   : > { %3529 = vmax.xlane.f32.xlu1 %v3528_v29 }
 0x7a2   : > { %v3521_v34 = vpop.xlane.xlu0 %3520 }
 0x7a5   : > { %v10677_v35 = vpop.f32.mrb[36].mxu0 }
 0x7a6   : > { %11851 = vst [vmem:[#allocation10_spill] sm:$0xff] %v10677_v35  ;;  %v10679_v16 = vpop.f32.mrb[37].mxu0 }
 0x7a7   : > { %11852 = vst [vmem:[#allocation11_spill] sm:$0xff] %v10679_v16 }
 0x7b0   : > { %8924 = vrot.lane.b32.xlu1 %v9967_v53, %s9478_s27 }
 0x7b4   : > { %8929 = vrot.lane.b32.xlu0 %v9975_v57, %s9478_s27  ;;  %8934 = vrot.lane.b32.xlu1 %v9979_v3, %s9478_s27 }
 0x7b8   : > { %8954 = vrot.lane.b32.xlu0 %v10004_v44, %s9478_s27  ;;  %8939 = vrot.lane.b32.xlu1 %v9998_v30, %s9478_s27 }
 0x7bc   : > { %3992 = vrot.lane.b32.xlu0 %v11845_v27, %s9482_s14  ;;  %8944 = vrot.lane.b32.xlu1 %v9899_v14, %s9482_s14  ;;  %v3515_v27 = vpop.xlane.xlu1 %3514 }
 0x7bd   : > { %v3559_v14 = vsub.f32 %v10629_v19, %v3515_v27 }
 0x7c0   : > { %3994 = vrot.lane.b32.xlu0 %v11846_v12, %s9482_s14  ;;  %8949 = vrot.lane.b32.xlu1 %v9907_v26, %s9482_s14  ;;  %v3576_v26 = vmul.f32 1.442695, %v3559_v14  ;;  %v3527_v12 = vpop.xlane.xlu0 %3526  ;;  %v3524_v10 = vpop.xlane.xlu1 %3523  ;;  %v11859_v14 = vld [vmem:[#allocation6_spill] sm:$0xff] }
 0x7c1   : > { %v3562_v19 = vsub.f32 %v10652_v6, %v3524_v10 }
 0x7c2   : > { %9333 = vpow2.f32 %v3576_v26 }
 0x7c4   : > { %3998 = vrot.lane.b32.xlu0 %v11842_v48, %s9482_s14  ;;  %8959 = vrot.lane.b32.xlu1 %v10008_v52, %s9478_s27  ;;  %v3560_v48 = vsub.f32 %v10643_v18, %v3518_v49 }
 0x7c6   : > { %v3578_v5 = vmul.f32 1.442695, %v3560_v48 }
 0x7c8   : > { %8964 = vrot.lane.b32.xlu1 %v9913_v31, %s9482_s14  ;;  %v3563_v31 = vsub.f32 %v10650_v37, %v3527_v12  ;;  %9335 = vpow2.f32 %v3578_v5 }
 0x7ca   : > { %v3584_v22 = vmul.f32 1.442695, %v3563_v31 }
 0x7cc   : > { %8969 = vrot.lane.b32.xlu1 %v10013_v56, %s9478_s27  ;;  %9337 = vpow2.f32 %v3584_v22  ;;  %v10727_v37 = vpop.eup %9333 }
 0x7cd   : > { %v3609_v6 = vsel %vm641_vm1, %v10727_v37, 0.0 }
 0x7d0   : > { %8974 = vrot.lane.b32.xlu1 %v11837_v55, %s9478_s27 }
 0x7d2   : > { %v10735_v33 = vpop.eup %9335 }
 0x7d4   : > { %8979 = vrot.lane.b32.xlu1 %v11838_v46, %s9482_s14  ;;  %v3582_v46 = vmul.f32 1.442695, %v3562_v19 }
 0x7d6   : > { %9339 = vpow2.f32 %v3582_v46  ;;  %v10747_v29 = vpop.eup %9337  ;;  %v3558_v46 = vsub.f32 %v10631_v36, %v3512_v23 }
 0x7d8   : > { %8984 = vrot.lane.b32.xlu1 %v11839_v32, %s9482_s14 }
 0x7da   : > { %v10719_v0 = vpop.f32.mrb[38].mxu0 }
 0x7db   : > { %11853 = vst [vmem:[#allocation5_spill] sm:$0xff] %v10719_v0  ;;  %v10721_v40 = vpop.f32.mrb[39].mxu0 }
 0x7dc   : > { %11854 = vst [vmem:[#allocation4_spill] sm:$0xff] %v10721_v40  ;;  %3996 = vrot.lane.b32.xlu1 %v11841_v17, %s9482_s14 }
 0x7e0   : > { %8989 = vrot.lane.b32.xlu1 %v11840_v9, %s9482_s14  ;;  %v3612_v9 = vsel %vm641_vm1, %v10735_v33, 0.0  ;;  %v10759_v48 = vpop.eup %9339 }
 0x7e1   : > { %v3618_v31 = vsel %vm641_vm1, %v10759_v48, 0.0 }
 0x7e2   : > { %v10731_v32 = vpop.f32.mrb[40].mxu0 }
 0x7e3   : > { %11855 = vst [vmem:[#allocation7_spill] sm:$0xff] %v10731_v32  ;;  %v10737_v28 = vpop.f32.mrb[41].mxu0  ;;  %3610 = vadd.xlane.f32.xlu0 %v3609_v6 }
 0x7e4   : > { %11856 = vst [vmem:[#allocation3_spill] sm:$0xff] %v10737_v28  ;;  %4000 = vrot.lane.b32.xlu1 %v11843_v1, %s9482_s14  ;;  %v3621_v1 = vsel %vm641_vm1, %v10747_v29, 0.0 }
 0x7e6   : > { %v10743_v2 = vpop.f32.mrb[42].mxu0 }
 0x7e7   : > { %11857 = vst [vmem:[#allocation2_spill] sm:$0xff] %v10743_v2  ;;  %v10749_v49 = vpop.f32.mrb[43].mxu0  ;;  %3613 = vadd.xlane.f32.xlu0 %v3612_v9 }
 0x7e8   : > { %11858 = vst [vmem:[#allocation32_spill] sm:$0xff] %v10749_v49  ;;  %4002 = vrot.lane.b32.xlu1 %v11859_v14, %s9482_s14  ;;  %v3574_v14 = vmul.f32 1.442695, %v3558_v46 }
 0x7ea   : > { %v10755_v26 = vpop.f32.mrb[44].mxu0  ;;  %9341 = vpow2.f32 %v3574_v14 }
 0x7eb   : > { %v10761_v12 = vpop.f32.mrb[45].mxu0  ;;  %3622 = vadd.xlane.f32.xlu0 %v3621_v1  ;;  %v3561_v1 = vsub.f32 %v10639_v15, %v3521_v34 }
 0x7ec   : > { %v3534_v23 = vsel %vm641_vm1, %v10761_v12, -inf }
 0x7ed   : > { %v3580_v27 = vmul.f32 1.442695, %v3561_v1 }
 0x7ee   : > { %v10763_v5 = vpop.f32.mrb[46].mxu0 }
 0x7ef   : > { %v10767_v10 = vpop.f32.mrb[47].mxu0  ;;  %3619 = vadd.xlane.f32.xlu0 %v3618_v31  ;;  %9343 = vpow2.f32 %v3580_v27 }
 0x7f0   : > { %v3540_v15 = vsel %vm641_vm1, %v10767_v10, -inf }
 0x7f2   : > { %v10769_v19 = vpop.f32.mrb[48].mxu0 }
 0x7f3   : > { %v10771_v22 = vpop.f32.mrb[49].mxu0 }
 0x7f4   : > { %v10779_v17 = vpop.eup %9341  ;;  %v3546_v34 = vsel %vm641_vm1, %v10771_v22, -inf }
 0x7f5   : > { %v3606_v31 = vsel %vm641_vm1, %v10779_v17, 0.0 }
 0x7f6   : > { %v10774_v6 = vpop.f32.mrb[50].mxu0 }
 0x7f7   : > { %v10776_v9 = vpop.f32.mrb[51].mxu0 }
 0x7f9   : > { %v10783_v18 = vpop.eup %9343 }
 0x7fa   : > { %v3615_v36 = vsel %vm641_vm1, %v10783_v18, 0.0 }
 0x80c   : > { %3607 = vadd.xlane.f32.xlu1 %v3606_v31  ;;  %v11860_v31 = vld [vmem:[#allocation8_spill] sm:$0xff] }
 0x810   : > { %3616 = vadd.xlane.f32.xlu1 %v3615_v36 }
 0x814   : > { %3535 = vmax.xlane.f32.xlu1 %v3534_v23 }
 0x818   : > { %3541 = vmax.xlane.f32.xlu1 %v3540_v15 }
 0x81c   : > { %3547 = vmax.xlane.f32.xlu1 %v3546_v34 }
 0x82b   : > { %v3533_v27 = vpop.xlane.xlu0 %3532 }
 0x82c   : > { %v3565_v46 = vsub.f32 %v10669_v58, %v3533_v27  ;;  %v3530_v14 = vpop.xlane.xlu1 %3529 }
 0x82d   : > { %v3564_v1 = vsub.f32 %v10671_v20, %v3530_v14  ;;  %4006 = vrot.lane.b32.xlu1 %v11860_v31, %s9482_s14 }
 0x82e   : > { %v3588_v36 = vmul.f32 1.442695, %v3565_v46 }
 0x82f   : > { %v3586_v54 = vmul.f32 1.442695, %v3564_v1  ;;  %v8930_v23 = vpop.permute.xlu0 %8929 }
 0x830   : > { %9345 = vpow2.f32 %v3588_v36  ;;  %v8925_v45 = vpop.permute.xlu1 %8924  ;;  %v8932_v47 = vunpack.i.h.bf16 %v8930_v23  ;;  %v8931_v15 = vunpack.i.l.bf16 %v8930_v23 }
 0x831   : > { %v8927_v38 = vunpack.i.h.bf16 %v8925_v45  ;;  %v8926_v43 = vunpack.i.l.bf16 %v8925_v45  ;;  %9347 = vpow2.f32 %v3586_v54 }
 0x832   : > { %v8508_v14 = vpack.c.bf16 %v8932_v47, %v8931_v15 }
 0x833   : > { %v8955_v34 = vpop.permute.xlu0 %8954  ;;  %v8504_v49 = vpack.c.bf16 %v8927_v38, %v8926_v43 }
 0x834   : > { %v8957_v2 = vunpack.i.h.bf16 %v8955_v34  ;;  %v8956_v58 = vunpack.i.l.bf16 %v8955_v34  ;;  %v8935_v27 = vpop.permute.xlu1 %8934 }
 0x835   : > { %v8937_v28 = vunpack.i.h.bf16 %v8935_v27  ;;  %v8936_v20 = vunpack.i.l.bf16 %v8935_v27  ;;  %8505 = vmatprep.subr.bf16.mxu1 %v8504_v49 }
 0x836   : > { %8507 = vmatpush3.bf16.msra.mxu1 %v8504_v49  ;;  %v8520_v46 = vpack.c.bf16 %v8957_v2, %v8956_v58  ;;  %v3537_v58 = vsel %vm641_vm1, %v10755_v26, -inf }
 0x837   : > { %8509 = vmatprep.subr.bf16.mxu1 %v8508_v14  ;;  %v8512_v23 = vpack.c.bf16 %v8937_v28, %v8936_v20 }
 0x838   : > { %8521 = vmatprep.subr.bf16.mxu0 %v8520_v46  ;;  %v8940_v1 = vpop.permute.xlu1 %8939 }
 0x839   : > { %v8942_v31 = vunpack.i.h.bf16 %v8940_v1  ;;  %v8941_v36 = vunpack.i.l.bf16 %v8940_v1  ;;  %8523 = vmatpush3.bf16.msra.mxu0 %v8520_v46  ;;  %v3543_v46 = vsel %vm641_vm1, %v10763_v5, -inf }
 0x83a   : > { %v10797_v45 = vpop.eup %9345  ;;  %8511 = vmatpush3.bf16.msra.mxu1 %v8508_v14 }
 0x83b   : > { %8513 = vmatprep.subr.bf16.mxu1 %v8512_v23  ;;  %v3627_v43 = vsel %vm641_vm1, %v10797_v45, 0.0  ;;  %v10801_v38 = vpop.eup %9347  ;;  %v8516_v49 = vpack.c.bf16 %v8942_v31, %v8941_v36  ;;  %v3549_v36 = vsel %vm641_vm1, %v10769_v19, -inf }
 0x83c   : > { %3628 = vadd.xlane.f32.xlu0 %v3627_v43  ;;  %v8945_v47 = vpop.permute.xlu1 %8944  ;;  %v3624_v15 = vsel %vm641_vm1, %v10801_v38, 0.0 }
 0x83d   : > { %v8947_v54 = vunpack.i.h.bf16 %v8945_v47  ;;  %v8946_v2 = vunpack.i.l.bf16 %v8945_v47 }
 0x83e   : > { %8515 = vmatpush3.bf16.msra.mxu1 %v8512_v23 }
 0x83f   : > { %8517 = vmatprep.subr.bf16.mxu1 %v8516_v49  ;;  %v10807_v34 = vpack.c.bf16 %v8947_v54, %v8946_v2  ;;  %v3555_v54 = vsel %vm641_vm1, %v10774_v6, -inf }
 0x840   : > { %3625 = vadd.xlane.f32.xlu0 %v3624_v15  ;;  %v10805_v28 = vpop.permute.xlu1 %8949  ;;  %v3552_v15 = vsel %vm641_vm1, %v10776_v9, -inf }
 0x841   : > { %v8952_v16 = vunpack.i.h.bf16 %v10805_v28  ;;  %v8951_v35 = vunpack.i.l.bf16 %v10805_v28 }
 0x842   : > { %8519 = vmatpush3.bf16.msra.mxu1 %v8516_v49 }
 0x843   : > { %8538 = vmatprep.subr.msk.bf16.mxu1 %vm9895_vm4, %v10807_v34 }
 0x844   : > { %3538 = vmax.xlane.f32.xlu0 %v3537_v58  ;;  %v8960_v27 = vpop.permute.xlu1 %8959 }
 0x845   : > { %v8962_v20 = vunpack.i.h.bf16 %v8960_v27  ;;  %v8961_v14 = vunpack.i.l.bf16 %v8960_v27 }
 0x847   : > { %v8524_v1 = vpack.c.bf16 %v8962_v20, %v8961_v14 }
 0x848   : > { %3544 = vmax.xlane.f32.xlu0 %v3543_v46  ;;  %v10816_v31 = vpop.permute.xlu1 %8964 }
 0x849   : > { %8525 = vmatprep.subr.bf16.mxu0 %v8524_v1 }
 0x84a   : > { %8527 = vmatpush3.bf16.msra.mxu0 %v8524_v1 }
 0x84c   : > { %3550 = vmax.xlane.f32.xlu0 %v3549_v36  ;;  %v8970_v23 = vpop.permute.xlu1 %8969 }
 0x84d   : > { %v8972_v43 = vunpack.i.h.bf16 %v8970_v23  ;;  %v8971_v47 = vunpack.i.l.bf16 %v8970_v23 }
 0x84f   : > { %v8528_v2 = vpack.c.bf16 %v8972_v43, %v8971_v47  ;;  %v11861_v43 = vld [vmem:[#allocation13_spill] sm:$0xff]  ;;  %v10833_v47 = vpop.permute.xlu0 %3992 }
 0x850   : > { %3556 = vmax.xlane.f32.xlu0 %v3555_v54  ;;  %v8975_v49 = vpop.permute.xlu1 %8974 }
 0x851   : > { %v8977_v58 = vunpack.i.h.bf16 %v8975_v49  ;;  %v8976_v27 = vunpack.i.l.bf16 %v8975_v49  ;;  %3553 = vmax.xlane.f32.xlu1 %v3552_v15  ;;  %8529 = vmatprep.subr.bf16.mxu0 %v8528_v2 }
 0x852   : > { %8531 = vmatpush3.bf16.msra.mxu0 %v8528_v2 }
 0x853   : > { %v8532_v20 = vpack.c.bf16 %v8977_v58, %v8976_v27  ;;  %v10835_v54 = vpop.permute.xlu0 %3994 }
 0x854   : > { %v8980_v14 = vpop.permute.xlu1 %8979 }
 0x855   : > { %8533 = vmatprep.subr.bf16.mxu0 %v8532_v20 }
 0x856   : > { %8535 = vmatpush3.bf16.msra.mxu0 %v8532_v20 }
 0x857   : > { %v10839_v49 = vpop.permute.xlu0 %3998 }
 0x858   : > { %v8985_v46 = vpop.permute.xlu1 %8984 }
 0x859   : > { %v8987_v1 = vunpack.i.h.bf16 %v8985_v46  ;;  %v8986_v36 = vunpack.i.l.bf16 %v8985_v46 }
 0x85b   : > { %v10824_v23 = vpack.c.bf16 %v8987_v1, %v8986_v36 }
 0x85c   : > { %v10837_v2 = vpop.permute.xlu1 %3996 }
 0x85d   : > { %8562 = vmatprep.subr.msk.bf16.mxu0 %vm9895_vm4, %v10824_v23 }
 0x860   : > { %v10841_v58 = vpop.permute.xlu1 %8989 }
 0x862   : > { %8999 = vrot.lane.b32.xlu1 %v11861_v43, %s9482_s14 }
 0x864   : > { %v10843_v20 = vpop.permute.xlu1 %4000 }
 0x866   : > { %4004 = vrot.lane.b32.xlu0 %v9873_v24, %s9482_s14 }
 0x868   : > { %v10845_v1 = vpop.permute.xlu1 %4002 }
 0x870   : > { %v3611_v15 = vpop.xlane.xlu0 %3610 }
 0x871   : > { %9349 = vrcp.f32 %v3611_v15 }
 0x874   : > { %v3614_v27 = vpop.xlane.xlu0 %3613 }
 0x875   : > { %9351 = vrcp.f32 %v3614_v27 }
 0x878   : > { %v3623_v46 = vpop.xlane.xlu0 %3622 }
 0x87b   : > { %v9350_v32 = vpop.eup %9349 }
 0x87c   : > { %v3620_v36 = vpop.xlane.xlu0 %3619  ;;  %v3671_v50 = vmul.f32 %v9350_v32, %v10727_v37  ;;  %v8981_v37 = vunpack.i.l.bf16 %v8980_v14 }
 0x87f   : > { %v9352_v40 = vpop.eup %9351 }
 0x880   : > { %v3672_v27 = vmul.f32 %v9352_v40, %v10735_v33  ;;  %v8967_v40 = vunpack.i.h.bf16 %v10816_v31 }
 0x899   : > { %v3608_v24 = vpop.xlane.xlu1 %3607 }
 0x89a   : > { %9353 = vrcp.f32 %v3608_v24 }
 0x89b   : > { %9355 = vrcp.f32 %v3620_v36  ;;  %v8542_v36 = vpack.c.bf16 %v8952_v16, %v8951_v35  ;;  %v8966_v35 = vunpack.i.l.bf16 %v10816_v31 }
 0x89d   : > { %v3617_v43 = vpop.xlane.xlu1 %3616  ;;  %v8548_v16 = vpack.c.bf16 %v8967_v40, %v8966_v35 }
 0x89e   : > { %9357 = vrcp.f32 %v3617_v43 }
 0x89f   : > { %9359 = vrcp.f32 %v3623_v46 }
 0x8a4   : > { %v9354_v0 = vpop.eup %9353 }
 0x8a5   : > { %v3670_v7 = vmul.f32 %v9354_v0, %v10779_v17  ;;  %v9356_v15 = vpop.eup %9355  ;;  %v3536_v17 = vpop.xlane.xlu1 %3535 }
 0x8a7   : > { %7772 = vmatprep.mubr.msk.f32.mxu1 %vm641_vm1, %v3670_v7  ;;  %v3674_v7 = vmul.f32 %v9356_v15, %v10759_v48  ;;  %v3566_v48 = vsub.f32 %v10761_v12, %v3536_v17 }
 0x8a8   : > { %v9358_v24 = vpop.eup %9357  ;;  %7773 = vmatmul.mubr.msk.f32.vlgmr.msra.gmra.mrb[84].mxu1 %vm641_vm1, %v3671_v50 }
 0x8a9   : > { %8541 = vmatpush3.bf16.xpose.msk.msra.mxu1 %vm9895_vm4, %v10807_v34  ;;  %7775 = vmatprep.mubr.msk.f32.mxu1 %vm641_vm1, %v3672_v27  ;;  %v3673_v28 = vmul.f32 %v9358_v24, %v10783_v18  ;;  %v9360_v0 = vpop.eup %9359  ;;  %v8982_v18 = vunpack.i.h.bf16 %v8980_v14  ;;  %v3590_v14 = vmul.f32 1.442695, %v3566_v48 }
 0x8aa   : > { %8544 = vmatprep.subr.msk.bf16.mxu1 %vm9895_vm4, %v8542_v36  ;;  %v3675_v50 = vmul.f32 %v9360_v0, %v10747_v29 }
 0x8ab   : > { %v8554_v32 = vpack.c.bf16 %v8982_v18, %v8981_v37 }
 0x8ac   : > { %7776 = vmatmul.mubr.msk.f32.gmra.mrb[86].mxu1 %vm641_vm1, %v3673_v28 }
 0x8ad   : > { %7778 = vmatprep.mubr.msk.f32.mxu1 %vm641_vm1, %v3674_v7 }
 0x8b0   : > { %7779 = vmatmul.mubr.msk.f32.gmra.mrb[88].mxu1 %vm641_vm1, %v3675_v50 }
 0x8b1   : > { %8547 = vmatpush3.bf16.xpose.msk.msra.mxu1 %vm9895_vm4, %v8542_v36 }
 0x8b2   : > { %8550 = vmatprep.subr.msk.bf16.mxu1 %vm9895_vm4, %v8548_v16 }
 0x8b9   : > { %8553 = vmatpush3.bf16.xpose.msk.msra.mxu1 %vm9895_vm4, %v8548_v16 }
 0x8ba   : > { %8556 = vmatprep.subr.msk.bf16.mxu1 %vm9895_vm4, %v8554_v32 }
 0x8c1   : > { %8559 = vmatpush3.bf16.xpose.msk.msra.mxu1 %vm9895_vm4, %v8554_v32 }
 0x8c9   : > { %v3629_v33 = vpop.xlane.xlu0 %3628 }
 0x8ca   : > { %9361 = vrcp.f32 %v3629_v33 }
 0x8cd   : > { %v3626_v29 = vpop.xlane.xlu0 %3625 }
 0x8ce   : > { %9363 = vrcp.f32 %v3626_v29 }
 0x8d1   : > { %v3539_v34 = vpop.xlane.xlu0 %3538 }
 0x8d2   : > { %v3567_v31 = vsub.f32 %v10755_v26, %v3539_v34  ;;  %v3542_v26 = vpop.xlane.xlu1 %3541 }
 0x8d3   : > { %v3568_v16 = vsub.f32 %v10767_v10, %v3542_v26 }
 0x8d4   : > { %v3592_v46 = vmul.f32 1.442695, %v3567_v31  ;;  %v9362_v27 = vpop.eup %9361 }
 0x8d5   : > { %v3545_v43 = vpop.xlane.xlu0 %3544  ;;  %v3677_v0 = vmul.f32 %v9362_v27, %v10797_v45  ;;  %v3594_v37 = vmul.f32 1.442695, %v3568_v16 }
 0x8d6   : > { %9365 = vpow2.f32 %v3592_v46  ;;  %v3569_v15 = vsub.f32 %v10763_v5, %v3545_v43 }
 0x8d7   : > { %9367 = vpow2.f32 %v3590_v14 }
 0x8d8   : > { %v9364_v24 = vpop.eup %9363  ;;  %v3596_v36 = vmul.f32 1.442695, %v3569_v15 }
 0x8d9   : > { %v3676_v28 = vmul.f32 %v9364_v24, %v10801_v38  ;;  %v3551_v12 = vpop.xlane.xlu0 %3550 }
 0x8da   : > { %9369 = vpow2.f32 %v3596_v36  ;;  %v3571_v32 = vsub.f32 %v10769_v19, %v3551_v12 }
 0x8db   : > { %7781 = vmatprep.mubr.msk.f32.mxu1 %vm641_vm1, %v3676_v28  ;;  %9371 = vpow2.f32 %v3594_v37 }
 0x8dc   : > { %7782 = vmatmul.mubr.msk.f32.gmra.mrb[90].mxu1 %vm641_vm1, %v3677_v0  ;;  %v3600_v17 = vmul.f32 1.442695, %v3571_v32 }
 0x8dd   : > { %7828 = vmatprep.mubr.msk.f32.mxu1 %vm1595_vm3, %v10833_v47  ;;  %v3557_v38 = vpop.xlane.xlu0 %3556  ;;  %v3548_v47 = vpop.xlane.xlu1 %3547 }
 0x8de   : > { %v3570_v33 = vsub.f32 %v10771_v22, %v3548_v47 }
 0x8e0   : > { %v10887_v7 = vpop.eup %9365  ;;  %7829 = vmatmul.mubr.msk.f32.vlgmr.msra.gmra.mrb[92].mxu1 %vm1595_vm3, %v10835_v54  ;;  %v3598_v29 = vmul.f32 1.442695, %v3570_v33 }
 0x8e1   : > { %7831 = vmatprep.mubr.msk.f32.mxu1 %vm1595_vm3, %v10837_v2  ;;  %v3633_v5 = vsel %vm641_vm1, %v10887_v7, 0.0  ;;  %v10895_v45 = vpop.eup %9367  ;;  %v4005_v35 = vpop.permute.xlu0 %4004 }
 0x8e2   : > { %3634 = vadd.xlane.f32.xlu0 %v3633_v5  ;;  %v3630_v2 = vsel %vm641_vm1, %v10895_v45, 0.0  ;;  %v4007_v50 = vpop.permute.xlu1 %4006 }
 0x8e4   : > { %v10897_v40 = vpop.eup %9369  ;;  %7832 = vmatmul.mubr.msk.f32.gmra.mrb[94].mxu1 %vm1595_vm3, %v10839_v49  ;;  %v11862_v49 = vld [vmem:[#allocation12_spill] sm:$0xff] }
 0x8e5   : > { %7834 = vmatprep.mubr.msk.f32.mxu1 %vm1595_vm3, %v10843_v20  ;;  %v3639_v54 = vsel %vm641_vm1, %v10897_v40, 0.0  ;;  %v10920_v34 = vpop.eup %9371 }
 0x8e6   : > { %3640 = vadd.xlane.f32.xlu1 %v3639_v54  ;;  %3631 = vadd.xlane.f32.xlu0 %v3630_v2  ;;  %v3554_v20 = vpop.xlane.xlu1 %3553  ;;  %v3636_v19 = vsel %vm641_vm1, %v10920_v34, 0.0 }
 0x8e7   : > { %v3572_v18 = vsub.f32 %v10776_v9, %v3554_v20 }
 0x8e8   : > { %7835 = vmatmul.mubr.msk.f32.gmra.mrb[96].mxu1 %vm1595_vm3, %v10845_v1 }
 0x8e9   : > { %7837 = vmatprep.mubr.msk.f32.mxu1 %vm1595_vm3, %v4005_v35  ;;  %v3602_v1 = vmul.f32 1.442695, %v3572_v18 }
 0x8ea   : > { %v9000_v2 = vpop.permute.xlu1 %8999 }
 0x8eb   : > { %9373 = vpow2.f32 %v3602_v1  ;;  %v9001_v35 = vunpack.i.l.bf16 %v9000_v2 }
 0x8ec   : > { %7838 = vmatmul.mubr.msk.f32.gmra.mrb[98].mxu1 %vm1595_vm3, %v4007_v50  ;;  %9375 = vpow2.f32 %v3600_v17 }
 0x8ed   : > { %9377 = vpow2.f32 %v3598_v29 }
 0x8f5   : > { %v10922_v10 = vpop.eup %9373 }
 0x8f6   : > { %v3648_v9 = vsel %vm641_vm1, %v10922_v10, 0.0  ;;  %v10928_v22 = vpop.eup %9375 }
 0x8f7   : > { %4163 = vrot.lane.b32.xlu1 %v9875_v25, %s9482_s14  ;;  %v3573_v25 = vsub.f32 %v10774_v6, %v3557_v38  ;;  %v3645_v6 = vsel %vm641_vm1, %v10928_v22, 0.0  ;;  %v10932_v31 = vpop.eup %9377 }
 0x8f8   : > { %v3642_v14 = vsel %vm641_vm1, %v10932_v31, 0.0 }
 0x8f9   : > { %v3604_v48 = vmul.f32 1.442695, %v3573_v25 }
 0x8fb   : > { %9379 = vpow2.f32 %v3604_v48 }
 0x8fc   : > { %8994 = vrot.lane.b32.xlu0 %v11862_v49, %s9482_s14 }
 0x905   : > { %v10936_v46 = vpop.eup %9379 }
 0x906   : > { %v3651_v43 = vsel %vm641_vm1, %v10936_v46, 0.0 }
 0x91b   : > { %3637 = vadd.xlane.f32.xlu0 %v3636_v19  ;;  %3649 = vadd.xlane.f32.xlu1 %v3648_v9 }
 0x91f   : > { %3646 = vadd.xlane.f32.xlu0 %v3645_v6 }
 0x923   : > { %3643 = vadd.xlane.f32.xlu0 %v3642_v14 }
 0x927   : > { %3652 = vadd.xlane.f32.xlu0 %v3651_v43 }
 0x92c   : > { %4167 = vrot.lane.b32.xlu1 %v9881_v60, %s9482_s14 }
 0x930   : > { %4171 = vrot.lane.b32.xlu1 %v9885_v62, %s9482_s14 }
 0x934   : > { %4175 = vrot.lane.b32.xlu1 %v9889_v4, %s9482_s14 }
 0x93d   : > { %4161 = vrot.lane.b32.xlu0 %v9877_v59, %s9482_s14 }
 0x941   : > { %4165 = vrot.lane.b32.xlu0 %v9883_v61, %s9482_s14  ;;  %v8992_v61 = vunpack.i.h.bf16 %v10841_v58 }
 0x945   : > { %4169 = vrot.lane.b32.xlu0 %v9887_v63, %s9482_s14  ;;  %v8991_v63 = vunpack.i.l.bf16 %v10841_v58 }
 0x947   : > { %v8566_v26 = vpack.c.bf16 %v8992_v61, %v8991_v63 }
 0x949   : > { %4173 = vrot.lane.b32.xlu0 %v9891_v8, %s9482_s14 }
 0x96f   : > { %v3635_v15 = vpop.xlane.xlu0 %3634 }
 0x970   : > { %9381 = vrcp.f32 %v3635_v15 }
 0x973   : > { %v3632_v60 = vpop.xlane.xlu0 %3631  ;;  %v3641_v49 = vpop.xlane.xlu1 %3640 }
 0x974   : > { %9383 = vrcp.f32 %v3632_v60 }
 0x975   : > { %9385 = vrcp.f32 %v3641_v49 }
 0x977   : > { %v8995_v5 = vpop.permute.xlu0 %8994  ;;  %v4164_v20 = vpop.permute.xlu1 %4163 }
 0x978   : > { %v8997_v38 = vunpack.i.h.bf16 %v8995_v5  ;;  %v8996_v47 = vunpack.i.l.bf16 %v8995_v5 }
 0x97a   : > { %v9382_v4 = vpop.eup %9381  ;;  %v8572_v54 = vpack.c.bf16 %v8997_v38, %v8996_v47 }
 0x97b   : > { %v10954_v62 = vpop.f32.mrb[84].mxu1  ;;  %v3679_v28 = vmul.f32 %v9382_v4, %v10887_v7 }
 0x97c   : > { %v10956_v27 = vpop.f32.mrb[85].mxu1 }
 0x97e   : > { %v9384_v24 = vpop.eup %9383 }
 0x97f   : > { %v10962_v36 = vpop.f32.mrb[86].mxu1  ;;  %v3678_v8 = vmul.f32 %v9384_v24, %v10895_v45  ;;  %v9386_v17 = vpop.eup %9385 }
 0x980   : > { %v10966_v0 = vpop.f32.mrb[87].mxu1  ;;  %v3681_v14 = vmul.f32 %v9386_v17, %v10897_v40 }
 0x981   : > { %7800 = vmatprep.mubr.msk.f32.mxu0 %vm641_vm1, %v3678_v8 }
 0x982   : > { %7801 = vmatmul.mubr.msk.f32.vlgmr.msra.gmra.mrb[52].mxu0 %vm641_vm1, %v3679_v28 }
 0x983   : > { %8565 = vmatpush3.bf16.xpose.msk.msra.mxu0 %vm9895_vm4, %v10824_v23  ;;  %v10975_v58 = vpop.f32.mrb[88].mxu1  ;;  %v9002_v23 = vunpack.i.h.bf16 %v9000_v2 }
 0x984   : > { %8568 = vmatprep.subr.msk.bf16.mxu0 %vm9895_vm4, %v8566_v26  ;;  %v10979_v7 = vpop.f32.mrb[89].mxu1 }
 0x985   : > { %v8578_v50 = vpack.c.bf16 %v9002_v23, %v9001_v35 }
 0x98b   : > { %8571 = vmatpush3.bf16.xpose.msk.msra.mxu0 %vm9895_vm4, %v8566_v26 }
 0x98c   : > { %8574 = vmatprep.subr.msk.bf16.mxu0 %vm9895_vm4, %v8572_v54 }
 0x993   : > { %8577 = vmatpush3.bf16.xpose.msk.msra.mxu0 %vm9895_vm4, %v8572_v54 }
 0x994   : > { %8580 = vmatprep.subr.msk.bf16.mxu0 %vm9895_vm4, %v8578_v50 }
 0x99b   : > { %8583 = vmatpush3.bf16.xpose.msk.msra.mxu0 %vm9895_vm4, %v8578_v50 }
 0x9a8   : > { %v3638_v16 = vpop.xlane.xlu0 %3637  ;;  %v3650_v18 = vpop.xlane.xlu1 %3649 }
 0x9a9   : > { %9387 = vrcp.f32 %v3638_v16 }
 0x9aa   : > { %9389 = vrcp.f32 %v3650_v18 }
 0x9ac   : > { %v3647_v37 = vpop.xlane.xlu0 %3646  ;;  %v4168_v50 = vpop.permute.xlu1 %4167 }
 0x9ad   : > { %9391 = vrcp.f32 %v3647_v37 }
 0x9af   : > { %v10993_v32 = vpop.f32.mrb[90].mxu1 }
 0x9b0   : > { %v3644_v1 = vpop.xlane.xlu0 %3643  ;;  %v10995_v33 = vpop.f32.mrb[91].mxu1 }
 0x9b1   : > { %9393 = vrcp.f32 %v3644_v1  ;;  %v4172_v16 = vpop.permute.xlu1 %4171 }
 0x9b3   : > { %v9388_v29 = vpop.eup %9387  ;;  %v7830_v25 = vpop.f32.mrb[92].mxu1 }
 0x9b4   : > { %v3653_v48 = vpop.xlane.xlu0 %3652  ;;  %v4333_v19 = vsel %vm641_vm1, %v7830_v25, -inf  ;;  %v3680_v9 = vmul.f32 %v9388_v29, %v10920_v34  ;;  %v4122_v6 = vpop.f32.mrb[93].mxu1 }
 0x9b5   : > { %9395 = vrcp.f32 %v3653_v48  ;;  %4334 = vmax.xlane.f32.xlu1 %v4333_v19  ;;  %v4330_v43 = vsel %vm641_vm1, %v4122_v6, -inf  ;;  %v9390_v4 = vpop.eup %9389  ;;  %v4176_v37 = vpop.permute.xlu1 %4175 }
 0x9b6   : > { %7803 = vmatprep.mubr.msk.f32.mxu0 %vm641_vm1, %v3680_v9  ;;  %4331 = vmax.xlane.f32.xlu0 %v4330_v43  ;;  %v3684_v47 = vmul.f32 %v9390_v4, %v10922_v10 }
 0x9b7   : > { %7804 = vmatmul.mubr.msk.f32.gmra.mrb[54].mxu0 %vm641_vm1, %v3681_v14  ;;  %v11005_v15 = vpop.f32.mrb[94].mxu1  ;;  %v9392_v61 = vpop.eup %9391 }
 0x9b8   : > { %v4132_v60 = vpop.f32.mrb[95].mxu1  ;;  %v4162_v28 = vpop.permute.xlu0 %4161  ;;  %v3683_v5 = vmul.f32 %v9392_v61, %v10928_v22  ;;  %v4339_v38 = vsel %vm641_vm1, %v11005_v15, -inf }
 0x9b9   : > { %v4336_v24 = vsel %vm641_vm1, %v4132_v60, -inf }
 0x9ba   : > { %4337 = vmax.xlane.f32.xlu0 %v4336_v24 }
 0x9bb   : > { %v9394_v34 = vpop.eup %9393  ;;  %v11008_v63 = vpop.f32.mrb[96].mxu1 }
 0x9bc   : > { %v4142_v8 = vpop.f32.mrb[97].mxu1  ;;  %v3682_v40 = vmul.f32 %v9394_v34, %v10932_v31  ;;  %v4345_v35 = vsel %vm641_vm1, %v11008_v63, -inf  ;;  %v4166_v10 = vpop.permute.xlu0 %4165 }
 0x9bd   : > { %v4342_v26 = vsel %vm641_vm1, %v4142_v8, -inf }
 0x9be   : > { %7806 = vmatprep.mubr.msk.f32.mxu0 %vm641_vm1, %v3682_v40  ;;  %4343 = vmax.xlane.f32.xlu1 %v4342_v26 }
 0x9bf   : > { %v9396_v54 = vpop.eup %9395  ;;  %4340 = vmax.xlane.f32.xlu0 %v4339_v38  ;;  %7807 = vmatmul.mubr.msk.f32.gmra.mrb[56].mxu0 %vm641_vm1, %v3683_v5  ;;  %v11018_v2 = vpop.f32.mrb[98].mxu1 }
 0x9c0   : > { %7809 = vmatprep.mubr.msk.f32.mxu0 %vm641_vm1, %v3684_v47  ;;  %v11021_v31 = vpop.f32.mrb[99].mxu1  ;;  %v3685_v22 = vmul.f32 %v9396_v54, %v10936_v46  ;;  %v4351_v49 = vsel %vm641_vm1, %v11018_v2, -inf  ;;  %v4170_v46 = vpop.permute.xlu0 %4169 }
 0x9c1   : > { %v4348_v23 = vsel %vm641_vm1, %v11021_v31, -inf }
 0x9c2   : > { %4349 = vmax.xlane.f32.xlu1 %v4348_v23 }
 0x9c3   : > { %4346 = vmax.xlane.f32.xlu0 %v4345_v35  ;;  %7810 = vmatmul.mubr.msk.f32.gmra.mrb[58].mxu0 %vm641_vm1, %v3685_v22 }
 0x9c4   : > { %7856 = vmatprep.mubr.msk.f32.mxu0 %vm1595_vm3, %v4162_v28  ;;  %v4174_v18 = vpop.permute.xlu0 %4173 }
 0x9c7   : > { %4352 = vmax.xlane.f32.xlu0 %v4351_v49  ;;  %7857 = vmatmul.mubr.msk.f32.vlgmr.msra.gmra.mrb[60].mxu0 %vm1595_vm3, %v4164_v20 }
 0x9c8   : > { %7859 = vmatprep.mubr.msk.f32.mxu0 %vm1595_vm3, %v4166_v10 }
 0x9cb   : > { %7860 = vmatmul.mubr.msk.f32.gmra.mrb[62].mxu0 %vm1595_vm3, %v4168_v50 }
 0x9cc   : > { %7862 = vmatprep.mubr.msk.f32.mxu0 %vm1595_vm3, %v4170_v46 }
 0x9cf   : > { %7863 = vmatmul.mubr.msk.f32.gmra.mrb[64].mxu0 %vm1595_vm3, %v4172_v16 }
 0x9d0   : > { %7865 = vmatprep.mubr.msk.f32.mxu0 %vm1595_vm3, %v4174_v18 }
 0x9d3   : > { %7866 = vmatmul.mubr.msk.f32.gmra.mrb[66].mxu0 %vm1595_vm3, %v4176_v37  ;;  %9004 = vrot.lane.b32.xlu1 %v9967_v53, %s9482_s14 }
 0xa42   : > { %v4335_v20 = vpop.xlane.xlu1 %4334 }
 0xa43   : > { %v4379_v1 = vsub.f32 %v7830_v25, %v4335_v20  ;;  %v4332_v17 = vpop.xlane.xlu0 %4331 }
 0xa44   : > { %v4378_v48 = vsub.f32 %v4122_v6, %v4332_v17 }
 0xa45   : > { %v4396_v29 = vmul.f32 1.442695, %v4379_v1 }
 0xa46   : > { %v4394_v19 = vmul.f32 1.442695, %v4378_v48 }
 0xa47   : > { %9397 = vpow2.f32 %v4396_v29  ;;  %v4338_v9 = vpop.xlane.xlu0 %4337 }
 0xa48   : > { %9399 = vpow2.f32 %v4394_v19  ;;  %v4380_v14 = vsub.f32 %v4132_v60, %v4338_v9 }
 0xa4a   : > { %v4398_v43 = vmul.f32 1.442695, %v4380_v14 }
 0xa4b   : > { %v4344_v4 = vpop.xlane.xlu1 %4343 }
 0xa4c   : > { %v4341_v24 = vpop.xlane.xlu0 %4340  ;;  %v4382_v61 = vsub.f32 %v4142_v8, %v4344_v4  ;;  %9401 = vpow2.f32 %v4398_v43 }
 0xa4d   : > { %v4381_v34 = vsub.f32 %v11005_v15, %v4341_v24 }
 0xa4e   : > { %v4402_v40 = vmul.f32 1.442695, %v4382_v61 }
 0xa4f   : > { %v4400_v28 = vmul.f32 1.442695, %v4381_v34  ;;  %v4350_v53 = vpop.xlane.xlu1 %4349 }
 0xa50   : > { %9403 = vpow2.f32 %v4402_v40  ;;  %v4347_v25 = vpop.xlane.xlu0 %4346  ;;  %v4384_v8 = vsub.f32 %v11021_v31, %v4350_v53 }
 0xa51   : > { %v11042_v26 = vpop.eup %9397  ;;  %9405 = vpow2.f32 %v4400_v28  ;;  %v4383_v6 = vsub.f32 %v11008_v63, %v4347_v25 }
 0xa52   : > { %v4429_v60 = vsel %vm641_vm1, %v11042_v26, 0.0  ;;  %v11047_v5 = vpop.eup %9399  ;;  %v4406_v31 = vmul.f32 1.442695, %v4384_v8 }
 0xa53   : > { %v4404_v38 = vmul.f32 1.442695, %v4383_v6  ;;  %4430 = vadd.xlane.f32.xlu0 %v4429_v60  ;;  %v9005_v15 = vpop.permute.xlu1 %9004  ;;  %v4426_v23 = vsel %vm641_vm1, %v11047_v5, 0.0 }
 0xa54   : > { %v4353_v47 = vpop.xlane.xlu0 %4352  ;;  %v9007_v54 = vunpack.i.h.bf16 %v9005_v15  ;;  %v9006_v22 = vunpack.i.l.bf16 %v9005_v15  ;;  %4427 = vadd.xlane.f32.xlu1 %v4426_v23 }
 0xa55   : > { %9407 = vpow2.f32 %v4404_v38  ;;  %v4385_v35 = vsub.f32 %v11018_v2, %v4353_v47  ;;  %v11053_v63 = vpop.f32.mrb[52].mxu0 }
 0xa56   : > { %v8584_v10 = vpack.c.bf16 %v9007_v54, %v9006_v22  ;;  %v11055_v50 = vpop.f32.mrb[53].mxu0  ;;  %v11057_v49 = vpop.eup %9401 }
 0xa57   : > { %v4408_v46 = vmul.f32 1.442695, %v4385_v35  ;;  %v4432_v18 = vsel %vm641_vm1, %v11057_v49, 0.0 }
 0xa58   : > { %8585 = vmatprep.subr.bf16.mxu1 %v8584_v10  ;;  %4433 = vadd.xlane.f32.xlu1 %v4432_v18 }
 0xa59   : > { %9409 = vpow2.f32 %v4408_v46  ;;  %8587 = vmatpush3.bf16.msra.mxu1 %v8584_v10 }
 0xa5a   : > { %v11063_v2 = vpop.eup %9403  ;;  %9411 = vpow2.f32 %v4406_v31 }
 0xa5b   : > { %v11065_v37 = vpop.eup %9405  ;;  %v4438_v20 = vsel %vm641_vm1, %v11063_v2, 0.0 }
 0xa5c   : > { %v4435_v1 = vsel %vm641_vm1, %v11065_v37, 0.0  ;;  %4439 = vadd.xlane.f32.xlu1 %v4438_v20 }
 0xa5d   : > { %4436 = vadd.xlane.f32.xlu0 %v4435_v1 }
 0xa5f   : > { %v11071_v17 = vpop.eup %9407 }
 0xa60   : > { %v4441_v29 = vsel %vm641_vm1, %v11071_v17, 0.0 }
 0xa61   : > { %4442 = vadd.xlane.f32.xlu0 %v4441_v29 }
 0xa63   : > { %v11075_v48 = vpop.eup %9409 }
 0xa64   : > { %v4447_v19 = vsel %vm641_vm1, %v11075_v48, 0.0  ;;  %v11079_v9 = vpop.eup %9411 }
 0xa65   : > { %4448 = vadd.xlane.f32.xlu0 %v4447_v19  ;;  %v4444_v14 = vsel %vm641_vm1, %v11079_v9, 0.0 }
 0xa69   : > { %4445 = vadd.xlane.f32.xlu0 %v4444_v14 }
 0xa8a   : > { %v11083_v43 = vpop.f32.mrb[54].mxu0 }
 0xa8b   : > { %v11085_v4 = vpop.f32.mrb[55].mxu0 }
 0xa92   : > { %v11089_v61 = vpop.f32.mrb[56].mxu0 }
 0xa93   : > { %v11091_v34 = vpop.f32.mrb[57].mxu0 }
 0xa96   : > { %v11095_v28 = vpop.f32.mrb[58].mxu0 }
 0xa97   : > { %v11097_v53 = vpop.f32.mrb[59].mxu0 }
 0xa9a   : > { %v7858_v6 = vpop.f32.mrb[60].mxu0 }
 0xa9b   : > { %v4291_v60 = vpop.f32.mrb[61].mxu0  ;;  %v4357_v38 = vsel %vm641_vm1, %v7858_v6, -inf }
 0xa9c   : > { %4358 = vmax.xlane.f32.xlu0 %v4357_v38  ;;  %v4354_v8 = vsel %vm641_vm1, %v4291_v60, -inf }
 0xa9d   : > { %4355 = vmax.xlane.f32.xlu1 %v4354_v8 }
 0xa9e   : > { %v7861_v15 = vpop.f32.mrb[62].mxu0 }
 0xa9f   : > { %v4301_v47 = vpop.f32.mrb[63].mxu0  ;;  %v4363_v54 = vsel %vm641_vm1, %v7861_v15, -inf }
 0xaa0   : > { %4364 = vmax.xlane.f32.xlu0 %v4363_v54  ;;  %v4360_v22 = vsel %vm641_vm1, %v4301_v47, -inf }
 0xaa1   : > { %4361 = vmax.xlane.f32.xlu1 %v4360_v22 }
 0xaa2   : > { %v7864_v23 = vpop.f32.mrb[64].mxu0 }
 0xaa3   : > { %v4311_v35 = vpop.f32.mrb[65].mxu0  ;;  %v4369_v10 = vsel %vm641_vm1, %v7864_v23, -inf }
 0xaa4   : > { %4370 = vmax.xlane.f32.xlu0 %v4369_v10  ;;  %v4366_v31 = vsel %vm641_vm1, %v4311_v35, -inf }
 0xaa5   : > { %4367 = vmax.xlane.f32.xlu1 %v4366_v31 }
 0xaa6   : > { %v7867_v46 = vpop.f32.mrb[66].mxu0 }
 0xaa7   : > { %v11107_v18 = vpop.f32.mrb[67].mxu0  ;;  %v4375_v20 = vsel %vm641_vm1, %v7867_v46, -inf }
 0xaa8   : > { %4376 = vmax.xlane.f32.xlu0 %v4375_v20  ;;  %v4372_v1 = vsel %vm641_vm1, %v11107_v18, -inf }
 0xab6   : > { %9014 = vrot.lane.b32.xlu1 %v9979_v3, %s9482_s14 }
 0xaba   : > { %9019 = vrot.lane.b32.xlu1 %v9998_v30, %s9482_s14 }
 0xabe   : > { %9009 = vrot.lane.b32.xlu0 %v9975_v57, %s9482_s14 }
 0xade   : > { %4373 = vmax.xlane.f32.xlu1 %v4372_v1 }
 0xae0   : > { %v4431_v3 = vpop.xlane.xlu0 %4430 }
 0xae1   : > { %v4428_v29 = vpop.xlane.xlu1 %4427 }
 0xae2   : > { %9413 = vrcp.f32 %v4428_v29 }
 0xae5   : > { %v4434_v57 = vpop.xlane.xlu1 %4433 }
 0xae9   : > { %v4440_v22 = vpop.xlane.xlu1 %4439 }
 0xaea   : > { %v4437_v38 = vpop.xlane.xlu0 %4436 }
 0xaec   : > { %v9414_v19 = vpop.eup %9413 }
 0xaed   : > { %v4490_v14 = vmul.f32 %v9414_v19, %v11047_v5 }
 0xaee   : > { %v11122_v30 = vpop.xlane.xlu0 %4442 }
 0xaef   : > { %9024 = vrot.lane.b32.xlu1 %v10004_v44, %s9482_s14  ;;  %7884 = vmatprep.mubr.msk.f32.mxu1 %vm641_vm1, %v4490_v14 }
 0xaf2   : > { %v11124_v8 = vpop.xlane.xlu0 %4448 }
 0xaf6   : > { %v11126_v54 = vpop.xlane.xlu0 %4445 }
 0xb29   : > { %v4359_v10 = vpop.xlane.xlu0 %4358 }
 0xb2a   : > { %v4387_v31 = vsub.f32 %v7858_v6, %v4359_v10  ;;  %v4356_v20 = vpop.xlane.xlu1 %4355 }
 0xb2b   : > { %v4386_v1 = vsub.f32 %v4291_v60, %v4356_v20 }
 0xb2c   : > { %v4412_v5 = vmul.f32 1.442695, %v4387_v31 }
 0xb2d   : > { %v4410_v29 = vmul.f32 1.442695, %v4386_v1  ;;  %v4365_v19 = vpop.xlane.xlu0 %4364 }
 0xb2e   : > { %9415 = vpow2.f32 %v4412_v5  ;;  %v4389_v44 = vsub.f32 %v7861_v15, %v4365_v19  ;;  %v4362_v14 = vpop.xlane.xlu1 %4361 }
 0xb2f   : > { %9417 = vpow2.f32 %v4410_v29  ;;  %v4388_v25 = vsub.f32 %v4301_v47, %v4362_v14 }
 0xb30   : > { %v4416_v40 = vmul.f32 1.442695, %v4389_v44 }
 0xb31   : > { %v4414_v24 = vmul.f32 1.442695, %v4388_v25  ;;  %v4371_v16 = vpop.xlane.xlu0 %4370 }
 0xb32   : > { %9419 = vpow2.f32 %v4416_v40  ;;  %v4391_v13 = vsub.f32 %v7864_v23, %v4371_v16  ;;  %v4368_v45 = vpop.xlane.xlu1 %4367 }
 0xb33   : > { %9421 = vpow2.f32 %v4414_v24  ;;  %v4390_v12 = vsub.f32 %v4311_v35, %v4368_v45 }
 0xb34   : > { %v4420_v59 = vmul.f32 1.442695, %v4391_v13 }
 0xb35   : > { %v4418_v6 = vmul.f32 1.442695, %v4390_v12  ;;  %v4377_v10 = vpop.xlane.xlu0 %4376 }
 0xb36   : > { %9423 = vpow2.f32 %v4420_v59  ;;  %v4393_v60 = vsub.f32 %v7867_v46, %v4377_v10  ;;  %v9015_v31 = vpop.permute.xlu1 %9014 }
 0xb37   : > { %9425 = vpow2.f32 %v4418_v6  ;;  %v9017_v47 = vunpack.i.h.bf16 %v9015_v31  ;;  %v9016_v25 = vunpack.i.l.bf16 %v9015_v31 }
 0xb38   : > { %v11128_v20 = vpop.eup %9415  ;;  %v4424_v15 = vmul.f32 1.442695, %v4393_v60 }
 0xb39   : > { %v11130_v1 = vpop.eup %9417  ;;  %v9010_v5 = vpop.permute.xlu0 %9009  ;;  %v4453_v16 = vsel %vm641_vm1, %v11128_v20, 0.0  ;;  %v8592_v46 = vpack.c.bf16 %v9017_v47, %v9016_v25 }
 0xb3a   : > { %9427 = vpow2.f32 %v4424_v15  ;;  %v9012_v45 = vunpack.i.h.bf16 %v9010_v5  ;;  %v9011_v13 = vunpack.i.l.bf16 %v9010_v5  ;;  %4454 = vadd.xlane.f32.xlu0 %v4453_v16  ;;  %v4450_v59 = vsel %vm641_vm1, %v11130_v1, 0.0  ;;  %v9020_v12 = vpop.permute.xlu1 %9019 }
 0xb3b   : > { %9429 = vrcp.f32 %v4431_v3  ;;  %4451 = vadd.xlane.f32.xlu1 %v4450_v59  ;;  %v9022_v29 = vunpack.i.h.bf16 %v9020_v12  ;;  %v9021_v19 = vunpack.i.l.bf16 %v9020_v12 }
 0xb3c   : > { %v11136_v24 = vpop.eup %9419  ;;  %9431 = vrcp.f32 %v4434_v57  ;;  %v8588_v40 = vpack.c.bf16 %v9012_v45, %v9011_v13 }
 0xb3d   : > { %v11138_v23 = vpop.eup %9421  ;;  %v4459_v35 = vsel %vm641_vm1, %v11136_v24, 0.0  ;;  %9433 = vrcp.f32 %v4437_v38  ;;  %v8596_v6 = vpack.c.bf16 %v9022_v29, %v9021_v19  ;;  %v5059_v19 = vld [vmem:[%s11200_s17 + $0x30] sm:$0xff] }
 0xb3e   : > { %4460 = vadd.xlane.f32.xlu0 %v4459_v35  ;;  %8589 = vmatprep.subr.bf16.mxu1 %v8588_v40  ;;  %v4456_v44 = vsel %vm641_vm1, %v11138_v23, 0.0  ;;  %9435 = vrcp.f32 %v4440_v22  ;;  %v5057_v35 = vld [vmem:[%s11200_s17 + $0x20] sm:$0xff] }
 0xb3f   : > { %4457 = vadd.xlane.f32.xlu1 %v4456_v44  ;;  %8591 = vmatpush3.bf16.msra.mxu1 %v8588_v40  ;;  %9437 = vrcp.f32 %v11122_v30  ;;  %v5060_v44 = vld [vmem:[%s11200_s17 + $0x38] sm:$0xff] }
 0xb40   : > { %v11144_v3 = vpop.eup %9423  ;;  %8593 = vmatprep.subr.bf16.mxu1 %v8592_v46  ;;  %9439 = vrcp.f32 %v11126_v54 }
 0xb41   : > { %v11146_v57 = vpop.eup %9425  ;;  %v4465_v14 = vsel %vm641_vm1, %v11144_v3, 0.0  ;;  %9441 = vrcp.f32 %v11124_v8 }
 0xb42   : > { %4466 = vadd.xlane.f32.xlu0 %v4465_v14  ;;  %v4462_v10 = vsel %vm641_vm1, %v11146_v57, 0.0  ;;  %v8628_v14 = vpack.c.bf16 %v5060_v44, %v5059_v19 }
 0xb43   : > { %4463 = vadd.xlane.f32.xlu1 %v4462_v10  ;;  %8595 = vmatpush3.bf16.msra.mxu1 %v8592_v46  ;;  %v5058_v46 = vld [vmem:[%s11200_s17 + $0x28] sm:$0xff]  ;;  %v5061_v10 = vld [vmem:[%s11200_s17 + $0x40] sm:$0xff] }
 0xb44   : > { %v11153_v38 = vpop.eup %9427  ;;  %8597 = vmatprep.subr.bf16.mxu1 %v8596_v6  ;;  %v8624_v29 = vpack.c.bf16 %v5058_v46, %v5057_v35 }
 0xb45   : > { %v9430_v22 = vpop.eup %9429  ;;  %v4471_v60 = vsel %vm641_vm1, %v11153_v38, 0.0 }
 0xb46   : > { %v9432_v31 = vpop.eup %9431  ;;  %4472 = vadd.xlane.f32.xlu0 %v4471_v60  ;;  %v4491_v15 = vmul.f32 %v9430_v22, %v11042_v26  ;;  %v5062_v22 = vld [vmem:[%s11200_s17 + $0x48] sm:$0xff] }
 0xb47   : > { %8599 = vmatpush3.bf16.msra.mxu1 %v8596_v6  ;;  %v9434_v47 = vpop.eup %9433  ;;  %v4492_v30 = vmul.f32 %v9432_v31, %v11057_v49  ;;  %v8632_v60 = vpack.c.bf16 %v5062_v22, %v5061_v10  ;;  %v5063_v31 = vld [vmem:[%s11200_s17 + $0x50] sm:$0xff] }
 0xb48   : > { %v9436_v25 = vpop.eup %9435  ;;  %v4493_v54 = vmul.f32 %v9434_v47, %v11065_v37 }
 0xb49   : > { %v9438_v5 = vpop.eup %9437  ;;  %v4494_v16 = vmul.f32 %v9436_v25, %v11063_v2  ;;  %v11863_v2 = vpack.i.bf16 %v10578_v11, %v10580_v41  ;;  %v5066_v25 = vld [vmem:[%s11200_s17 + $0x68] sm:$0xff] }
 0xb4a   : > { %7885 = vmatmul.mubr.msk.f32.vlgmr.msra.gmra.mrb[100].mxu1 %vm641_vm1, %v4491_v15  ;;  %v9440_v45 = vpop.eup %9439  ;;  %v4495_v26 = vmul.f32 %v9438_v5, %v11071_v17  ;;  %v11864_v17 = vpack.i.bf16 %v10954_v62, %v10956_v27  ;;  %v5055_v27 = vld [vmem:[%s11200_s17 + $0x10] sm:$0xff]  ;;  %v5064_v15 = vld [vmem:[%s11200_s17 + $0x58] sm:$0xff] }
 0xb4b   : > { %7887 = vmatprep.mubr.msk.f32.mxu1 %vm641_vm1, %v4492_v30  ;;  %v9442_v8 = vpop.eup %9441  ;;  %v4496_v49 = vmul.f32 %v9440_v45, %v11079_v9  ;;  %v8636_v47 = vpack.c.bf16 %v5064_v15, %v5063_v31  ;;  %v5065_v30 = vld [vmem:[%s11200_s17 + $0x60] sm:$0xff] }
 0xb4c   : > { %v4497_v37 = vmul.f32 %v9442_v8, %v11075_v48  ;;  %v8640_v5 = vpack.c.bf16 %v5066_v25, %v5065_v30 }
 0xb4e   : > { %7888 = vmatmul.mubr.msk.f32.gmra.mrb[102].mxu1 %vm641_vm1, %v4493_v54 }
 0xb4f   : > { %7890 = vmatprep.mubr.msk.f32.mxu1 %vm641_vm1, %v4494_v16 }
 0xb52   : > { %7891 = vmatmul.mubr.msk.f32.gmra.mrb[104].mxu1 %vm641_vm1, %v4495_v26 }
 0xb53   : > { %7893 = vmatprep.mubr.msk.f32.mxu1 %vm641_vm1, %v4496_v49 }
 0xb54   : > { %9034 = vrot.lane.b32.xlu1 %v10013_v56, %s9482_s14  ;;  %v11865_v56 = vpack.i.bf16 %v10584_v21, %v10586_v51  ;;  %v5053_v21 = vld [vmem:[%s11200_s17] sm:$0xff]  ;;  %v5054_v51 = vld [vmem:[%s11200_s17 + $0x8] sm:$0xff] }
 0xb56   : > { %7894 = vmatmul.mubr.msk.f32.gmra.mrb[106].mxu1 %vm641_vm1, %v4497_v37 }
 0xb58   : > { %9039 = vrot.lane.b32.xlu1 %v11837_v55, %s9482_s14 }
 0xb5c   : > { %9044 = vrot.lane.b32.xlu1 %v11863_v2, %s9482_s14 }
 0xb60   : > { %9049 = vrot.lane.b32.xlu1 %v11864_v17, %s9478_s27 }
 0xb64   : > { %9059 = vrot.lane.b32.xlu1 %v11865_v56, %s9482_s14 }
 0xb6b   : > { %v4374_v48 = vpop.xlane.xlu1 %4373 }
 0xb6c   : > { %v4392_v9 = vsub.f32 %v11107_v18, %v4374_v48  ;;  %v8616_v18 = vpack.c.bf16 %v5054_v51, %v5053_v21  ;;  %v5067_v51 = vld [vmem:[%s11200_s17 + $0x70] sm:$0xff] }
 0xb6e   : > { %v4422_v55 = vmul.f32 1.442695, %v4392_v9  ;;  %8617 = vmatprep.subr.bf16.mxu1 %v8616_v18 }
 0xb6f   : > { %v9025_v13 = vpop.permute.xlu1 %9024  ;;  %8619 = vmatpush3.bf16.msra.mxu1 %v8616_v18 }
 0xb70   : > { %9443 = vpow2.f32 %v4422_v55  ;;  %v9027_v59 = vunpack.i.h.bf16 %v9025_v13  ;;  %v9026_v11 = vunpack.i.l.bf16 %v9025_v13 }
 0xb72   : > { %v8600_v41 = vpack.c.bf16 %v9027_v59, %v9026_v11 }
 0xb74   : > { %8601 = vmatprep.subr.bf16.mxu0 %v8600_v41 }
 0xb75   : > { %8603 = vmatpush3.bf16.msra.mxu0 %v8600_v41 }
 0xb7a   : > { %v11190_v12 = vpop.eup %9443 }
 0xb7b   : > { %v4468_v62 = vsel %vm641_vm1, %v11190_v12, 0.0 }
 0xb7c   : > { %4469 = vadd.xlane.f32.xlu0 %v4468_v62 }
 0xb92   : > { %9029 = vrot.lane.b32.xlu0 %v10008_v52, %s9482_s14  ;;  %v5056_v52 = vld [vmem:[%s11200_s17 + $0x18] sm:$0xff] }
 0xb93   : > { %v8620_v40 = vpack.c.bf16 %v5056_v52, %v5055_v27  ;;  %v5068_v27 = vld [vmem:[%s11200_s17 + $0x78] sm:$0xff]  ;;  %s11502_s17 = scalar_lea.vmem %s11767_s9, %s9563_s23 }
 0xb94   : > { %v8644_v18 = vpack.c.bf16 %v5068_v27, %v5067_v51 }
 0xb95   : > { %8621 = vmatprep.subr.bf16.mxu1 %v8620_v40 }
 0xb96   : > { %8623 = vmatpush3.bf16.msra.mxu1 %v8620_v40 }
 0xb97   : > { %8625 = vmatprep.subr.bf16.mxu1 %v8624_v29 }
 0xb9a   : > { %8627 = vmatpush3.bf16.msra.mxu1 %v8624_v29 }
 0xb9b   : > { %8629 = vmatprep.subr.bf16.mxu1 %v8628_v14 }
 0xb9e   : > { %8631 = vmatpush3.bf16.msra.mxu1 %v8628_v14 }
 0xb9f   : > { %8633 = vmatprep.subr.bf16.mxu1 %v8632_v60 }
 0xba2   : > { %8635 = vmatpush3.bf16.msra.mxu1 %v8632_v60 }
 0xba3   : > { %8637 = vmatprep.subr.bf16.mxu1 %v8636_v47 }
 0xba6   : > { %8639 = vmatpush3.bf16.msra.mxu1 %v8636_v47 }
 0xba7   : > { %8641 = vmatprep.subr.bf16.mxu1 %v8640_v5 }
 0xbaa   : > { %8643 = vmatpush3.bf16.msra.mxu1 %v8640_v5 }
 0xbab   : > { %8645 = vmatprep.subr.bf16.mxu1 %v8644_v18 }
 0xbae   : > { %8647 = vmatpush3.bf16.msra.mxu1 %v8644_v18 }
 0xbc7   : > { %v4455_v45 = vpop.xlane.xlu0 %4454 }
 0xbc8   : > { %v4452_v6 = vpop.xlane.xlu1 %4451 }
 0xbc9   : > { %9445 = vrcp.f32 %v4452_v6 }
 0xbca   : > { %9447 = vrcp.f32 %v4455_v45 }
 0xbcb   : > { %v4461_v26 = vpop.xlane.xlu0 %4460 }
 0xbcc   : > { %v4458_v8 = vpop.xlane.xlu1 %4457 }
 0xbcd   : > { %9449 = vrcp.f32 %v4458_v8  ;;  %v11869_v8 = vld [vmem:[#allocation14_spill] sm:$0xff] }
 0xbce   : > { %9451 = vrcp.f32 %v4461_v26 }
 0xbcf   : > { %v4467_v49 = vpop.xlane.xlu0 %4466 }
 0xbd0   : > { %v4464_v37 = vpop.xlane.xlu1 %4463 }
 0xbd1   : > { %9453 = vrcp.f32 %v4464_v37 }
 0xbd2   : > { %9455 = vrcp.f32 %v4467_v49  ;;  %v11870_v49 = vld [vmem:[#allocation9_spill] sm:$0xff] }
 0xbd3   : > { %v9446_v54 = vpop.eup %9445  ;;  %v4473_v2 = vpop.xlane.xlu0 %4472  ;;  %v11871_v37 = vpack.i.bf16 %v11869_v8, %v11870_v49 }
 0xbd4   : > { %v4498_v16 = vmul.f32 %v9446_v54, %v11130_v1  ;;  %v9035_v17 = vpop.permute.xlu1 %9034  ;;  %v9448_v40 = vpop.eup %9447 }
 0xbd5   : > { %v9037_v9 = vunpack.i.h.bf16 %v9035_v17  ;;  %v9036_v55 = vunpack.i.l.bf16 %v9035_v17  ;;  %v4499_v46 = vmul.f32 %v9448_v40, %v11128_v20 }
 0xbd6   : > { %7912 = vmatprep.mubr.msk.f32.mxu0 %vm641_vm1, %v4498_v16 }
 0xbd7   : > { %v8608_v41 = vpack.c.bf16 %v9037_v9, %v9036_v55  ;;  %v9450_v35 = vpop.eup %9449 }
 0xbd8   : > { %v9040_v59 = vpop.permute.xlu1 %9039  ;;  %v9452_v29 = vpop.eup %9451  ;;  %v4500_v44 = vmul.f32 %v9450_v35, %v11138_v23 }
 0xbd9   : > { %v9042_v62 = vunpack.i.h.bf16 %v9040_v59  ;;  %v9041_v21 = vunpack.i.l.bf16 %v9040_v59  ;;  %v4501_v22 = vmul.f32 %v9452_v29, %v11136_v24  ;;  %v11866_v24 = vpack.i.bf16 %v10962_v36, %v10966_v0 }
 0xbda   : > { %v11868_v36 = vpack.i.bf16 %v10975_v58, %v10979_v7  ;;  %v11874_v58 = vld [vmem:[#allocation11_spill] sm:$0xff] }
 0xbdb   : > { %v8612_v52 = vpack.c.bf16 %v9042_v62, %v9041_v21  ;;  %v9454_v14 = vpop.eup %9453  ;;  %v11883_v62 = vld [vmem:[#allocation17_spill] sm:$0xff] }
 0xbdc   : > { %v9456_v60 = vpop.eup %9455  ;;  %v4502_v15 = vmul.f32 %v9454_v14, %v11146_v57  ;;  %v11884_v14 = vld [vmem:[#allocation19_spill] sm:$0xff] }
 0xbdd   : > { %v4503_v30 = vmul.f32 %v9456_v60, %v11144_v3  ;;  %v11867_v3 = vpack.i.bf16 %v10590_v39, %v10592_v42  ;;  %v11872_v39 = vpack.i.bf16 %v10993_v32, %v10995_v33  ;;  %v11873_v42 = vld [vmem:[#allocation10_spill] sm:$0xff]  ;;  %v11878_v32 = vld [vmem:[#allocation5_spill] sm:$0xff]  ;;  %v11879_v33 = vld [vmem:[#allocation4_spill] sm:$0xff] }
 0xbde   : > { %v11875_v7 = vpack.i.bf16 %v11873_v42, %v11874_v58  ;;  %v11880_v17 = vpack.i.bf16 %v11878_v32, %v11879_v33 }
 0xc09   : > { %v4470_v56 = vpop.xlane.xlu0 %4469 }
 0xc0a   : > { %9457 = vrcp.f32 %v4470_v56  ;;  %v11881_v56 = vpack.i.bf16 %v11089_v61, %v11091_v34 }
 0xc0b   : > { %9459 = vrcp.f32 %v4473_v2  ;;  %v11877_v2 = vpack.i.bf16 %v11083_v43, %v11085_v4  ;;  %v11882_v43 = vld [vmem:[#allocation16_spill] sm:$0xff] }
 0xc0d   : > { %v9030_v48 = vpop.permute.xlu0 %9029 }
 0xc0e   : > { %v9032_v13 = vunpack.i.h.bf16 %v9030_v48  ;;  %v9031_v1 = vunpack.i.l.bf16 %v9030_v48  ;;  %v9045_v48 = vpop.permute.xlu1 %9044 }
 0xc0f   : > { %v9047_v55 = vunpack.i.h.bf16 %v9045_v48 }
 0xc10   : > { %v8604_v11 = vpack.c.bf16 %v9032_v13, %v9031_v1 }
 0xc11   : > { %v5005_v4 = vsel %vm1595_vm3, %v11882_v43, %v9047_v55 }
 0xc12   : > { %8605 = vmatprep.subr.bf16.mxu0 %v8604_v11  ;;  %v9050_v9 = vpop.permute.xlu1 %9049 }
 0xc13   : > { %8607 = vmatpush3.bf16.msra.mxu0 %v8604_v11  ;;  %v9051_v13 = vunpack.i.l.bf16 %v9050_v9 }
 0xc14   : > { %8609 = vmatprep.subr.bf16.mxu0 %v8608_v41  ;;  %v9458_v20 = vpop.eup %9457 }
 0xc15   : > { %v9460_v25 = vpop.eup %9459  ;;  %v4504_v57 = vmul.f32 %v9458_v20, %v11190_v12 }
 0xc16   : > { %v4505_v45 = vmul.f32 %v9460_v25, %v11153_v38  ;;  %v11876_v38 = vpack.i.bf16 %v11053_v63, %v11055_v50  ;;  %v9046_v63 = vunpack.i.l.bf16 %v9045_v48  ;;  %v9052_v50 = vunpack.i.h.bf16 %v9050_v9  ;;  %v9060_v1 = vpop.permute.xlu1 %9059  ;;  %v11889_v48 = vld [vmem:[#allocation22_spill] sm:$0xff] }
 0xc17   : > { %8611 = vmatpush3.bf16.msra.mxu0 %v8608_v41  ;;  %v9062_v34 = vunpack.i.h.bf16 %v9060_v1  ;;  %v9061_v51 = vunpack.i.l.bf16 %v9060_v1 }
 0xc18   : > { %8613 = vmatprep.subr.bf16.mxu0 %v8612_v52  ;;  %v5004_v21 = vsel %vm1595_vm3, %v11883_v62, %v9046_v63  ;;  %v5021_v61 = vsel %vm641_vm1, %v5005_v4, %v9052_v50 }
 0xc19   : > { %v5020_v27 = vsel %vm641_vm1, %v5004_v21, %v9051_v13  ;;  %v11890_v21 = vld [vmem:[#allocation7_spill] sm:$0xff] }
 0xc1b   : > { %8615 = vmatpush3.bf16.msra.mxu0 %v8612_v52 }
 0xc1d   : > { %v7886_v19 = vpop.f32.mrb[100].mxu1 }
 0xc1e   : > { %v4620_v6 = vpop.f32.mrb[101].mxu1  ;;  %7913 = vmatmul.mubr.msk.f32.vlgmr.msra.gmra.mrb[68].mxu0 %vm641_vm1, %v4499_v46 }
 0xc1f   : > { %v9053_v10 = vpack.i.bf16 %v7886_v19, %v4620_v6  ;;  %7915 = vmatprep.mubr.msk.f32.mxu0 %vm641_vm1, %v4500_v44  ;;  %v5006_v6 = vsel %vm1595_vm3, %v11884_v14, %v9061_v51 }
 0xc21   : > { %9054 = vrot.lane.b32.xlu0 %v9053_v10, %s9481_s13  ;;  %v7889_v31 = vpop.f32.mrb[102].mxu1  ;;  %v11885_v10 = vld [vmem:[#allocation18_spill] sm:$0xff] }
 0xc22   : > { %v4630_v47 = vpop.f32.mrb[103].mxu1  ;;  %7916 = vmatmul.mubr.msk.f32.gmra.mrb[70].mxu0 %vm641_vm1, %v4501_v22  ;;  %v5007_v22 = vsel %vm1595_vm3, %v11885_v10, %v9062_v34 }
 0xc23   : > { %v9068_v23 = vpack.i.bf16 %v7889_v31, %v4630_v47  ;;  %7918 = vmatprep.mubr.msk.f32.mxu0 %vm641_vm1, %v4502_v15 }
 0xc25   : > { %9064 = vrot.lane.b32.xlu0 %v11866_v24, %s9478_s27  ;;  %9069 = vrot.lane.b32.xlu1 %v9068_v23, %s9481_s13  ;;  %v7892_v54 = vpop.f32.mrb[104].mxu1 }
 0xc26   : > { %v4640_v5 = vpop.f32.mrb[105].mxu1  ;;  %7919 = vmatmul.mubr.msk.f32.gmra.mrb[72].mxu0 %vm641_vm1, %v4503_v30 }
 0xc27   : > { %v9083_v16 = vpack.i.bf16 %v7892_v54, %v4640_v5  ;;  %7921 = vmatprep.mubr.msk.f32.mxu0 %vm641_vm1, %v4504_v57  ;;  %v11886_v57 = vld [vmem:[#allocation21_spill] sm:$0xff] }
 0xc29   : > { %9074 = vrot.lane.b32.xlu0 %v11867_v3, %s9482_s14  ;;  %9079 = vrot.lane.b32.xlu1 %v11868_v36, %s9478_s27  ;;  %v7895_v0 = vpop.f32.mrb[106].mxu1 }
 0xc2a   : > { %v4650_v12 = vpop.f32.mrb[107].mxu1  ;;  %7922 = vmatmul.mubr.msk.f32.gmra.mrb[74].mxu0 %vm641_vm1, %v4505_v45 }
 0xc2b   : > { %v9098_v26 = vpack.i.bf16 %v7895_v0, %v4650_v12 }
 0xc2d   : > { %9089 = vrot.lane.b32.xlu1 %v11871_v37, %s9482_s14  ;;  %9084 = vrot.lane.b32.xlu0 %v9083_v16, %s9481_s13  ;;  %v11887_v16 = vld [vmem:[#allocation20_spill] sm:$0xff] }
 0xc31   : > { %9094 = vrot.lane.b32.xlu0 %v11872_v39, %s9478_s27  ;;  %9099 = vrot.lane.b32.xlu1 %v9098_v26, %s9481_s13 }
 0xc35   : > { %9104 = vrot.lane.b32.xlu0 %v11875_v7, %s9482_s14  ;;  %9109 = vrot.lane.b32.xlu1 %v11876_v38, %s9478_s27 }
 0xc39   : > { %9119 = vrot.lane.b32.xlu0 %v11877_v2, %s9478_s27  ;;  %9114 = vrot.lane.b32.xlu1 %v11880_v17, %s9482_s14  ;;  %v11888_v17 = vld [vmem:[#allocation23_spill] sm:$0xff] }
 0xc3d   : > { %9134 = vrot.lane.b32.xlu1 %v11881_v56, %s9478_s27 }
 0xc93   : > { %v9055_v59 = vpop.permute.xlu0 %9054 }
 0xc94   : > { %v9057_v11 = vunpack.i.h.bf16 %v9055_v59  ;;  %v9056_v41 = vunpack.i.l.bf16 %v9055_v59 }
 0xc96   : > { %v5037_v18 = vsel %vm5036_vm5, %v5020_v27, %v9056_v41  ;;  %v5038_v52 = vsel %vm5036_vm5, %v5021_v61, %v9057_v11  ;;  %v11891_v61 = vld [vmem:[#allocation3_spill] sm:$0xff] }
 0xc97   : > { %v9065_v40 = vpop.permute.xlu0 %9064  ;;  %7956 = vmatprep.mubr.f32.mxu1 %v5037_v18  ;;  %v9070_v35 = vpop.permute.xlu1 %9069  ;;  %v11892_v34 = vpack.i.bf16 %v11890_v21, %v11891_v61 }
 0xc98   : > { %v9067_v46 = vunpack.i.h.bf16 %v9065_v40  ;;  %v9066_v29 = vunpack.i.l.bf16 %v9065_v40  ;;  %v9072_v19 = vunpack.i.h.bf16 %v9070_v35  ;;  %v9071_v44 = vunpack.i.l.bf16 %v9070_v35  ;;  %7957 = vmatmul.mubr.f32.vlgmr.msra.gmra.mrb[108].mxu1 %v5038_v52  ;;  %v11893_v52 = vld [vmem:[#allocation2_spill] sm:$0xff]  ;;  %v11894_v40 = vld [vmem:[#allocation32_spill] sm:$0xff] }
 0xc99   : > { %v11895_v35 = vpack.i.bf16 %v11893_v52, %v11894_v40 }
 0xc9a   : > { %v5022_v60 = vsel %vm641_vm1, %v5006_v6, %v9066_v29  ;;  %v5023_v31 = vsel %vm641_vm1, %v5007_v22, %v9067_v46 }
 0xc9b   : > { %v9075_v15 = vpop.permute.xlu0 %9074  ;;  %v9080_v20 = vpop.permute.xlu1 %9079  ;;  %v5039_v47 = vsel %vm5036_vm5, %v5022_v60, %v9071_v44  ;;  %v5040_v23 = vsel %vm5036_vm5, %v5023_v31, %v9072_v19  ;;  %v11896_v19 = vpack.i.bf16 %v11095_v28, %v11097_v53 }
 0xc9c   : > { %v9077_v30 = vunpack.i.h.bf16 %v9075_v15  ;;  %v9076_v25 = vunpack.i.l.bf16 %v9075_v15  ;;  %7959 = vmatprep.mubr.f32.mxu1 %v5039_v47  ;;  %v9082_v24 = vunpack.i.h.bf16 %v9080_v20  ;;  %v9081_v54 = vunpack.i.l.bf16 %v9080_v20 }
 0xc9d   : > { %7960 = vmatmul.mubr.f32.gmra.mrb[110].mxu1 %v5040_v23  ;;  %v11897_v23 = vld [vmem:[#allocation25_spill] sm:$0xff] }
 0xc9e   : > { %v5008_v5 = vsel %vm1595_vm3, %v11886_v57, %v9076_v25  ;;  %v5009_v45 = vsel %vm1595_vm3, %v11887_v16, %v9077_v30  ;;  %v11898_v25 = vld [vmem:[#allocation24_spill] sm:$0xff] }
 0xc9f   : > { %v9090_v3 = vpop.permute.xlu1 %9089  ;;  %v9085_v36 = vpop.permute.xlu0 %9084  ;;  %v5024_v49 = vsel %vm641_vm1, %v5008_v5, %v9081_v54  ;;  %v5025_v37 = vsel %vm641_vm1, %v5009_v45, %v9082_v24 }
 0xca0   : > { %v9087_v0 = vunpack.i.h.bf16 %v9085_v36  ;;  %v9086_v12 = vunpack.i.l.bf16 %v9085_v36  ;;  %v9092_v26 = vunpack.i.h.bf16 %v9090_v3  ;;  %v9091_v8 = vunpack.i.l.bf16 %v9090_v3  ;;  %v11336_v36 = vld [vmem:[%s563_s20] ss:$0 sm:$0xff]  ;;  %s11638_s20 = scalar_lea.vmem %s11769_s11, %s6685_s24 }
 0xca2   : > { %v5041_v39 = vsel %vm5036_vm5, %v5024_v49, %v9086_v12  ;;  %v5042_v42 = vsel %vm5036_vm5, %v5025_v37, %v9087_v0  ;;  %v5010_v56 = vsel %vm1595_vm3, %v11888_v17, %v9091_v8  ;;  %v5011_v9 = vsel %vm1595_vm3, %v11889_v48, %v9092_v26  ;;  %v11899_v26 = vld [vmem:[#allocation27_spill] sm:$0xff]  ;;  %v11900_v49 = vld [vmem:[#allocation26_spill] sm:$0xff] }
 0xca3   : > { %v9095_v58 = vpop.permute.xlu0 %9094  ;;  %7962 = vmatprep.mubr.f32.mxu1 %v5041_v39  ;;  %v9100_v7 = vpop.permute.xlu1 %9099 }
 0xca4   : > { %v9097_v38 = vunpack.i.h.bf16 %v9095_v58  ;;  %v9096_v2 = vunpack.i.l.bf16 %v9095_v58  ;;  %v9102_v32 = vunpack.i.h.bf16 %v9100_v7  ;;  %v9101_v33 = vunpack.i.l.bf16 %v9100_v7  ;;  %7963 = vmatmul.mubr.f32.gmra.mrb[112].mxu1 %v5042_v42 }
 0xca6   : > { %v5026_v55 = vsel %vm641_vm1, %v5010_v56, %v9096_v2  ;;  %v5027_v63 = vsel %vm641_vm1, %v5011_v9, %v9097_v38 }
 0xca7   : > { %v5043_v50 = vsel %vm5036_vm5, %v5026_v55, %v9101_v33  ;;  %v5044_v13 = vsel %vm5036_vm5, %v5027_v63, %v9102_v32  ;;  %v9110_v44 = vpop.permute.xlu1 %9109  ;;  %v9105_v14 = vpop.permute.xlu0 %9104 }
 0xca8   : > { %7965 = vmatprep.mubr.f32.mxu1 %v5043_v50  ;;  %v9107_v10 = vunpack.i.h.bf16 %v9105_v14  ;;  %v9106_v22 = vunpack.i.l.bf16 %v9105_v14  ;;  %v9112_v31 = vunpack.i.h.bf16 %v9110_v44  ;;  %v9111_v15 = vunpack.i.l.bf16 %v9110_v44 }
 0xca9   : > { %7966 = vmatmul.mubr.f32.gmra.mrb[114].mxu1 %v5044_v13  ;;  %v11901_v13 = vld [vmem:[#allocation29_spill] sm:$0xff] }
 0xcaa   : > { %v5012_v30 = vsel %vm1595_vm3, %v11897_v23, %v9106_v22  ;;  %v5013_v28 = vsel %vm1595_vm3, %v11898_v25, %v9107_v10 }
 0xcab   : > { %v9115_v6 = vpop.permute.xlu1 %9114  ;;  %v9120_v60 = vpop.permute.xlu0 %9119  ;;  %v5028_v45 = vsel %vm641_vm1, %v5012_v30, %v9111_v15  ;;  %v5029_v3 = vsel %vm641_vm1, %v5013_v28, %v9112_v31  ;;  %v11904_v30 = vld [vmem:[#allocation30_spill] sm:$0xff] }
 0xcac   : > { %v9117_v20 = vunpack.i.h.bf16 %v9115_v6  ;;  %v9116_v47 = vunpack.i.l.bf16 %v9115_v6  ;;  %v9122_v5 = vunpack.i.h.bf16 %v9120_v60  ;;  %v9121_v16 = vunpack.i.l.bf16 %v9120_v60 }
 0xcae   : > { %v5014_v8 = vsel %vm1595_vm3, %v11899_v26, %v9116_v47  ;;  %v5015_v37 = vsel %vm1595_vm3, %v11900_v49, %v9117_v20  ;;  %v11903_v47 = vld [vmem:[#allocation31_spill] sm:$0xff] }
 0xcaf   : > { %v9135_v53 = vpop.permute.xlu1 %9134  ;;  %v5030_v48 = vsel %vm641_vm1, %v5014_v8, %v9121_v16  ;;  %v5031_v9 = vsel %vm641_vm1, %v5015_v37, %v9122_v5 }
 0xcb0   : > { %v9136_v33 = vunpack.i.l.bf16 %v9135_v53 }
 0xcf1   : > { %v7914_v1 = vpop.f32.mrb[68].mxu0 }
 0xcf2   : > { %v4773_v59 = vpop.f32.mrb[69].mxu0 }
 0xcf3   : > { %v9123_v43 = vpack.i.bf16 %v7914_v1, %v4773_v59  ;;  %v9137_v59 = vunpack.i.h.bf16 %v9135_v53 }
 0xcf5   : > { %v7917_v4 = vpop.f32.mrb[70].mxu0  ;;  %9124 = vrot.lane.b32.xlu0 %v9123_v43, %s9481_s13 }
 0xcf6   : > { %v4783_v11 = vpop.f32.mrb[71].mxu0 }
 0xcf7   : > { %v9138_v41 = vpack.i.bf16 %v7917_v4, %v4783_v11 }
 0xcf9   : > { %v7920_v62 = vpop.f32.mrb[72].mxu0  ;;  %9129 = vrot.lane.b32.xlu0 %v11892_v34, %s9482_s14  ;;  %9139 = vrot.lane.b32.xlu1 %v9138_v41, %s9481_s13  ;;  %v11902_v41 = vld [vmem:[#allocation28_spill] sm:$0xff] }
 0xcfa   : > { %v4793_v51 = vpop.f32.mrb[73].mxu0 }
 0xcfb   : > { %v9148_v27 = vpack.i.bf16 %v7920_v62, %v4793_v51 }
 0xcfd   : > { %v7923_v18 = vpop.f32.mrb[74].mxu0  ;;  %9149 = vrot.lane.b32.xlu0 %v9148_v27, %s9481_s13  ;;  %9144 = vrot.lane.b32.xlu1 %v11895_v35, %s9482_s14  ;;  %s570_s14 = scalar_lea.vmem %s11765_s7, %s11907_s22 }
 0xcfe   : > { %v4803_v46 = vpop.f32.mrb[75].mxu0 }
 0xcff   : > { %v9158_v29 = vpack.i.bf16 %v7923_v18, %v4803_v46 }
 0xd01   : > { %9154 = vrot.lane.b32.xlu0 %v11896_v19, %s9478_s27  ;;  %9159 = vrot.lane.b32.xlu1 %v9158_v29, %s9481_s13 }
 0xd67   : > { %v9125_v24 = vpop.permute.xlu0 %9124 }
 0xd68   : > { %v9127_v54 = vunpack.i.h.bf16 %v9125_v24  ;;  %v9126_v57 = vunpack.i.l.bf16 %v9125_v24 }
 0xd6a   : > { %v5045_v0 = vsel %vm5036_vm5, %v5028_v45, %v9126_v57  ;;  %v5046_v12 = vsel %vm5036_vm5, %v5029_v3, %v9127_v54 }
 0xd6b   : > { %v9130_v39 = vpop.permute.xlu0 %9129  ;;  %v9140_v42 = vpop.permute.xlu1 %9139  ;;  %7968 = vmatprep.mubr.f32.mxu1 %v5045_v0 }
 0xd6c   : > { %v9132_v58 = vunpack.i.h.bf16 %v9130_v39  ;;  %v9131_v7 = vunpack.i.l.bf16 %v9130_v39  ;;  %v9142_v38 = vunpack.i.h.bf16 %v9140_v42  ;;  %v9141_v2 = vunpack.i.l.bf16 %v9140_v42  ;;  %v7958_v32 = vpop.f32.mrb[108].mxu1  ;;  %7969 = vmatmul.mubr.f32.gmra.mrb[116].mxu1 %v5046_v12 }
 0xd6d   : > { %v5148_v17 = vadd.f32 %v7958_v32, %v11336_v36  ;;  %v5142_v56 = vpop.f32.mrb[109].mxu1  ;;  %v9483_v42 = vmov 0  }
 0xd6e   : > { %v5143_v55 = vadd.f32 %v11336_v36, %v5142_v56  ;;  %v5047_v63 = vsel %vm5036_vm5, %v5030_v48, %v9141_v2  ;;  %v5048_v50 = vsel %vm5036_vm5, %v5031_v9, %v9142_v38  ;;  %v5016_v1 = vsel %vm1595_vm3, %v11901_v13, %v9131_v7  ;;  %9203 = vset.pattern.permute.xlu0 %v9483_v42 }
 0xd6f   : > { %v9150_v43 = vpop.permute.xlu0 %9149  ;;  %v9145_v4 = vpop.permute.xlu1 %9144  ;;  %7971 = vmatprep.mubr.f32.mxu1 %v5047_v63  ;;  %v5032_v11 = vsel %vm641_vm1, %v5016_v1, %v9136_v33  ;;  %v5017_v62 = vsel %vm1595_vm3, %v11902_v41, %v9132_v58  ;;  %9204 = vset.pattern.permute.xlu1 %v9483_v42  ;;  %v11393_v58 = vld [vmem:[%s11390_s29 + $0x80] sm:$0xff]  ;;  %v11408_v41 = vld [vmem:[%s11390_s29 + $0x98] sm:$0xff]  ;;  %v5995_v42 = vld [vmem:[%s11502_s17 + $0x8] sm:$0xff] }
 0xd70   : > { %v9163_v21 = vpack.i.bf16 %v5148_v17, %v5143_v55  ;;  %v11355_v61 = vpack.c.bf16 %v5148_v17, %v5143_v55  ;;  %v9152_v34 = vunpack.i.h.bf16 %v9150_v43  ;;  %v9151_v51 = vunpack.i.l.bf16 %v9150_v43  ;;  %v7961_v27 = vpop.f32.mrb[110].mxu1  ;;  %7972 = vmatmul.mubr.f32.gmra.mrb[118].mxu1 %v5048_v50  ;;  %7996 = vmatprep.mubr.msk.f32.mxu0 %vm641_vm1, %v11393_v58 }
 0xd71   : > { %v9147_v18 = vunpack.i.h.bf16 %v9145_v4  ;;  %v9146_v52 = vunpack.i.l.bf16 %v9145_v4  ;;  %v5158_v40 = vadd.f32 %v7961_v27, %v11336_v36  ;;  %v5152_v35 = vpop.f32.mrb[111].mxu1  ;;  %v5033_v46 = vsel %vm641_vm1, %v5017_v62, %v9137_v59  ;;  %v11398_v4 = vld [vmem:[%s11390_s29 + $0x88] sm:$0xff]  ;;  %v11411_v62 = vld [vmem:[%s11390_s29 + $0xa0] sm:$0xff] }
 0xd72   : > { %v5153_v29 = vadd.f32 %v11336_v36, %v5152_v35  ;;  %9164 = vrot.lane.b32.xlu0 %v9163_v21, %s9478_s27  ;;  %v5049_v19 = vsel %vm5036_vm5, %v5032_v11, %v9151_v51  ;;  %v5050_v44 = vsel %vm5036_vm5, %v5033_v46, %v9152_v34  ;;  %v11401_v11 = vld [vmem:[%s11390_s29 + $0x90] sm:$0xff]  ;;  %v11418_v21 = vld [vmem:[%s11390_s29 + $0xa8] sm:$0xff]  ;;  %v11428_v51 = vld [vmem:[%s11390_s29 + $0xb8] sm:$0xff] }
 0xd73   : > { %v9155_v14 = vpop.permute.xlu0 %9154  ;;  %v9160_v6 = vpop.permute.xlu1 %9159  ;;  %7974 = vmatprep.mubr.f32.mxu1 %v5049_v19  ;;  %v5018_v23 = vsel %vm1595_vm3, %v11903_v47, %v9146_v52  ;;  %v5019_v25 = vsel %vm1595_vm3, %v11904_v30, %v9147_v18  ;;  %v11423_v34 = vld [vmem:[%s11390_s29 + $0xb0] sm:$0xff]  ;;  %v11433_v27 = vld [vmem:[%s11390_s29 + $0xc0] sm:$0xff]  ;;  %v11438_v18 = vld [vmem:[%s11390_s29 + $0xc8] sm:$0xff] }
 0xd74   : > { %v9168_v10 = vpack.i.bf16 %v5158_v40, %v5153_v29  ;;  %v11363_v22 = vpack.c.bf16 %v5158_v40, %v5153_v29  ;;  %v9157_v60 = vunpack.i.h.bf16 %v9155_v14  ;;  %v9156_v31 = vunpack.i.l.bf16 %v9155_v14  ;;  %7975 = vmatmul.mubr.f32.gmra.mrb[120].mxu1 %v5050_v44  ;;  %v11445_v29 = vld [vmem:[%s11390_s29 + $0xd0] sm:$0xff]  ;;  %v11450_v19 = vld [vmem:[%s11390_s29 + $0xd8] sm:$0xff] }
 0xd75   : > { %v9162_v15 = vunpack.i.h.bf16 %v9160_v6  ;;  %v9161_v20 = vunpack.i.l.bf16 %v9160_v6 }
 0xd76   : > { %9169 = vrot.lane.b32.xlu1 %v9168_v10, %s9478_s27  ;;  %v5034_v28 = vsel %vm641_vm1, %v5018_v23, %v9156_v31  ;;  %v5035_v53 = vsel %vm641_vm1, %v5019_v25, %v9157_v60  ;;  %v11472_v25 = vld [vmem:[%s11390_s29 + $0xf0] sm:$0xff] }
 0xd77   : > { %v7964_v24 = vpop.f32.mrb[112].mxu1  ;;  %v5051_v54 = vsel %vm5036_vm5, %v5034_v28, %v9161_v20  ;;  %v5052_v57 = vsel %vm5036_vm5, %v5035_v53, %v9162_v15  ;;  %v11460_v15 = vld [vmem:[%s11390_s29 + $0xe0] sm:$0xff]  ;;  %v11465_v20 = vld [vmem:[%s11390_s29 + $0xe8] sm:$0xff] }
 0xd78   : > { %v5168_v5 = vadd.f32 %v7964_v24, %v11336_v36  ;;  %v5162_v16 = vpop.f32.mrb[113].mxu1  ;;  %7977 = vmatprep.mubr.f32.mxu1 %v5051_v54  ;;  %v11478_v24 = vld [vmem:[%s11390_s29 + $0xf8] sm:$0xff] }
 0xd79   : > { %v5163_v45 = vadd.f32 %v11336_v36, %v5162_v16  ;;  %7978 = vmatmul.mubr.f32.gmra.mrb[122].mxu1 %v5052_v57 }
 0xd7b   : > { %v9173_v3 = vpack.i.bf16 %v5168_v5, %v5163_v45  ;;  %v11376_v0 = vpack.c.bf16 %v5168_v5, %v5163_v45 }
 0xd7c   : > { %v7967_v12 = vpop.f32.mrb[114].mxu1 }
 0xd7d   : > { %v5178_v26 = vadd.f32 %v7967_v12, %v11336_v36  ;;  %v5172_v8 = vpop.f32.mrb[115].mxu1  ;;  %9174 = vrot.lane.b32.xlu0 %v9173_v3, %s9478_s27 }
 0xd7e   : > { %v5173_v49 = vadd.f32 %v11336_v36, %v5172_v8 }
 0xd80   : > { %v9178_v37 = vpack.i.bf16 %v5178_v26, %v5173_v49  ;;  %v11381_v39 = vpack.c.bf16 %v5178_v26, %v5173_v49  ;;  %v968_v26 = vld [vmem:[%s570_s14] sm:$0x1] }
 0xd82   : > { %9179 = vrot.lane.b32.xlu1 %v9178_v37, %s9478_s27  ;;  %v5996_v37 = vld [vmem:[%s11502_s17 + $0x10] sm:$0xff] }
 0xde4   : > { %v9165_v7 = vpop.permute.xlu0 %9164 }
 0xde5   : > { %v9167_v38 = vunpack.i.h.bf16 %v9165_v7  ;;  %v9166_v2 = vunpack.i.l.bf16 %v9165_v7  ;;  %v5997_v7 = vld [vmem:[%s11502_s17 + $0x18] sm:$0xff] }
 0xde7   : > { %v8648_v32 = vpack.c.bf16 %v9167_v38, %v9166_v2  ;;  %v6000_v38 = vld [vmem:[%s11502_s17 + $0x30] sm:$0xff]  ;;  %v5999_v2 = vld [vmem:[%s11502_s17 + $0x28] sm:$0xff] }
 0xde8   : > { %v9170_v33 = vpop.permute.xlu1 %9169 }
 0xde9   : > { %v9172_v17 = vunpack.i.h.bf16 %v9170_v33  ;;  %v9171_v56 = vunpack.i.l.bf16 %v9170_v33  ;;  %8649 = vmatprep.subr.bf16.mxu0 %v8648_v32 }
 0xdea   : > { %8651 = vmatpush3.bf16.msra.mxu0 %v8648_v32  ;;  %v6002_v32 = vld [vmem:[%s11502_s17 + $0x40] sm:$0xff] }
 0xdeb   : > { %v8652_v48 = vpack.c.bf16 %v9172_v17, %v9171_v56 }
 0xded   : > { %8653 = vmatprep.subr.bf16.mxu0 %v8652_v48 }
 0xdee   : > { %8655 = vmatpush3.bf16.msra.mxu0 %v8652_v48  ;;  %v6001_v48 = vld [vmem:[%s11502_s17 + $0x38] sm:$0xff] }
 0xdef   : > { %v9175_v9 = vpop.permute.xlu0 %9174 }
 0xdf0   : > { %v9177_v55 = vunpack.i.h.bf16 %v9175_v9  ;;  %v9176_v63 = vunpack.i.l.bf16 %v9175_v9  ;;  %v6004_v9 = vld [vmem:[%s11502_s17 + $0x50] sm:$0xff] }
 0xdf2   : > { %v8656_v50 = vpack.c.bf16 %v9177_v55, %v9176_v63 }
 0xdf4   : > { %v9180_v13 = vpop.permute.xlu1 %9179  ;;  %8657 = vmatprep.subr.bf16.mxu0 %v8656_v50 }
 0xdf5   : > { %v9182_v1 = vunpack.i.h.bf16 %v9180_v13  ;;  %v9181_v59 = vunpack.i.l.bf16 %v9180_v13  ;;  %8659 = vmatpush3.bf16.msra.mxu0 %v8656_v50 }
 0xdf7   : > { %v8660_v43 = vpack.c.bf16 %v9182_v1, %v9181_v59  ;;  %v6003_v1 = vld [vmem:[%s11502_s17 + $0x48] sm:$0xff]  ;;  %v6006_v59 = vld [vmem:[%s11502_s17 + $0x60] sm:$0xff] }
 0xdf9   : > { %8661 = vmatprep.subr.bf16.mxu0 %v8660_v43 }
 0xdfa   : > { %8663 = vmatpush3.bf16.msra.mxu0 %v8660_v43 }
 0xdfd   : > { %7997 = vmatmul.mubr.msk.f32.vlgmr.msra.gmra.mrb[76].mxu0 %vm641_vm1, %v11398_v4 }
 0xdfe   : > { %7999 = vmatprep.mubr.msk.f32.mxu0 %vm641_vm1, %v11401_v11 }
 0xe01   : > { %8000 = vmatmul.mubr.msk.f32.gmra.mrb[78].mxu0 %vm641_vm1, %v11408_v41 }
 0xe02   : > { %8002 = vmatprep.mubr.msk.f32.mxu0 %vm641_vm1, %v11411_v62 }
 0xe05   : > { %8003 = vmatmul.mubr.msk.f32.gmra.mrb[80].mxu0 %vm641_vm1, %v11418_v21 }
 0xe06   : > { %8005 = vmatprep.mubr.msk.f32.mxu0 %vm641_vm1, %v11423_v34 }
 0xe09   : > { %8006 = vmatmul.mubr.msk.f32.gmra.mrb[82].mxu0 %vm641_vm1, %v11428_v51 }
 0xe0a   : > { %8008 = vmatprep.mubr.msk.f32.mxu0 %vm641_vm1, %v11433_v27 }
 0xe0d   : > { %8009 = vmatmul.mubr.msk.f32.gmra.mrb[84].mxu0 %vm641_vm1, %v11438_v18 }
 0xe0e   : > { %8011 = vmatprep.mubr.msk.f32.mxu0 %vm641_vm1, %v11445_v29 }
 0xe11   : > { %8012 = vmatmul.mubr.msk.f32.gmra.mrb[86].mxu0 %vm641_vm1, %v11450_v19 }
 0xe12   : > { %8014 = vmatprep.mubr.msk.f32.mxu0 %vm641_vm1, %v11460_v15 }
 0xe15   : > { %8015 = vmatmul.mubr.msk.f32.gmra.mrb[88].mxu0 %vm641_vm1, %v11465_v20 }
 0xe16   : > { %8017 = vmatprep.mubr.msk.f32.mxu0 %vm641_vm1, %v11472_v25 }
 0xe19   : > { %8018 = vmatmul.mubr.msk.f32.gmra.mrb[90].mxu0 %vm641_vm1, %v11478_v24 }
 0xe1a   : > { %8036 = vmatprep.mubr.msk.f32.mxu0 %vm641_vm1, %v11393_v58  ;;  %v5998_v58 = vld [vmem:[%s11502_s17 + $0x20] sm:$0xff] }
 0xe3f   : > { %v7970_v52 = vpop.f32.mrb[116].mxu1 }
 0xe40   : > { %v5188_v40 = vadd.f32 %v7970_v52, %v11336_v36  ;;  %v5182_v35 = vpop.f32.mrb[117].mxu1 }
 0xe41   : > { %v5183_v46 = vadd.f32 %v11336_v36, %v5182_v35 }
 0xe43   : > { %v9183_v44 = vpack.i.bf16 %v5188_v40, %v5183_v46  ;;  %v11452_v14 = vpack.c.bf16 %v5188_v40, %v5183_v46  ;;  %v7973_v6 = vpop.f32.mrb[118].mxu1  ;;  %v6005_v46 = vld [vmem:[%s11502_s17 + $0x58] sm:$0xff] }
 0xe44   : > { %v5198_v10 = vadd.f32 %v7973_v6, %v11336_v36  ;;  %v5192_v60 = vpop.f32.mrb[119].mxu1 }
 0xe45   : > { %v5193_v31 = vadd.f32 %v11336_v36, %v5192_v60  ;;  %9184 = vrot.lane.b32.xlu0 %v9183_v44, %s9478_s27  ;;  %v6008_v44 = vld [vmem:[%s11502_s17 + $0x70] sm:$0xff]  ;;  %v6007_v60 = vld [vmem:[%s11502_s17 + $0x68] sm:$0xff] }
 0xe47   : > { %v9188_v47 = vpack.i.bf16 %v5198_v10, %v5193_v31  ;;  %v11467_v23 = vpack.c.bf16 %v5198_v10, %v5193_v31  ;;  %v7976_v30 = vpop.f32.mrb[120].mxu1 }
 0xe48   : > { %v5208_v28 = vadd.f32 %v7976_v30, %v11336_v36  ;;  %v5202_v53 = vpop.f32.mrb[121].mxu1  ;;  %v974_v30 = vlaneseq }
 0xe49   : > { %v5203_v54 = vadd.f32 %v11336_v36, %v5202_v53  ;;  %9189 = vrot.lane.b32.xlu1 %v9188_v47, %s9478_s27  ;;  %v6009_v53 = vld [vmem:[%s11502_s17 + $0x78] sm:$0xff] }
 0xe4b   : > { %v9193_v57 = vpack.i.bf16 %v5208_v28, %v5203_v54  ;;  %v11482_v5 = vpack.c.bf16 %v5208_v28, %v5203_v54  ;;  %v975_v54 = vshrl.u32 %v974_v30, 7 }
 0xe4c   : > { %v7979_v16 = vpop.f32.mrb[122].mxu1 }
 0xe4d   : > { %v5218_v45 = vadd.f32 %v7979_v16, %v11336_v36  ;;  %v5212_v3 = vpop.f32.mrb[123].mxu1  ;;  %9194 = vrot.lane.b32.xlu0 %v9193_v57, %s9478_s27  ;;  %v9484_v57 = vmov 1966171168  }
 0xe4e   : > { %v5213_v12 = vadd.f32 %v11336_v36, %v5212_v3  ;;  %v5994_v36 = vld [vmem:[%s11502_s17] sm:$0xff]  ;;  %v986_v16 = vunpack.c.l.s4 %v9484_v57 }
 0xe50   : > { %v9198_v8 = vpack.i.bf16 %v5218_v45, %v5213_v12  ;;  %v11495_v49 = vpack.c.bf16 %v5218_v45, %v5213_v12  ;;  %v976_v45 = vsub.s32 0, %v975_v54  ;;  %v987_v3 = vunpack.c.0.s8 %v986_v16 }
 0xe51   : > { %971 = vperm.xlu0 %9203, %v968_v26  }
 0xe52   : > { %9199 = vrot.lane.b32.xlu1 %v9198_v8, %s9478_s27  ;;  %v990_v26 = vsub.s32 %v987_v3, %v975_v54 }
 0xe55   : > { %6022 = vperm.xlu0 %9203, %v5996_v37   ;;  %v5226_v37 = vld [vmem:[%s11390_s29 + $0x28] sm:$0xff] }
 0xe56   : > { %6012 = vperm.xlu1 %9204, %v5994_v36  }
 0xe59   : > { %6032 = vperm.xlu0 %9203, %v5998_v58  }
 0xe5a   : > { %6017 = vperm.xlu1 %9204, %v5995_v42   ;;  %v5229_v42 = vld [vmem:[%s11390_s29 + $0x40] sm:$0xff] }
 0xe5d   : > { %6042 = vperm.xlu0 %9203, %v6000_v38   ;;  %v5231_v38 = vld [vmem:[%s11390_s29 + $0x50] sm:$0xff] }
 0xe5e   : > { %6027 = vperm.xlu1 %9204, %v5997_v7  }
 0xe61   : > { %6052 = vperm.xlu0 %9203, %v6002_v32   ;;  %v5233_v32 = vld [vmem:[%s11390_s29 + $0x60] sm:$0xff] }
 0xe62   : > { %6037 = vperm.xlu1 %9204, %v5999_v2   ;;  %v5232_v2 = vld [vmem:[%s11390_s29 + $0x58] sm:$0xff] }
 0xe65   : > { %6062 = vperm.xlu0 %9203, %v6004_v9  }
 0xe66   : > { %6047 = vperm.xlu1 %9204, %v6001_v48  }
 0xe69   : > { %6072 = vperm.xlu0 %9203, %v6006_v59  }
 0xe6a   : > { %6057 = vperm.xlu1 %9204, %v6003_v1  }
 0xe6d   : > { %6082 = vperm.xlu0 %9203, %v6008_v44  }
 0xe6e   : > { %6067 = vperm.xlu1 %9204, %v6005_v46  }
 0xe72   : > { %6077 = vperm.xlu1 %9204, %v6007_v60  }
 0xe76   : > { %6087 = vperm.xlu1 %9204, %v6009_v53  }
 0xeb7   : > { %v9185_v33 = vpop.permute.xlu0 %9184 }
 0xeb8   : > { %v9187_v17 = vunpack.i.h.bf16 %v9185_v33  ;;  %v9186_v56 = vunpack.i.l.bf16 %v9185_v33  ;;  %v5234_v33 = vld [vmem:[%s11390_s29 + $0x68] sm:$0xff] }
 0xeba   : > { %v8664_v55 = vpack.c.bf16 %v9187_v17, %v9186_v56  ;;  %v5235_v17 = vld [vmem:[%s11390_s29 + $0x70] sm:$0xff] }
 0xebb   : > { %v9190_v63 = vpop.permute.xlu1 %9189 }
 0xebc   : > { %v9192_v50 = vunpack.i.h.bf16 %v9190_v63  ;;  %v9191_v13 = vunpack.i.l.bf16 %v9190_v63  ;;  %8665 = vmatprep.subr.bf16.mxu0 %v8664_v55 }
 0xebd   : > { %8667 = vmatpush3.bf16.msra.mxu0 %v8664_v55 }
 0xebe   : > { %v8668_v43 = vpack.c.bf16 %v9192_v50, %v9191_v13 }
 0xebf   : > { %v9195_v52 = vpop.permute.xlu0 %9194 }
 0xec0   : > { %v9197_v40 = vunpack.i.h.bf16 %v9195_v52  ;;  %v9196_v35 = vunpack.i.l.bf16 %v9195_v52  ;;  %8669 = vmatprep.subr.bf16.mxu0 %v8668_v43 }
 0xec1   : > { %8671 = vmatpush3.bf16.msra.mxu0 %v8668_v43 }
 0xec2   : > { %v8672_v6 = vpack.c.bf16 %v9197_v40, %v9196_v35 }
 0xec4   : > { %v9200_v10 = vpop.permute.xlu1 %9199  ;;  %8673 = vmatprep.subr.bf16.mxu0 %v8672_v6 }
 0xec5   : > { %v9202_v31 = vunpack.i.h.bf16 %v9200_v10  ;;  %v9201_v47 = vunpack.i.l.bf16 %v9200_v10  ;;  %8675 = vmatpush3.bf16.msra.mxu0 %v8672_v6 }
 0xec7   : > { %v8676_v28 = vpack.c.bf16 %v9202_v31, %v9201_v47 }
 0xec9   : > { %8677 = vmatprep.subr.bf16.mxu0 %v8676_v28 }
 0xeca   : > { %8679 = vmatpush3.bf16.msra.mxu0 %v8676_v28 }
 0xecb   : > { %8681 = vmatprep.subr.bf16.mxu0 %v11355_v61 }
 0xecd   : > { %8037 = vmatmul.mubr.msk.f32.vlgmr.msra.gmra.mrb[92].mxu0 %vm641_vm1, %v11398_v4 }
 0xece   : > { %8683 = vmatpush3.bf16.msra.mxu0 %v11355_v61  ;;  %8039 = vmatprep.mubr.msk.f32.mxu0 %vm641_vm1, %v11401_v11 }
 0xecf   : > { %8685 = vmatprep.subr.bf16.mxu0 %v11363_v22 }
 0xed0   : > { %v972_v12 = vpop.permute.xlu0 %971 }
 0xed1   : > { %v977_v8 = vrot.slane %v972_v12, %v976_v45  ;;  %8040 = vmatmul.mubr.msk.f32.gmra.mrb[94].mxu0 %vm641_vm1, %v11408_v41  ;;  %v11905_v41 = vld [vmem:[#allocation15_spill] sm:$0xff] }
 0xed2   : > { %8687 = vmatpush3.bf16.msra.mxu0 %v11363_v22  ;;  %8042 = vmatprep.mubr.msk.f32.mxu0 %vm641_vm1, %v11411_v62 }
 0xed3   : > { %v984_v4 = vcombine.low %v977_v8, %v977_v8  ;;  %8689 = vmatprep.subr.bf16.mxu0 %v11376_v0 }
 0xed4   : > { %v11626_v55 = vpop.permute.xlu0 %6022 }
 0xed5   : > { %v991_v61 = vrot.slane %v984_v4, %v990_v26  ;;  %8043 = vmatmul.mubr.msk.f32.gmra.mrb[96].mxu0 %vm641_vm1, %v11418_v21  ;;  %v11620_v56 = vpop.permute.xlu1 %6012 }
 0xed6   : > { %8691 = vmatpush3.bf16.msra.mxu0 %v11376_v0  ;;  %8045 = vmatprep.mubr.msk.f32.mxu0 %vm641_vm1, %v11423_v34 }
 0xed7   : > { %v998_v11 = vrot.slane %v991_v61, %v990_v26  ;;  %8693 = vmatprep.subr.bf16.mxu0 %v11381_v39 }
 0xed8   : > { %v11630_v50 = vpop.permute.xlu0 %6032 }
 0xed9   : > { %v1069_v22 = vadd.f32 %v11905_v41, %v998_v11  ;;  %8046 = vmatmul.mubr.msk.f32.gmra.mrb[98].mxu0 %vm641_vm1, %v11428_v51  ;;  %v11622_v48 = vpop.permute.xlu1 %6017 }
 0xeda   : > { %8695 = vmatpush3.bf16.msra.mxu0 %v11381_v39  ;;  %8048 = vmatprep.mubr.msk.f32.mxu0 %vm641_vm1, %v11433_v27  ;;  %v5221_v27 = vld [vmem:[%s11390_s29] sm:$0xff] }
 0xedb   : > { %v1079_v62 = vrot.slane %v1069_v22, %v990_v26  ;;  %8697 = vmatprep.subr.bf16.mxu0 %v11452_v14 }
 0xedc   : > { %v11646_v10 = vpop.permute.xlu0 %6042 }
 0xedd   : > { %v1080_v0 = vcombine.high %v1079_v62, %v1079_v62  ;;  %v1087_v21 = vrot.slane %v1079_v62, %v990_v26  ;;  %8049 = vmatmul.mubr.msk.f32.gmra.mrb[100].mxu0 %vm641_vm1, %v11438_v18  ;;  %v5222_v18 = vld [vmem:[%s11390_s29 + $0x8] sm:$0xff]  ;;  %v11624_v9 = vpop.permute.xlu1 %6027 }
 0xede   : > { %8051 = vmatprep.mubr.msk.f32.mxu0 %vm641_vm1, %v11445_v29 }
 0xedf   : > { %v1094_v34 = vrot.slane %v1080_v0, %v990_v26  ;;  %v6403_v51 = vmul.f32 -1.442695, %v1087_v21 }
 0xee0   : > { %v11659_v45 = vpop.permute.xlu0 %6052 }
 0xee1   : > { %9461 = vpow2.f32 %v6403_v51  ;;  %v6404_v39 = vmul.f32 -1.442695, %v1094_v34  ;;  %8052 = vmatmul.mubr.msk.f32.gmra.mrb[102].mxu0 %vm641_vm1, %v11450_v19  ;;  %v5223_v19 = vld [vmem:[%s11390_s29 + $0x10] sm:$0xff]  ;;  %v11628_v63 = vpop.permute.xlu1 %6037 }
 0xee2   : > { %8054 = vmatprep.mubr.msk.f32.mxu0 %vm641_vm1, %v11460_v15 }
 0xee3   : > { %9463 = vpow2.f32 %v6404_v39 }
 0xee4   : > { %v11672_v21 = vpop.permute.xlu0 %6062 }
 0xee5   : > { %8055 = vmatmul.mubr.msk.f32.gmra.mrb[104].mxu0 %vm641_vm1, %v11465_v20  ;;  %v11641_v52 = vpop.permute.xlu1 %6047 }
 0xee6   : > { %8057 = vmatprep.mubr.msk.f32.mxu0 %vm641_vm1, %v11472_v25  ;;  %v5224_v25 = vld [vmem:[%s11390_s29 + $0x18] sm:$0xff] }
 0xee9   : > { %8058 = vmatmul.mubr.msk.f32.gmra.mrb[106].mxu0 %vm641_vm1, %v11478_v24  ;;  %v5225_v24 = vld [vmem:[%s11390_s29 + $0x20] sm:$0xff]  ;;  %v11651_v28 = vpop.permute.xlu1 %6057 }
 0xeea   : > { %8076 = vmatprep.mubr.msk.f32.mxu0 %vm641_vm1, %v5221_v27 }
 0xeeb   : > { %v9462_v29 = vpop.eup %9461 }
 0xeec   : > { %v1103_v15 = vadd.f32 1.0, %v9462_v29 }
 0xeed   : > { %v9464_v36 = vpop.eup %9463  ;;  %8077 = vmatmul.mubr.msk.f32.vlgmr.msra.gmra.mrb[76].mxu0 %vm641_vm1, %v5222_v18  ;;  %v11667_v61 = vpop.permute.xlu1 %6067 }
 0xeee   : > { %v1104_v20 = vadd.f32 1.0, %v9464_v36  ;;  %9465 = vrcp.f32 %v1103_v15  ;;  %8699 = vmatpush3.bf16.msra.mxu0 %v11452_v14  ;;  %8079 = vmatprep.mubr.msk.f32.mxu0 %vm641_vm1, %v5223_v19  ;;  %v5227_v14 = vld [vmem:[%s11390_s29 + $0x30] sm:$0xff] }
 0xeef   : > { %8701 = vmatprep.subr.bf16.mxu0 %v11467_v23 }
 0xef0   : > { %9467 = vrcp.f32 %v1104_v20  ;;  %v11685_v20 = vpop.permute.xlu0 %6072 }
 0xef1   : > { %8080 = vmatmul.mubr.msk.f32.gmra.mrb[78].mxu0 %vm641_vm1, %v5224_v25 }
 0xef2   : > { %8703 = vmatpush3.bf16.msra.mxu0 %v11467_v23  ;;  %8082 = vmatprep.mubr.msk.f32.mxu0 %vm641_vm1, %v5225_v24  ;;  %v5228_v23 = vld [vmem:[%s11390_s29 + $0x38] sm:$0xff] }
 0xef3   : > { %8705 = vmatprep.subr.bf16.mxu0 %v11482_v5 }
 0xef5   : > { %8083 = vmatmul.mubr.msk.f32.gmra.mrb[80].mxu0 %vm641_vm1, %v5226_v37 }
 0xef6   : > { %8707 = vmatpush3.bf16.msra.mxu0 %v11482_v5  ;;  %8085 = vmatprep.mubr.msk.f32.mxu0 %vm641_vm1, %v5227_v14  ;;  %v5230_v5 = vld [vmem:[%s11390_s29 + $0x48] sm:$0xff] }
 0xef7   : > { %8709 = vmatprep.subr.bf16.mxu0 %v11495_v49 }
 0xef8   : > { %v9466_v58 = vpop.eup %9465 }
 0xef9   : > { %1110 = vst.msk [vmem:[%s589_s18] sm:$0x1] %vm1109_vm6, %v9466_v58  ;;  %8086 = vmatmul.mubr.msk.f32.gmra.mrb[82].mxu0 %vm641_vm1, %v5228_v23 }
 0xefa   : > { %v9468_v7 = vpop.eup %9467  ;;  %8711 = vmatpush3.bf16.msra.mxu0 %v11495_v49  ;;  %8088 = vmatprep.mubr.msk.f32.mxu0 %vm641_vm1, %v5229_v42  ;;  %v5236_v49 = vld [vmem:[%s11390_s29 + $0x78] sm:$0xff] }
 0xefb   : > { %1111 = vst.msk [vmem:[%s589_s18 + $0x1] sm:$0x1] %vm1109_vm6, %v9468_v7 }
 0xefd   : > { %8089 = vmatmul.mubr.msk.f32.gmra.mrb[84].mxu0 %vm641_vm1, %v5230_v5 }
 0xefe   : > { %8091 = vmatprep.mubr.msk.f32.mxu0 %vm641_vm1, %v5231_v38 }
 0xf01   : > { %8092 = vmatmul.mubr.msk.f32.gmra.mrb[86].mxu0 %vm641_vm1, %v5232_v2 }
 0xf02   : > { %8094 = vmatprep.mubr.msk.f32.mxu0 %vm641_vm1, %v5233_v32 }
 0xf05   : > { %8095 = vmatmul.mubr.msk.f32.gmra.mrb[88].mxu0 %vm641_vm1, %v5234_v33 }
 0xf06   : > { %8097 = vmatprep.mubr.msk.f32.mxu0 %vm641_vm1, %v5235_v17 }
 0xf09   : > { %8098 = vmatmul.mubr.msk.f32.gmra.mrb[90].mxu0 %vm641_vm1, %v5236_v49 }
 0xf0a   : > { %8116 = vmatprep.mubr.msk.f32.mxu0 %vm641_vm1, %v5221_v27 }
 0xf0d   : > { %8117 = vmatmul.mubr.msk.f32.vlgmr.msra.gmra.mrb[92].mxu0 %vm641_vm1, %v5222_v18  ;;  %v11677_v18 = vpop.permute.xlu1 %6077 }
 0xf0e   : > { %8119 = vmatprep.mubr.msk.f32.mxu0 %vm641_vm1, %v5223_v19 }
 0xf11   : > { %8120 = vmatmul.mubr.msk.f32.gmra.mrb[94].mxu0 %vm641_vm1, %v5224_v25 }
 0xf12   : > { %8122 = vmatprep.mubr.msk.f32.mxu0 %vm641_vm1, %v5225_v24 }
 0xf15   : > { %8123 = vmatmul.mubr.msk.f32.gmra.mrb[96].mxu0 %vm641_vm1, %v5226_v37 }
 0xf16   : > { %8125 = vmatprep.mubr.msk.f32.mxu0 %vm641_vm1, %v5227_v14 }
 0xf19   : > { %8126 = vmatmul.mubr.msk.f32.gmra.mrb[98].mxu0 %vm641_vm1, %v5228_v23 }
 0xf1a   : > { %8128 = vmatprep.mubr.msk.f32.mxu0 %vm641_vm1, %v5229_v42  ;;  %v11693_v42 = vpop.permute.xlu1 %6087 }
 0xf1d   : > { %8129 = vmatmul.mubr.msk.f32.gmra.mrb[100].mxu0 %vm641_vm1, %v5230_v5 }
 0xf1e   : > { %8131 = vmatprep.mubr.msk.f32.mxu0 %vm641_vm1, %v5231_v38 }
 0xf21   : > { %8132 = vmatmul.mubr.msk.f32.gmra.mrb[102].mxu0 %vm641_vm1, %v5232_v2  ;;  %v11698_v2 = vpop.permute.xlu0 %6082 }
 0xf22   : > { %8134 = vmatprep.mubr.msk.f32.mxu0 %vm641_vm1, %v5233_v32 }
 0xf25   : > { %8135 = vmatmul.mubr.msk.f32.gmra.mrb[104].mxu0 %vm641_vm1, %v5234_v33 }
 0xf26   : > { %8137 = vmatprep.mubr.msk.f32.mxu0 %vm641_vm1, %v5235_v17 }
 0xf29   : > { %8138 = vmatmul.mubr.msk.f32.gmra.mrb[106].mxu0 %vm641_vm1, %v5236_v49 }
 0xfc0   : > { %v8078_v13 = vpop.f32.mrb[76].mxu0 }
 0xfc1   : > { %v6091_v1 = vadd.f32 %v8078_v13, %v11622_v48  ;;  %v5770_v59 = vpop.f32.mrb[77].mxu0 }
 0xfc2   : > { %v6090_v43 = vadd.f32 %v11620_v56, %v5770_v59 }
 0xfc3   : > { %v6123_v40 = vmax.f32 %v6091_v1, 0.0 }
 0xfc4   : > { %v6122_v35 = vmax.f32 %v6090_v43, 0.0  ;;  %v8081_v46 = vpop.f32.mrb[78].mxu0 }
 0xfc5   : > { %6155 = vst.msk [vmem:[%s11638_s20 + $0x8] sm:$0xff] %vm641_vm1, %v6123_v40  ;;  %v6093_v44 = vadd.f32 %v8081_v46, %v11624_v9  ;;  %v5780_v6 = vpop.f32.mrb[79].mxu0 }
 0xfc6   : > { %6154 = vst.msk [vmem:[%s11638_s20] sm:$0xff] %vm641_vm1, %v6122_v35  ;;  %v6092_v60 = vadd.f32 %v11626_v55, %v5780_v6 }
 0xfc7   : > { %v6125_v31 = vmax.f32 %v6093_v44, 0.0 }
 0xfc8   : > { %v6124_v47 = vmax.f32 %v6092_v60, 0.0  ;;  %v8084_v30 = vpop.f32.mrb[80].mxu0 }
 0xfc9   : > { %6157 = vst.msk [vmem:[%s11638_s20 + $0x18] sm:$0xff] %vm641_vm1, %v6125_v31  ;;  %v6095_v53 = vadd.f32 %v8084_v30, %v11628_v63  ;;  %v5790_v54 = vpop.f32.mrb[81].mxu0 }
 0xfca   : > { %6156 = vst.msk [vmem:[%s11638_s20 + $0x10] sm:$0xff] %vm641_vm1, %v6124_v47  ;;  %v6094_v57 = vadd.f32 %v11630_v50, %v5790_v54 }
 0xfcb   : > { %v6127_v16 = vmax.f32 %v6095_v53, 0.0 }
 0xfcc   : > { %v6126_v3 = vmax.f32 %v6094_v57, 0.0  ;;  %v8087_v12 = vpop.f32.mrb[82].mxu0 }
 0xfcd   : > { %6159 = vst.msk [vmem:[%s11638_s20 + $0x28] sm:$0xff] %vm641_vm1, %v6127_v16  ;;  %v6097_v26 = vadd.f32 %v8087_v12, %v11641_v52  ;;  %v5800_v8 = vpop.f32.mrb[83].mxu0 }
 0xfce   : > { %6158 = vst.msk [vmem:[%s11638_s20 + $0x20] sm:$0xff] %vm641_vm1, %v6126_v3  ;;  %v6096_v4 = vadd.f32 %v11646_v10, %v5800_v8 }
 0xfcf   : > { %v6129_v11 = vmax.f32 %v6097_v26, 0.0 }
 0xfd0   : > { %v6128_v41 = vmax.f32 %v6096_v4, 0.0  ;;  %v8090_v22 = vpop.f32.mrb[84].mxu0 }
 0xfd1   : > { %6161 = vst.msk [vmem:[%s11638_s20 + $0x38] sm:$0xff] %vm641_vm1, %v6129_v11  ;;  %v6099_v62 = vadd.f32 %v8090_v22, %v11651_v28  ;;  %v5810_v0 = vpop.f32.mrb[85].mxu0 }
 0xfd2   : > { %6160 = vst.msk [vmem:[%s11638_s20 + $0x30] sm:$0xff] %vm641_vm1, %v6128_v41  ;;  %v6098_v34 = vadd.f32 %v11659_v45, %v5810_v0 }
 0xfd3   : > { %v6131_v51 = vmax.f32 %v6099_v62, 0.0 }
 0xfd4   : > { %v6130_v39 = vmax.f32 %v6098_v34, 0.0  ;;  %v8093_v27 = vpop.f32.mrb[86].mxu0 }
 0xfd5   : > { %6163 = vst.msk [vmem:[%s11638_s20 + $0x48] sm:$0xff] %vm641_vm1, %v6131_v51  ;;  %v6101_v29 = vadd.f32 %v8093_v27, %v11667_v61  ;;  %v5820_v19 = vpop.f32.mrb[87].mxu0 }
 0xfd6   : > { %6162 = vst.msk [vmem:[%s11638_s20 + $0x40] sm:$0xff] %vm641_vm1, %v6130_v39  ;;  %v6100_v15 = vadd.f32 %v11672_v21, %v5820_v19 }
 0xfd7   : > { %v6133_v36 = vmax.f32 %v6101_v29, 0.0 }
 0xfd8   : > { %v6132_v25 = vmax.f32 %v6100_v15, 0.0  ;;  %v8096_v24 = vpop.f32.mrb[88].mxu0 }
 0xfd9   : > { %6165 = vst.msk [vmem:[%s11638_s20 + $0x58] sm:$0xff] %vm641_vm1, %v6133_v36  ;;  %v6103_v37 = vadd.f32 %v8096_v24, %v11677_v18  ;;  %v5830_v14 = vpop.f32.mrb[89].mxu0 }
 0xfda   : > { %6164 = vst.msk [vmem:[%s11638_s20 + $0x50] sm:$0xff] %vm641_vm1, %v6132_v25  ;;  %v6102_v23 = vadd.f32 %v11685_v20, %v5830_v14 }
 0xfdb   : > { %v6135_v58 = vmax.f32 %v6103_v37, 0.0 }
 0xfdc   : > { %v6134_v7 = vmax.f32 %v6102_v23, 0.0  ;;  %v8099_v5 = vpop.f32.mrb[90].mxu0 }
 0xfdd   : > { %6167 = vst.msk [vmem:[%s11638_s20 + $0x68] sm:$0xff] %vm641_vm1, %v6135_v58  ;;  %v6105_v38 = vadd.f32 %v8099_v5, %v11693_v42  ;;  %v5840_v32 = vpop.f32.mrb[91].mxu0 }
 0xfde   : > { %6166 = vst.msk [vmem:[%s11638_s20 + $0x60] sm:$0xff] %vm641_vm1, %v6134_v7  ;;  %v6104_v33 = vadd.f32 %v11698_v2, %v5840_v32 }
 0xfdf   : > { %v6137_v17 = vmax.f32 %v6105_v38, 0.0 }
 0xfe0   : > { %v6136_v49 = vmax.f32 %v6104_v33, 0.0  ;;  %v8118_v13 = vpop.f32.mrb[92].mxu0 }
 0xfe1   : > { %6169 = vst.msk [vmem:[%s11638_s20 + $0x78] sm:$0xff] %vm641_vm1, %v6137_v17  ;;  %v6107_v1 = vadd.f32 %v8118_v13, %v11622_v48  ;;  %v5915_v59 = vpop.f32.mrb[93].mxu0 }
 0xfe2   : > { %6168 = vst.msk [vmem:[%s11638_s20 + $0x70] sm:$0xff] %vm641_vm1, %v6136_v49  ;;  %v6106_v43 = vadd.f32 %v11620_v56, %v5915_v59 }
 0xfe3   : > { %v6139_v40 = vmax.f32 %v6107_v1, 0.0 }
 0xfe4   : > { %v6138_v35 = vmax.f32 %v6106_v43, 0.0  ;;  %v8121_v46 = vpop.f32.mrb[94].mxu0 }
 0xfe5   : > { %6171 = vst.msk [vmem:[%s11638_s20 + $0x88] sm:$0xff] %vm641_vm1, %v6139_v40  ;;  %v6109_v44 = vadd.f32 %v8121_v46, %v11624_v9  ;;  %v5925_v6 = vpop.f32.mrb[95].mxu0 }
 0xfe6   : > { %6170 = vst.msk [vmem:[%s11638_s20 + $0x80] sm:$0xff] %vm641_vm1, %v6138_v35  ;;  %v6108_v48 = vadd.f32 %v11626_v55, %v5925_v6 }
 0xfe7   : > { %v6141_v60 = vmax.f32 %v6109_v44, 0.0 }
 0xfe8   : > { %v6140_v31 = vmax.f32 %v6108_v48, 0.0  ;;  %v8124_v47 = vpop.f32.mrb[96].mxu0 }
 0xfe9   : > { %6173 = vst.msk [vmem:[%s11638_s20 + $0x98] sm:$0xff] %vm641_vm1, %v6141_v60  ;;  %v6111_v56 = vadd.f32 %v8124_v47, %v11628_v63  ;;  %v5935_v30 = vpop.f32.mrb[97].mxu0 }
 0xfea   : > { %6172 = vst.msk [vmem:[%s11638_s20 + $0x90] sm:$0xff] %vm641_vm1, %v6140_v31  ;;  %v6110_v9 = vadd.f32 %v11630_v50, %v5935_v30 }
 0xfeb   : > { %v6143_v53 = vmax.f32 %v6111_v56, 0.0 }
 0xfec   : > { %v6142_v54 = vmax.f32 %v6110_v9, 0.0  ;;  %v8127_v57 = vpop.f32.mrb[98].mxu0 }
 0xfed   : > { %6175 = vst.msk [vmem:[%s11638_s20 + $0xa8] sm:$0xff] %vm641_vm1, %v6143_v53  ;;  %v6113_v55 = vadd.f32 %v8127_v57, %v11641_v52  ;;  %v5945_v16 = vpop.f32.mrb[99].mxu0 }
 0xfee   : > { %6174 = vst.msk [vmem:[%s11638_s20 + $0xa0] sm:$0xff] %vm641_vm1, %v6142_v54  ;;  %v6112_v63 = vadd.f32 %v11646_v10, %v5945_v16 }
 0xfef   : > { %v6145_v3 = vmax.f32 %v6113_v55, 0.0 }
 0xff0   : > { %v6144_v12 = vmax.f32 %v6112_v63, 0.0  ;;  %v8130_v26 = vpop.f32.mrb[100].mxu0 }
 0xff1   : > { %6177 = vst.msk [vmem:[%s11638_s20 + $0xb8] sm:$0xff] %vm641_vm1, %v6145_v3  ;;  %v6115_v50 = vadd.f32 %v8130_v26, %v11651_v28  ;;  %v5955_v8 = vpop.f32.mrb[101].mxu0 }
 0xff2   : > { %6176 = vst.msk [vmem:[%s11638_s20 + $0xb0] sm:$0xff] %vm641_vm1, %v6144_v12  ;;  %v6114_v52 = vadd.f32 %v11659_v45, %v5955_v8 }
 0xff3   : > { %v6147_v4 = vmax.f32 %v6115_v50, 0.0 }
 0xff4   : > { %v6146_v11 = vmax.f32 %v6114_v52, 0.0  ;;  %v8133_v41 = vpop.f32.mrb[102].mxu0 }
 0xff5   : > { %6179 = vst.msk [vmem:[%s11638_s20 + $0xc8] sm:$0xff] %vm641_vm1, %v6147_v4  ;;  %v6117_v10 = vadd.f32 %v8133_v41, %v11667_v61  ;;  %v5965_v22 = vpop.f32.mrb[103].mxu0 }
 0xff6   : > { %6178 = vst.msk [vmem:[%s11638_s20 + $0xc0] sm:$0xff] %vm641_vm1, %v6146_v11  ;;  %v6116_v28 = vadd.f32 %v11672_v21, %v5965_v22 }
 0xff7   : > { %v6149_v62 = vmax.f32 %v6117_v10, 0.0 }
 0xff8   : > { %v6148_v0 = vmax.f32 %v6116_v28, 0.0  ;;  %v8136_v34 = vpop.f32.mrb[104].mxu0 }
 0xff9   : > { %6181 = vst.msk [vmem:[%s11638_s20 + $0xd8] sm:$0xff] %vm641_vm1, %v6149_v62  ;;  %v6119_v45 = vadd.f32 %v8136_v34, %v11677_v18  ;;  %v5975_v51 = vpop.f32.mrb[105].mxu0 }
 0xffa   : > { %6180 = vst.msk [vmem:[%s11638_s20 + $0xd0] sm:$0xff] %vm641_vm1, %v6148_v0  ;;  %v6118_v61 = vadd.f32 %v11685_v20, %v5975_v51 }
 0xffb   : > { %v6151_v39 = vmax.f32 %v6119_v45, 0.0 }
 0xffc   : > { %v6150_v27 = vmax.f32 %v6118_v61, 0.0  ;;  %v8139_v29 = vpop.f32.mrb[106].mxu0 }
 0xffd   : > { %6183 = vst.msk [vmem:[%s11638_s20 + $0xe8] sm:$0xff] %vm641_vm1, %v6151_v39  ;;  %v6121_v21 = vadd.f32 %v8139_v29, %v11693_v42  ;;  %v5985_v19 = vpop.f32.mrb[107].mxu0 }
 0xffe   : > { %6182 = vst.msk [vmem:[%s11638_s20 + $0xe0] sm:$0xff] %vm641_vm1, %v6150_v27  ;;  %v6120_v15 = vadd.f32 %v11698_v2, %v5985_v19 }
 0xfff   : > { %v6153_v36 = vmax.f32 %v6121_v21, 0.0 }
0x1000   : > { %v6152_v25 = vmax.f32 %v6120_v15, 0.0 }
0x1001   : > { %6185 = vst.msk [vmem:[%s11638_s20 + $0xf8] sm:$0xff] %vm641_vm1, %v6153_v36 }
0x1002   : > { %6184 = vst.msk [vmem:[%s11638_s20 + $0xf0] sm:$0xff] %vm641_vm1, %v6152_v25 }
0x1003 PF: > { %s23_s21 = sadd.s32 1, %s9475_s21  }
0x1004   : > { %p20_p4 = scmp.ge.s32.totalorder %s23_s21, 4  }
0x1006   :  { %22 = sbr.rel (!%p20_p4) target bundleno = 1 (0x1), region = 135 }

</bundles_post_ra>
